<compile_context>
chip_gen: v7x
topology: tpu7x:2x2x1
jax: 0.10.0
libtpu: 0.0.40
codegen_flags: <defaults>
</compile_context>

<pallas_src>
import jax
import jax.numpy as jnp
import numpy as np
from jax.experimental import pallas as pl
from jax.experimental.pallas import tpu as pltpu


# -----------------------------------------------------------------------------
# Fused conv-features + multi-layer-LSTM kernel (single grid step)
# -----------------------------------------------------------------------------
def _make_env_kernel(T, B, C, H, L, Dmax):
    H4 = 4 * H

    def kernel(patches_ref, w1b_ref, b1_ref, w2_ref, b2_ref, wl_ref, bl_ref,
               y_ref, hn_ref, cn_ref, feat_sc, xh_sc, h_sc, c_sc):
        # ---------------- conv path: two MXU matmuls ----------------
        # conv1 over all spatial positions at once (block-diagonal weight) + ReLU
        y1 = jnp.dot(patches_ref[...], w1b_ref[...],
                     preferred_element_type=jnp.float32)            # (N, P*C)
        y1 = jnp.maximum(y1 + b1_ref[...], 0.0)
        # conv2 == full-spatial contraction over (position, channel) + ReLU
        feat = jnp.dot(y1.astype(jnp.bfloat16), w2_ref[...],
                       preferred_element_type=jnp.float32)           # (N, C)
        feat = jnp.maximum(feat + b2_ref[...], 0.0)
        feat_bf = feat.astype(jnp.bfloat16)                          # rows: n = t*B + b
        for t in range(T):                                           # static, T small
            feat_sc[t] = feat_bf[t * B:(t + 1) * B, :]

        # ---------------- LSTM over time, fully in-kernel ----------------
        h_sc[...] = jnp.zeros_like(h_sc)
        c_sc[...] = jnp.zeros_like(c_sc)
        xh_sc[...] = jnp.zeros_like(xh_sc)   # zero once: dead cols hit zero weight rows

        def step(t, carry):
            xh_sc[:, 0:C] = feat_sc[t]                               # layer-0 input
            h_last = None
            for l in range(L):                                       # L is static
                xh_sc[:, Dmax:] = h_sc[l].astype(jnp.bfloat16)
                gates = (jnp.dot(xh_sc[...], wl_ref[l],
                                 preferred_element_type=jnp.float32)
                         + bl_ref[l])                                # (B, 4H): i,f,g,o
                i_g = jax.nn.sigmoid(gates[:, 0:H])
                f_g = jax.nn.sigmoid(gates[:, H:2 * H])
                g_g = jnp.tanh(gates[:, 2 * H:3 * H])
                o_g = jax.nn.sigmoid(gates[:, 3 * H:H4])
                c_new = f_g * c_sc[l] + i_g * g_g
                h_last = o_g * jnp.tanh(c_new)
                h_sc[l] = h_last
                c_sc[l] = c_new
                if l + 1 < L:                                        # next layer input
                    xh_sc[:, 0:H] = h_last.astype(jnp.bfloat16)
            y_ref[t] = h_last            # VMEM store; single HBM writeback at step end
            return carry

        jax.lax.fori_loop(0, T, step, 0, unroll=True)
        hn_ref[...] = h_sc[...]
        cn_ref[...] = c_sc[...]

    return kernel


# -----------------------------------------------------------------------------
# Wrapper: parameter setup, im2col, forward mirroring EnvironmentNet.forward
# -----------------------------------------------------------------------------
def _uniform(key, shape, fan_in):
    bound = 1.0 / np.sqrt(fan_in)
    return jax.random.uniform(key, shape, jnp.float32, -bound, bound)


def _im2col_flat(x, k):
    """x: (N, Cin, Hh, Ww) -> (N, P*K); column index = p*K + (cin*k*k + di*k + dj)."""
    N, Cin, Hh, Ww = x.shape
    H1, W1 = Hh - k + 1, Ww - k + 1
    cols = jnp.stack([x[:, :, di:di + H1, dj:dj + W1]
                      for di in range(k) for dj in range(k)], axis=-1)  # (N,Cin,H1,W1,k*k)
    cols = jnp.transpose(cols, (0, 2, 3, 1, 4))                         # (N,H1,W1,Cin,k*k)
    return cols.reshape(N, H1 * W1 * Cin * k * k)                       # contiguous slab


class EnvironmentNetPallas:
    def __init__(self, height, goal_num, env_conv_channel_size, states_num,
                 layers_num, key):
        k = 4
        C = env_conv_channel_size
        H = states_num
        L = layers_num
        k2 = height - k + 1                      # conv2 kernel == conv1 output extent
        P = k2 * k2
        K = goal_num * k * k
        self.kernel_size = k
        self.conv_channels = C
        self.hidden_size = H
        self.layers_num = L
        self.num_pos = P

        keys = jax.random.split(key, 4 + 4 * L)
        # PyTorch-layout parameters (kept in f32 for the reference path)
        self.w1 = _uniform(keys[0], (C, goal_num, k, k), K)
        self.b1 = _uniform(keys[1], (C,), K)
        self.w2 = _uniform(keys[2], (C, C, k2, k2), C * P)
        self.b2 = _uniform(keys[3], (C,), C * P)
        self.lstm_params = []
        for l in range(L):
            in_l = C if l == 0 else H
            kk = keys[4 + 4 * l: 8 + 4 * l]
            self.lstm_params.append((
                _uniform(kk[0], (4 * H, in_l), H),    # w_ih (4H, in_l)
                _uniform(kk[1], (4 * H, H), H),       # w_hh (4H, H)
                _uniform(kk[2], (4 * H,), H),         # b_ih
                _uniform(kk[3], (4 * H,), H),         # b_hh
            ))

        # ---- kernel-side re-arrangements (one-time glue; bf16 matmul operands) ----
        w1_mat = self.w1.reshape(C, K).T                                    # (K, C)
        self.w1_blk = jnp.kron(jnp.eye(P, dtype=jnp.float32),
                               w1_mat).astype(jnp.bfloat16)                 # (P*K, P*C)
        self.b1_k = jnp.tile(self.b1, P).reshape(1, P * C)                  # f32
        w2r = jnp.transpose(self.w2.reshape(C, C, P), (2, 1, 0))            # (P, Cin, Cout)
        self.w2_flat = w2r.reshape(P * C, C).astype(jnp.bfloat16)           # (P*C, C)
        self.b2_k = self.b2.reshape(1, C)                                   # f32

        # Fused per-layer LSTM weight: rows [0:in_l]=w_ih^T, [in_l:Dmax]=0, [Dmax:]=w_hh^T
        Dmax = max(C, H)
        self.d_max = Dmax
        wl, bl = [], []
        for l in range(L):
            w_ih, w_hh, b_ih, b_hh = self.lstm_params[l]
            in_l = w_ih.shape[1]
            w_ih_pad = jnp.zeros((Dmax, 4 * H), jnp.float32).at[:in_l, :].set(w_ih.T)
            wl.append(jnp.concatenate([w_ih_pad, w_hh.T], axis=0))          # (Dmax+H, 4H)
            bl.append((b_ih + b_hh).reshape(1, 4 * H))
        self.wl = jnp.stack(wl).astype(jnp.bfloat16)                        # (L, Dmax+H, 4H)
        self.bl = jnp.stack(bl)                                             # (L, 1, 4H) f32

    def __call__(self, x):
        B, T, G, Hh, Ww = x.shape
        k = self.kernel_size
        C = self.conv_channels
        H = self.hidden_size
        L = self.layers_num
        P = self.num_pos
        K = G * k * k
        Dmax = self.d_max
        N = T * B

        # time-major frames so row n = t*B + b; im2col into one contiguous (N, P*K) slab
        xf = jnp.transpose(x, (1, 0, 2, 3, 4)).reshape(N, G, Hh, Ww).astype(jnp.float32)
        patches = _im2col_flat(xf, k).astype(jnp.bfloat16)                  # (N, P*K)

        kernel = _make_env_kernel(T, B, C, H, L, Dmax)
        y, h_n, c_n = pl.pallas_call(
            kernel,
            out_shape=(jax.ShapeDtypeStruct((T, B, H), jnp.float32),
                       jax.ShapeDtypeStruct((L, B, H), jnp.float32),
                       jax.ShapeDtypeStruct((L, B, H), jnp.float32)),
            grid_spec=pltpu.PrefetchScalarGridSpec(
                num_scalar_prefetch=0,
                grid=(1,),
                in_specs=[
                    pl.BlockSpec((N, P * K), lambda i: (0, 0)),
                    pl.BlockSpec((P * K, P * C), lambda i: (0, 0)),
                    pl.BlockSpec((1, P * C), lambda i: (0, 0)),
                    pl.BlockSpec((P * C, C), lambda i: (0, 0)),
                    pl.BlockSpec((1, C), lambda i: (0, 0)),
                    pl.BlockSpec((L, Dmax + H, 4 * H), lambda i: (0, 0, 0)),
                    pl.BlockSpec((L, 1, 4 * H), lambda i: (0, 0, 0)),
                ],
                out_specs=(pl.BlockSpec((T, B, H), lambda i: (0, 0, 0)),
                           pl.BlockSpec((L, B, H), lambda i: (0, 0, 0)),
                           pl.BlockSpec((L, B, H), lambda i: (0, 0, 0))),
                scratch_shapes=[pltpu.VMEM((T, B, C), jnp.bfloat16),      # feat per step
                                pltpu.VMEM((B, Dmax + H), jnp.bfloat16),  # fused [x, h]
                                pltpu.VMEM((L, B, H), jnp.float32),       # h state
                                pltpu.VMEM((L, B, H), jnp.float32)],      # c state
            ),
            compiler_params=pltpu.CompilerParams(
                dimension_semantics=("arbitrary",)),
        )(patches, self.w1_blk, self.b1_k, self.w2_flat, self.b2_k,
          self.wl, self.bl)

        env_belief = jnp.transpose(y, (1, 0, 2))      # (B, T, H), batch_first
        return env_belief, (h_n, c_n)


# -----------------------------------------------------------------------------
# Pure-JAX f32 reference mirroring the PyTorch forward (validation only)
# -----------------------------------------------------------------------------
def reference_forward(net, x):
    B, T, G, Hh, Ww = x.shape
    xf = x.reshape(B * T, G, Hh, Ww).astype(jnp.float32)
    dn = ('NCHW', 'OIHW', 'NCHW')
    y = jax.lax.conv_general_dilated(xf, net.w1, (1, 1), 'VALID',
                                     dimension_numbers=dn) + net.b1[None, :, None, None]
    y = jnp.maximum(y, 0.0)
    y = jax.lax.conv_general_dilated(y, net.w2, (1, 1), 'VALID',
                                     dimension_numbers=dn) + net.b2[None, :, None, None]
    y = jnp.maximum(y, 0.0)
    seq = y.reshape(B, T, -1)

    H, L = net.hidden_size, net.layers_num
    h = jnp.zeros((L, B, H), jnp.float32)
    c = jnp.zeros((L, B, H), jnp.float32)
    ys = []
    for t in range(T):
        xt = seq[:, t, :]
        new_h, new_c = [], []
        for l in range(L):
            w_ih, w_hh, b_ih, b_hh = net.lstm_params[l]
            gates = xt @ w_ih.T + h[l] @ w_hh.T + b_ih + b_hh
            i = jax.nn.sigmoid(gates[:, 0:H])
            f = jax.nn.sigmoid(gates[:, H:2 * H])
            g = jnp.tanh(gates[:, 2 * H:3 * H])
            o = jax.nn.sigmoid(gates[:, 3 * H:4 * H])
            c_l = f * c[l] + i * g
            h_l = o * jnp.tanh(c_l)
            new_h.append(h_l)
            new_c.append(c_l)
            xt = h_l
        h = jnp.stack(new_h)
        c = jnp.stack(new_c)
        ys.append(h[-1])
    return jnp.stack(ys, axis=1), (h, c)


if __name__ == "__main__":
    height = 8
    goal_num = 4
    env_conv_channel_size = 8
    states_num = 16
    layers_num = 2
    batch = 2
    episode_len = 4

    root = jax.random.PRNGKey(0)
    k_param, k_x = jax.random.split(root)

    net = EnvironmentNetPallas(height, goal_num, env_conv_channel_size,
                               states_num, layers_num, k_param)

    # x: (batch, episode_len, goal_num, height, height)
    x = jax.random.normal(k_x, (batch, episode_len, goal_num, height, height),
                          dtype=jnp.float32)

    env_belief, (h_n, c_n) = net(x)
    jax.block_until_ready((env_belief, h_n, c_n))

    # sanity check vs pure-JAX f32 reference (kernel uses bf16 matmul operands,
    # f32 accumulation -> slightly looser tolerance than a pure-f32 kernel)
    ref_belief, (ref_h, ref_c) = reference_forward(net, x)
    assert env_belief.shape == (batch, episode_len, states_num)
    assert h_n.shape == (layers_num, batch, states_num)
    assert c_n.shape == (layers_num, batch, states_num)
    np.testing.assert_allclose(np.asarray(env_belief), np.asarray(ref_belief),
                               rtol=2e-2, atol=2e-2)
    np.testing.assert_allclose(np.asarray(h_n), np.asarray(ref_h),
                               rtol=2e-2, atol=2e-2)
    np.testing.assert_allclose(np.asarray(c_n), np.asarray(ref_c),
                               rtol=2e-2, atol=2e-2)

    print("KERNEL_OK")
</pallas_src>

<mosaic_0001>
module attributes {stable_mosaic.version = 11 : i64} {
  func.func @kernel(%arg0: i32, %arg1: memref<8x1600xbf16, #tpu.memory_space<vmem>>, %arg2: memref<1600x200xbf16, #tpu.memory_space<vmem>>, %arg3: memref<1x200xf32, #tpu.memory_space<vmem>>, %arg4: memref<200x8xbf16, #tpu.memory_space<vmem>>, %arg5: memref<1x8xf32, #tpu.memory_space<vmem>>, %arg6: memref<2x32x64xbf16, #tpu.memory_space<vmem>>, %arg7: memref<2x1x64xf32, #tpu.memory_space<vmem>>, %arg8: memref<4x2x16xf32, #tpu.memory_space<vmem>>, %arg9: memref<2x2x16xf32, #tpu.memory_space<vmem>>, %arg10: memref<2x2x16xf32, #tpu.memory_space<vmem>>, %arg11: memref<4x2x8xbf16, #tpu.memory_space<vmem>>, %arg12: memref<2x32xbf16, #tpu.memory_space<vmem>>, %arg13: memref<2x2x16xf32, #tpu.memory_space<vmem>>, %arg14: memref<2x2x16xf32, #tpu.memory_space<vmem>>) attributes {dimension_semantics = [#tpu.dimension_semantics<arbitrary>], iteration_bounds = array<i64: 1>, scalar_prefetch = 0 : i64, scratch_operands = 4 : i64, tpu.core_type = #tpu.core_type<tc>, window_params = [{pipeline_mode = #tpu.pipeline_mode<synchronous>, transform_indices = @transform_0, window_bounds = array<i64: 8, 1600>}, {pipeline_mode = #tpu.pipeline_mode<synchronous>, transform_indices = @transform_1, window_bounds = array<i64: 1600, 200>}, {pipeline_mode = #tpu.pipeline_mode<synchronous>, transform_indices = @transform_2, window_bounds = array<i64: 1, 200>}, {pipeline_mode = #tpu.pipeline_mode<synchronous>, transform_indices = @transform_3, window_bounds = array<i64: 200, 8>}, {pipeline_mode = #tpu.pipeline_mode<synchronous>, transform_indices = @transform_4, window_bounds = array<i64: 1, 8>}, {pipeline_mode = #tpu.pipeline_mode<synchronous>, transform_indices = @transform_5, window_bounds = array<i64: 2, 32, 64>}, {pipeline_mode = #tpu.pipeline_mode<synchronous>, transform_indices = @transform_6, window_bounds = array<i64: 2, 1, 64>}, {pipeline_mode = #tpu.pipeline_mode<synchronous>, transform_indices = @transform_7, window_bounds = array<i64: 4, 2, 16>}, {pipeline_mode = #tpu.pipeline_mode<synchronous>, transform_indices = @transform_8, window_bounds = array<i64: 2, 2, 16>}, {pipeline_mode = #tpu.pipeline_mode<synchronous>, transform_indices = @transform_9, window_bounds = array<i64: 2, 2, 16>}]} {
    %c0 = arith.constant 0 : index
    %c0_0 = arith.constant 0 : index
    %0 = vector.load %arg1[%c0, %c0_0] : memref<8x1600xbf16, #tpu.memory_space<vmem>>, vector<8x1600xbf16>
    %c0_1 = arith.constant 0 : index
    %c0_2 = arith.constant 0 : index
    %1 = vector.load %arg2[%c0_1, %c0_2] : memref<1600x200xbf16, #tpu.memory_space<vmem>>, vector<1600x200xbf16>
    %cst = arith.constant dense<0.000000e+00> : vector<8x200xf32>
    %2 = tpu.matmul %0, %1, %cst {dimension_numbers = #tpu.dot_dimension_numbers<[1], [0], [0], [1], [0, 0, 1, 1], [], []>} : vector<8x1600xbf16>, vector<1600x200xbf16>, vector<8x200xf32> -> vector<8x200xf32>
    %c0_3 = arith.constant 0 : index
    %c0_4 = arith.constant 0 : index
    %3 = vector.load %arg3[%c0_3, %c0_4] : memref<1x200xf32, #tpu.memory_space<vmem>>, vector<1x200xf32>
    %4 = vector.broadcast %3 : vector<1x200xf32> to vector<8x200xf32>
    %5 = arith.addf %2, %4 : vector<8x200xf32>
    %cst_5 = arith.constant 0.000000e+00 : f32
    %6 = vector.broadcast %cst_5 : f32 to vector<8x200xf32>
    %7 = arith.maximumf %5, %6 : vector<8x200xf32>
    %8 = arith.truncf %7 : vector<8x200xf32> to vector<8x200xbf16>
    %c0_6 = arith.constant 0 : index
    %c0_7 = arith.constant 0 : index
    %9 = vector.load %arg4[%c0_6, %c0_7] : memref<200x8xbf16, #tpu.memory_space<vmem>>, vector<200x8xbf16>
    %cst_8 = arith.constant dense<0.000000e+00> : vector<8x8xf32>
    %10 = tpu.matmul %8, %9, %cst_8 {dimension_numbers = #tpu.dot_dimension_numbers<[1], [0], [0], [1], [0, 0, 1, 1], [], []>} : vector<8x200xbf16>, vector<200x8xbf16>, vector<8x8xf32> -> vector<8x8xf32>
    %c0_9 = arith.constant 0 : index
    %c0_10 = arith.constant 0 : index
    %11 = vector.load %arg5[%c0_9, %c0_10] : memref<1x8xf32, #tpu.memory_space<vmem>>, vector<1x8xf32>
    %12 = vector.broadcast %11 : vector<1x8xf32> to vector<8x8xf32>
    %13 = arith.addf %10, %12 : vector<8x8xf32>
    %cst_11 = arith.constant 0.000000e+00 : f32
    %14 = vector.broadcast %cst_11 : f32 to vector<8x8xf32>
    %15 = arith.maximumf %13, %14 : vector<8x8xf32>
    %16 = arith.truncf %15 : vector<8x8xf32> to vector<8x8xbf16>
    %17 = vector.extract_strided_slice %16 {offsets = [0, 0], sizes = [2, 8], strides = [1, 1]} : vector<8x8xbf16> to vector<2x8xbf16>
    %c0_12 = arith.constant 0 : index
    %c0_13 = arith.constant 0 : index
    %c0_14 = arith.constant 0 : index
    %18 = vector.load %arg11[%c0_12, %c0_13, %c0_14] : memref<4x2x8xbf16, #tpu.memory_space<vmem>>, vector<1x2x8xbf16>
    %19 = vector.shape_cast %18 : vector<1x2x8xbf16> to vector<2x8xbf16>
    %20 = vector.shape_cast %17 : vector<2x8xbf16> to vector<1x2x8xbf16>
    tpu.vector_store %arg11[%c0_12, %c0_13, %c0_14], %20 {strides = array<i32>} : memref<4x2x8xbf16, #tpu.memory_space<vmem>>, vector<1x2x8xbf16>,
    %21 = vector.extract_strided_slice %16 {offsets = [2, 0], sizes = [2, 8], strides = [1, 1]} : vector<8x8xbf16> to vector<2x8xbf16>
    %c1 = arith.constant 1 : index
    %c0_15 = arith.constant 0 : index
    %c0_16 = arith.constant 0 : index
    %22 = vector.load %arg11[%c1, %c0_15, %c0_16] : memref<4x2x8xbf16, #tpu.memory_space<vmem>>, vector<1x2x8xbf16>
    %23 = vector.shape_cast %22 : vector<1x2x8xbf16> to vector<2x8xbf16>
    %24 = vector.shape_cast %21 : vector<2x8xbf16> to vector<1x2x8xbf16>
    tpu.vector_store %arg11[%c1, %c0_15, %c0_16], %24 {strides = array<i32>} : memref<4x2x8xbf16, #tpu.memory_space<vmem>>, vector<1x2x8xbf16>,
    %25 = vector.extract_strided_slice %16 {offsets = [4, 0], sizes = [2, 8], strides = [1, 1]} : vector<8x8xbf16> to vector<2x8xbf16>
    %c2 = arith.constant 2 : index
    %c0_17 = arith.constant 0 : index
    %c0_18 = arith.constant 0 : index
    %26 = vector.load %arg11[%c2, %c0_17, %c0_18] : memref<4x2x8xbf16, #tpu.memory_space<vmem>>, vector<1x2x8xbf16>
    %27 = vector.shape_cast %26 : vector<1x2x8xbf16> to vector<2x8xbf16>
    %28 = vector.shape_cast %25 : vector<2x8xbf16> to vector<1x2x8xbf16>
    tpu.vector_store %arg11[%c2, %c0_17, %c0_18], %28 {strides = array<i32>} : memref<4x2x8xbf16, #tpu.memory_space<vmem>>, vector<1x2x8xbf16>,
    %29 = vector.extract_strided_slice %16 {offsets = [6, 0], sizes = [2, 8], strides = [1, 1]} : vector<8x8xbf16> to vector<2x8xbf16>
    %c3 = arith.constant 3 : index
    %c0_19 = arith.constant 0 : index
    %c0_20 = arith.constant 0 : index
    %30 = vector.load %arg11[%c3, %c0_19, %c0_20] : memref<4x2x8xbf16, #tpu.memory_space<vmem>>, vector<1x2x8xbf16>
    %31 = vector.shape_cast %30 : vector<1x2x8xbf16> to vector<2x8xbf16>
    %32 = vector.shape_cast %29 : vector<2x8xbf16> to vector<1x2x8xbf16>
    tpu.vector_store %arg11[%c3, %c0_19, %c0_20], %32 {strides = array<i32>} : memref<4x2x8xbf16, #tpu.memory_space<vmem>>, vector<1x2x8xbf16>,
    %cst_21 = arith.constant 0.000000e+00 : f32
    %33 = vector.broadcast %cst_21 : f32 to vector<2x2x16xf32>
    %c0_22 = arith.constant 0 : index
    %c0_23 = arith.constant 0 : index
    %c0_24 = arith.constant 0 : index
    %34 = vector.load %arg13[%c0_22, %c0_23, %c0_24] : memref<2x2x16xf32, #tpu.memory_space<vmem>>, vector<2x2x16xf32>
    tpu.vector_store %arg13[%c0_22, %c0_23, %c0_24], %33 {strides = array<i32>} : memref<2x2x16xf32, #tpu.memory_space<vmem>>, vector<2x2x16xf32>,
    %cst_25 = arith.constant 0.000000e+00 : f32
    %35 = vector.broadcast %cst_25 : f32 to vector<2x2x16xf32>
    %c0_26 = arith.constant 0 : index
    %c0_27 = arith.constant 0 : index
    %c0_28 = arith.constant 0 : index
    %36 = vector.load %arg14[%c0_26, %c0_27, %c0_28] : memref<2x2x16xf32, #tpu.memory_space<vmem>>, vector<2x2x16xf32>
    tpu.vector_store %arg14[%c0_26, %c0_27, %c0_28], %35 {strides = array<i32>} : memref<2x2x16xf32, #tpu.memory_space<vmem>>, vector<2x2x16xf32>,
    %cst_29 = arith.constant 0.000000e+00 : bf16
    %37 = vector.broadcast %cst_29 : bf16 to vector<2x32xbf16>
    %c0_30 = arith.constant 0 : index
    %c0_31 = arith.constant 0 : index
    %38 = vector.load %arg12[%c0_30, %c0_31] : memref<2x32xbf16, #tpu.memory_space<vmem>>, vector<2x32xbf16>
    tpu.vector_store %arg12[%c0_30, %c0_31], %37 {strides = array<i32>} : memref<2x32xbf16, #tpu.memory_space<vmem>>, vector<2x32xbf16>,
    %c0_i32 = arith.constant 0 : i32
    %39 = arith.index_cast %c0_i32 : i32 to index
    %c0_32 = arith.constant 0 : index
    %c0_33 = arith.constant 0 : index
    %40 = vector.load %arg11[%39, %c0_32, %c0_33] : memref<4x2x8xbf16, #tpu.memory_space<vmem>>, vector<1x2x8xbf16>
    %41 = vector.shape_cast %40 : vector<1x2x8xbf16> to vector<2x8xbf16>
    %c0_34 = arith.constant 0 : index
    %c0_35 = arith.constant 0 : index
    %42 = vector.load %arg12[%c0_34, %c0_35] : memref<2x32xbf16, #tpu.memory_space<vmem>>, vector<2x8xbf16>
    tpu.vector_store %arg12[%c0_34, %c0_35], %41 {strides = array<i32>} : memref<2x32xbf16, #tpu.memory_space<vmem>>, vector<2x8xbf16>,
    %c0_36 = arith.constant 0 : index
    %c0_37 = arith.constant 0 : index
    %c0_38 = arith.constant 0 : index
    %43 = vector.load %arg13[%c0_36, %c0_37, %c0_38] : memref<2x2x16xf32, #tpu.memory_space<vmem>>, vector<1x2x16xf32>
    %44 = vector.shape_cast %43 : vector<1x2x16xf32> to vector<2x16xf32>
    %45 = arith.truncf %44 : vector<2x16xf32> to vector<2x16xbf16>
    %c0_39 = arith.constant 0 : index
    %c16 = arith.constant 16 : index
    %46 = vector.load %arg12[%c0_39, %c16] : memref<2x32xbf16, #tpu.memory_space<vmem>>, vector<2x16xbf16>
    tpu.vector_store %arg12[%c0_39, %c16], %45 {strides = array<i32>} : memref<2x32xbf16, #tpu.memory_space<vmem>>, vector<2x16xbf16>,
    %c0_40 = arith.constant 0 : index
    %c0_41 = arith.constant 0 : index
    %47 = vector.load %arg12[%c0_40, %c0_41] : memref<2x32xbf16, #tpu.memory_space<vmem>>, vector<2x32xbf16>
    %c0_42 = arith.constant 0 : index
    %c0_43 = arith.constant 0 : index
    %c0_44 = arith.constant 0 : index
    %48 = vector.load %arg6[%c0_42, %c0_43, %c0_44] : memref<2x32x64xbf16, #tpu.memory_space<vmem>>, vector<1x32x64xbf16>
    %49 = vector.shape_cast %48 : vector<1x32x64xbf16> to vector<32x64xbf16>
    %cst_45 = arith.constant dense<0.000000e+00> : vector<2x64xf32>
    %50 = tpu.matmul %47, %49, %cst_45 {dimension_numbers = #tpu.dot_dimension_numbers<[1], [0], [0], [1], [0, 0, 1, 1], [], []>} : vector<2x32xbf16>, vector<32x64xbf16>, vector<2x64xf32> -> vector<2x64xf32>
    %c0_46 = arith.constant 0 : index
    %c0_47 = arith.constant 0 : index
    %c0_48 = arith.constant 0 : index
    %51 = vector.load %arg7[%c0_46, %c0_47, %c0_48] : memref<2x1x64xf32, #tpu.memory_space<vmem>>, vector<1x1x64xf32>
    %52 = vector.shape_cast %51 : vector<1x1x64xf32> to vector<1x64xf32>
    %53 = vector.broadcast %52 : vector<1x64xf32> to vector<2x64xf32>
    %54 = arith.addf %50, %53 : vector<2x64xf32>
    %55 = vector.extract_strided_slice %54 {offsets = [0, 0], sizes = [2, 16], strides = [1, 1]} : vector<2x64xf32> to vector<2x16xf32>
    %56 = arith.negf %55 : vector<2x16xf32>
    %57 = math.exp %56 : vector<2x16xf32>
    %cst_49 = arith.constant 1.000000e+00 : f32
    %58 = vector.broadcast %cst_49 : f32 to vector<2x16xf32>
    %59 = arith.addf %58, %57 : vector<2x16xf32>
    %60 = arith.divf %58, %59 : vector<2x16xf32>
    %61 = vector.extract_strided_slice %54 {offsets = [0, 16], sizes = [2, 16], strides = [1, 1]} : vector<2x64xf32> to vector<2x16xf32>
    %62 = arith.negf %61 : vector<2x16xf32>
    %63 = math.exp %62 : vector<2x16xf32>
    %cst_50 = arith.constant 1.000000e+00 : f32
    %64 = vector.broadcast %cst_50 : f32 to vector<2x16xf32>
    %65 = arith.addf %64, %63 : vector<2x16xf32>
    %66 = arith.divf %64, %65 : vector<2x16xf32>
    %67 = vector.extract_strided_slice %54 {offsets = [0, 32], sizes = [2, 16], strides = [1, 1]} : vector<2x64xf32> to vector<2x16xf32>
    %68 = math.tanh %67 : vector<2x16xf32>
    %69 = vector.extract_strided_slice %54 {offsets = [0, 48], sizes = [2, 16], strides = [1, 1]} : vector<2x64xf32> to vector<2x16xf32>
    %70 = arith.negf %69 : vector<2x16xf32>
    %71 = math.exp %70 : vector<2x16xf32>
    %cst_51 = arith.constant 1.000000e+00 : f32
    %72 = vector.broadcast %cst_51 : f32 to vector<2x16xf32>
    %73 = arith.addf %72, %71 : vector<2x16xf32>
    %74 = arith.divf %72, %73 : vector<2x16xf32>
    %c0_52 = arith.constant 0 : index
    %c0_53 = arith.constant 0 : index
    %c0_54 = arith.constant 0 : index
    %75 = vector.load %arg14[%c0_52, %c0_53, %c0_54] : memref<2x2x16xf32, #tpu.memory_space<vmem>>, vector<1x2x16xf32>
    %76 = vector.shape_cast %75 : vector<1x2x16xf32> to vector<2x16xf32>
    %77 = arith.mulf %66, %76 : vector<2x16xf32>
    %78 = arith.mulf %60, %68 : vector<2x16xf32>
    %79 = arith.addf %77, %78 : vector<2x16xf32>
    %80 = math.tanh %79 : vector<2x16xf32>
    %81 = arith.mulf %74, %80 : vector<2x16xf32>
    %c0_55 = arith.constant 0 : index
    %c0_56 = arith.constant 0 : index
    %c0_57 = arith.constant 0 : index
    %82 = vector.load %arg13[%c0_55, %c0_56, %c0_57] : memref<2x2x16xf32, #tpu.memory_space<vmem>>, vector<1x2x16xf32>
    %83 = vector.shape_cast %82 : vector<1x2x16xf32> to vector<2x16xf32>
    %84 = vector.shape_cast %81 : vector<2x16xf32> to vector<1x2x16xf32>
    tpu.vector_store %arg13[%c0_55, %c0_56, %c0_57], %84 {strides = array<i32>} : memref<2x2x16xf32, #tpu.memory_space<vmem>>, vector<1x2x16xf32>,
    %c0_58 = arith.constant 0 : index
    %c0_59 = arith.constant 0 : index
    %c0_60 = arith.constant 0 : index
    %85 = vector.load %arg14[%c0_58, %c0_59, %c0_60] : memref<2x2x16xf32, #tpu.memory_space<vmem>>, vector<1x2x16xf32>
    %86 = vector.shape_cast %85 : vector<1x2x16xf32> to vector<2x16xf32>
    %87 = vector.shape_cast %79 : vector<2x16xf32> to vector<1x2x16xf32>
    tpu.vector_store %arg14[%c0_58, %c0_59, %c0_60], %87 {strides = array<i32>} : memref<2x2x16xf32, #tpu.memory_space<vmem>>, vector<1x2x16xf32>,
    %88 = arith.truncf %81 : vector<2x16xf32> to vector<2x16xbf16>
    %c0_61 = arith.constant 0 : index
    %c0_62 = arith.constant 0 : index
    %89 = vector.load %arg12[%c0_61, %c0_62] : memref<2x32xbf16, #tpu.memory_space<vmem>>, vector<2x16xbf16>
    tpu.vector_store %arg12[%c0_61, %c0_62], %88 {strides = array<i32>} : memref<2x32xbf16, #tpu.memory_space<vmem>>, vector<2x16xbf16>,
    %c1_63 = arith.constant 1 : index
    %c0_64 = arith.constant 0 : index
    %c0_65 = arith.constant 0 : index
    %90 = vector.load %arg13[%c1_63, %c0_64, %c0_65] : memref<2x2x16xf32, #tpu.memory_space<vmem>>, vector<1x2x16xf32>
    %91 = vector.shape_cast %90 : vector<1x2x16xf32> to vector<2x16xf32>
    %92 = arith.truncf %91 : vector<2x16xf32> to vector<2x16xbf16>
    %c0_66 = arith.constant 0 : index
    %c16_67 = arith.constant 16 : index
    %93 = vector.load %arg12[%c0_66, %c16_67] : memref<2x32xbf16, #tpu.memory_space<vmem>>, vector<2x16xbf16>
    tpu.vector_store %arg12[%c0_66, %c16_67], %92 {strides = array<i32>} : memref<2x32xbf16, #tpu.memory_space<vmem>>, vector<2x16xbf16>,
    %c0_68 = arith.constant 0 : index
    %c0_69 = arith.constant 0 : index
    %94 = vector.load %arg12[%c0_68, %c0_69] : memref<2x32xbf16, #tpu.memory_space<vmem>>, vector<2x32xbf16>
    %c1_70 = arith.constant 1 : index
    %c0_71 = arith.constant 0 : index
    %c0_72 = arith.constant 0 : index
    %95 = vector.load %arg6[%c1_70, %c0_71, %c0_72] : memref<2x32x64xbf16, #tpu.memory_space<vmem>>, vector<1x32x64xbf16>
    %96 = vector.shape_cast %95 : vector<1x32x64xbf16> to vector<32x64xbf16>
    %cst_73 = arith.constant dense<0.000000e+00> : vector<2x64xf32>
    %97 = tpu.matmul %94, %96, %cst_73 {dimension_numbers = #tpu.dot_dimension_numbers<[1], [0], [0], [1], [0, 0, 1, 1], [], []>} : vector<2x32xbf16>, vector<32x64xbf16>, vector<2x64xf32> -> vector<2x64xf32>
    %c1_74 = arith.constant 1 : index
    %c0_75 = arith.constant 0 : index
    %c0_76 = arith.constant 0 : index
    %98 = vector.load %arg7[%c1_74, %c0_75, %c0_76] : memref<2x1x64xf32, #tpu.memory_space<vmem>>, vector<1x1x64xf32>
    %99 = vector.shape_cast %98 : vector<1x1x64xf32> to vector<1x64xf32>
    %100 = vector.broadcast %99 : vector<1x64xf32> to vector<2x64xf32>
    %101 = arith.addf %97, %100 : vector<2x64xf32>
    %102 = vector.extract_strided_slice %101 {offsets = [0, 0], sizes = [2, 16], strides = [1, 1]} : vector<2x64xf32> to vector<2x16xf32>
    %103 = arith.negf %102 : vector<2x16xf32>
    %104 = math.exp %103 : vector<2x16xf32>
    %cst_77 = arith.constant 1.000000e+00 : f32
    %105 = vector.broadcast %cst_77 : f32 to vector<2x16xf32>
    %106 = arith.addf %105, %104 : vector<2x16xf32>
    %107 = arith.divf %105, %106 : vector<2x16xf32>
    %108 = vector.extract_strided_slice %101 {offsets = [0, 16], sizes = [2, 16], strides = [1, 1]} : vector<2x64xf32> to vector<2x16xf32>
    %109 = arith.negf %108 : vector<2x16xf32>
    %110 = math.exp %109 : vector<2x16xf32>
    %cst_78 = arith.constant 1.000000e+00 : f32
    %111 = vector.broadcast %cst_78 : f32 to vector<2x16xf32>
    %112 = arith.addf %111, %110 : vector<2x16xf32>
    %113 = arith.divf %111, %112 : vector<2x16xf32>
    %114 = vector.extract_strided_slice %101 {offsets = [0, 32], sizes = [2, 16], strides = [1, 1]} : vector<2x64xf32> to vector<2x16xf32>
    %115 = math.tanh %114 : vector<2x16xf32>
    %116 = vector.extract_strided_slice %101 {offsets = [0, 48], sizes = [2, 16], strides = [1, 1]} : vector<2x64xf32> to vector<2x16xf32>
    %117 = arith.negf %116 : vector<2x16xf32>
    %118 = math.exp %117 : vector<2x16xf32>
    %cst_79 = arith.constant 1.000000e+00 : f32
    %119 = vector.broadcast %cst_79 : f32 to vector<2x16xf32>
    %120 = arith.addf %119, %118 : vector<2x16xf32>
    %121 = arith.divf %119, %120 : vector<2x16xf32>
    %c1_80 = arith.constant 1 : index
    %c0_81 = arith.constant 0 : index
    %c0_82 = arith.constant 0 : index
    %122 = vector.load %arg14[%c1_80, %c0_81, %c0_82] : memref<2x2x16xf32, #tpu.memory_space<vmem>>, vector<1x2x16xf32>
    %123 = vector.shape_cast %122 : vector<1x2x16xf32> to vector<2x16xf32>
    %124 = arith.mulf %113, %123 : vector<2x16xf32>
    %125 = arith.mulf %107, %115 : vector<2x16xf32>
    %126 = arith.addf %124, %125 : vector<2x16xf32>
    %127 = math.tanh %126 : vector<2x16xf32>
    %128 = arith.mulf %121, %127 : vector<2x16xf32>
    %c1_83 = arith.constant 1 : index
    %c0_84 = arith.constant 0 : index
    %c0_85 = arith.constant 0 : index
    %129 = vector.load %arg13[%c1_83, %c0_84, %c0_85] : memref<2x2x16xf32, #tpu.memory_space<vmem>>, vector<1x2x16xf32>
    %130 = vector.shape_cast %129 : vector<1x2x16xf32> to vector<2x16xf32>
    %131 = vector.shape_cast %128 : vector<2x16xf32> to vector<1x2x16xf32>
    tpu.vector_store %arg13[%c1_83, %c0_84, %c0_85], %131 {strides = array<i32>} : memref<2x2x16xf32, #tpu.memory_space<vmem>>, vector<1x2x16xf32>,
    %c1_86 = arith.constant 1 : index
    %c0_87 = arith.constant 0 : index
    %c0_88 = arith.constant 0 : index
    %132 = vector.load %arg14[%c1_86, %c0_87, %c0_88] : memref<2x2x16xf32, #tpu.memory_space<vmem>>, vector<1x2x16xf32>
    %133 = vector.shape_cast %132 : vector<1x2x16xf32> to vector<2x16xf32>
    %134 = vector.shape_cast %126 : vector<2x16xf32> to vector<1x2x16xf32>
    tpu.vector_store %arg14[%c1_86, %c0_87, %c0_88], %134 {strides = array<i32>} : memref<2x2x16xf32, #tpu.memory_space<vmem>>, vector<1x2x16xf32>,
    %135 = arith.index_cast %c0_i32 : i32 to index
    %c0_89 = arith.constant 0 : index
    %c0_90 = arith.constant 0 : index
    %136 = vector.load %arg8[%135, %c0_89, %c0_90] : memref<4x2x16xf32, #tpu.memory_space<vmem>>, vector<1x2x16xf32>
    %137 = vector.shape_cast %136 : vector<1x2x16xf32> to vector<2x16xf32>
    %138 = vector.shape_cast %128 : vector<2x16xf32> to vector<1x2x16xf32>
    tpu.vector_store %arg8[%135, %c0_89, %c0_90], %138 {strides = array<i32>} : memref<4x2x16xf32, #tpu.memory_space<vmem>>, vector<1x2x16xf32>,
    %c1_i32 = arith.constant 1 : i32
    %139 = arith.index_cast %c1_i32 : i32 to index
    %c0_91 = arith.constant 0 : index
    %c0_92 = arith.constant 0 : index
    %140 = vector.load %arg11[%139, %c0_91, %c0_92] : memref<4x2x8xbf16, #tpu.memory_space<vmem>>, vector<1x2x8xbf16>
    %141 = vector.shape_cast %140 : vector<1x2x8xbf16> to vector<2x8xbf16>
    %c0_93 = arith.constant 0 : index
    %c0_94 = arith.constant 0 : index
    %142 = vector.load %arg12[%c0_93, %c0_94] : memref<2x32xbf16, #tpu.memory_space<vmem>>, vector<2x8xbf16>
    tpu.vector_store %arg12[%c0_93, %c0_94], %141 {strides = array<i32>} : memref<2x32xbf16, #tpu.memory_space<vmem>>, vector<2x8xbf16>,
    %c0_95 = arith.constant 0 : index
    %c0_96 = arith.constant 0 : index
    %c0_97 = arith.constant 0 : index
    %143 = vector.load %arg13[%c0_95, %c0_96, %c0_97] : memref<2x2x16xf32, #tpu.memory_space<vmem>>, vector<1x2x16xf32>
    %144 = vector.shape_cast %143 : vector<1x2x16xf32> to vector<2x16xf32>
    %145 = arith.truncf %144 : vector<2x16xf32> to vector<2x16xbf16>
    %c0_98 = arith.constant 0 : index
    %c16_99 = arith.constant 16 : index
    %146 = vector.load %arg12[%c0_98, %c16_99] : memref<2x32xbf16, #tpu.memory_space<vmem>>, vector<2x16xbf16>
    tpu.vector_store %arg12[%c0_98, %c16_99], %145 {strides = array<i32>} : memref<2x32xbf16, #tpu.memory_space<vmem>>, vector<2x16xbf16>,
    %c0_100 = arith.constant 0 : index
    %c0_101 = arith.constant 0 : index
    %147 = vector.load %arg12[%c0_100, %c0_101] : memref<2x32xbf16, #tpu.memory_space<vmem>>, vector<2x32xbf16>
    %c0_102 = arith.constant 0 : index
    %c0_103 = arith.constant 0 : index
    %c0_104 = arith.constant 0 : index
    %148 = vector.load %arg6[%c0_102, %c0_103, %c0_104] : memref<2x32x64xbf16, #tpu.memory_space<vmem>>, vector<1x32x64xbf16>
    %149 = vector.shape_cast %148 : vector<1x32x64xbf16> to vector<32x64xbf16>
    %cst_105 = arith.constant dense<0.000000e+00> : vector<2x64xf32>
    %150 = tpu.matmul %147, %149, %cst_105 {dimension_numbers = #tpu.dot_dimension_numbers<[1], [0], [0], [1], [0, 0, 1, 1], [], []>} : vector<2x32xbf16>, vector<32x64xbf16>, vector<2x64xf32> -> vector<2x64xf32>
    %c0_106 = arith.constant 0 : index
    %c0_107 = arith.constant 0 : index
    %c0_108 = arith.constant 0 : index
    %151 = vector.load %arg7[%c0_106, %c0_107, %c0_108] : memref<2x1x64xf32, #tpu.memory_space<vmem>>, vector<1x1x64xf32>
    %152 = vector.shape_cast %151 : vector<1x1x64xf32> to vector<1x64xf32>
    %153 = vector.broadcast %152 : vector<1x64xf32> to vector<2x64xf32>
    %154 = arith.addf %150, %153 : vector<2x64xf32>
    %155 = vector.extract_strided_slice %154 {offsets = [0, 0], sizes = [2, 16], strides = [1, 1]} : vector<2x64xf32> to vector<2x16xf32>
    %156 = arith.negf %155 : vector<2x16xf32>
    %157 = math.exp %156 : vector<2x16xf32>
    %cst_109 = arith.constant 1.000000e+00 : f32
    %158 = vector.broadcast %cst_109 : f32 to vector<2x16xf32>
    %159 = arith.addf %158, %157 : vector<2x16xf32>
    %160 = arith.divf %158, %159 : vector<2x16xf32>
    %161 = vector.extract_strided_slice %154 {offsets = [0, 16], sizes = [2, 16], strides = [1, 1]} : vector<2x64xf32> to vector<2x16xf32>
    %162 = arith.negf %161 : vector<2x16xf32>
    %163 = math.exp %162 : vector<2x16xf32>
    %cst_110 = arith.constant 1.000000e+00 : f32
    %164 = vector.broadcast %cst_110 : f32 to vector<2x16xf32>
    %165 = arith.addf %164, %163 : vector<2x16xf32>
    %166 = arith.divf %164, %165 : vector<2x16xf32>
    %167 = vector.extract_strided_slice %154 {offsets = [0, 32], sizes = [2, 16], strides = [1, 1]} : vector<2x64xf32> to vector<2x16xf32>
    %168 = math.tanh %167 : vector<2x16xf32>
    %169 = vector.extract_strided_slice %154 {offsets = [0, 48], sizes = [2, 16], strides = [1, 1]} : vector<2x64xf32> to vector<2x16xf32>
    %170 = arith.negf %169 : vector<2x16xf32>
    %171 = math.exp %170 : vector<2x16xf32>
    %cst_111 = arith.constant 1.000000e+00 : f32
    %172 = vector.broadcast %cst_111 : f32 to vector<2x16xf32>
    %173 = arith.addf %172, %171 : vector<2x16xf32>
    %174 = arith.divf %172, %173 : vector<2x16xf32>
    %c0_112 = arith.constant 0 : index
    %c0_113 = arith.constant 0 : index
    %c0_114 = arith.constant 0 : index
    %175 = vector.load %arg14[%c0_112, %c0_113, %c0_114] : memref<2x2x16xf32, #tpu.memory_space<vmem>>, vector<1x2x16xf32>
    %176 = vector.shape_cast %175 : vector<1x2x16xf32> to vector<2x16xf32>
    %177 = arith.mulf %166, %176 : vector<2x16xf32>
    %178 = arith.mulf %160, %168 : vector<2x16xf32>
    %179 = arith.addf %177, %178 : vector<2x16xf32>
    %180 = math.tanh %179 : vector<2x16xf32>
    %181 = arith.mulf %174, %180 : vector<2x16xf32>
    %c0_115 = arith.constant 0 : index
    %c0_116 = arith.constant 0 : index
    %c0_117 = arith.constant 0 : index
    %182 = vector.load %arg13[%c0_115, %c0_116, %c0_117] : memref<2x2x16xf32, #tpu.memory_space<vmem>>, vector<1x2x16xf32>
    %183 = vector.shape_cast %182 : vector<1x2x16xf32> to vector<2x16xf32>
    %184 = vector.shape_cast %181 : vector<2x16xf32> to vector<1x2x16xf32>
    tpu.vector_store %arg13[%c0_115, %c0_116, %c0_117], %184 {strides = array<i32>} : memref<2x2x16xf32, #tpu.memory_space<vmem>>, vector<1x2x16xf32>,
    %c0_118 = arith.constant 0 : index
    %c0_119 = arith.constant 0 : index
    %c0_120 = arith.constant 0 : index
    %185 = vector.load %arg14[%c0_118, %c0_119, %c0_120] : memref<2x2x16xf32, #tpu.memory_space<vmem>>, vector<1x2x16xf32>
    %186 = vector.shape_cast %185 : vector<1x2x16xf32> to vector<2x16xf32>
    %187 = vector.shape_cast %179 : vector<2x16xf32> to vector<1x2x16xf32>
    tpu.vector_store %arg14[%c0_118, %c0_119, %c0_120], %187 {strides = array<i32>} : memref<2x2x16xf32, #tpu.memory_space<vmem>>, vector<1x2x16xf32>,
    %188 = arith.truncf %181 : vector<2x16xf32> to vector<2x16xbf16>
    %c0_121 = arith.constant 0 : index
    %c0_122 = arith.constant 0 : index
    %189 = vector.load %arg12[%c0_121, %c0_122] : memref<2x32xbf16, #tpu.memory_space<vmem>>, vector<2x16xbf16>
    tpu.vector_store %arg12[%c0_121, %c0_122], %188 {strides = array<i32>} : memref<2x32xbf16, #tpu.memory_space<vmem>>, vector<2x16xbf16>,
    %c1_123 = arith.constant 1 : index
    %c0_124 = arith.constant 0 : index
    %c0_125 = arith.constant 0 : index
    %190 = vector.load %arg13[%c1_123, %c0_124, %c0_125] : memref<2x2x16xf32, #tpu.memory_space<vmem>>, vector<1x2x16xf32>
    %191 = vector.shape_cast %190 : vector<1x2x16xf32> to vector<2x16xf32>
    %192 = arith.truncf %191 : vector<2x16xf32> to vector<2x16xbf16>
    %c0_126 = arith.constant 0 : index
    %c16_127 = arith.constant 16 : index
    %193 = vector.load %arg12[%c0_126, %c16_127] : memref<2x32xbf16, #tpu.memory_space<vmem>>, vector<2x16xbf16>
    tpu.vector_store %arg12[%c0_126, %c16_127], %192 {strides = array<i32>} : memref<2x32xbf16, #tpu.memory_space<vmem>>, vector<2x16xbf16>,
    %c0_128 = arith.constant 0 : index
    %c0_129 = arith.constant 0 : index
    %194 = vector.load %arg12[%c0_128, %c0_129] : memref<2x32xbf16, #tpu.memory_space<vmem>>, vector<2x32xbf16>
    %c1_130 = arith.constant 1 : index
    %c0_131 = arith.constant 0 : index
    %c0_132 = arith.constant 0 : index
    %195 = vector.load %arg6[%c1_130, %c0_131, %c0_132] : memref<2x32x64xbf16, #tpu.memory_space<vmem>>, vector<1x32x64xbf16>
    %196 = vector.shape_cast %195 : vector<1x32x64xbf16> to vector<32x64xbf16>
    %cst_133 = arith.constant dense<0.000000e+00> : vector<2x64xf32>
    %197 = tpu.matmul %194, %196, %cst_133 {dimension_numbers = #tpu.dot_dimension_numbers<[1], [0], [0], [1], [0, 0, 1, 1], [], []>} : vector<2x32xbf16>, vector<32x64xbf16>, vector<2x64xf32> -> vector<2x64xf32>
    %c1_134 = arith.constant 1 : index
    %c0_135 = arith.constant 0 : index
    %c0_136 = arith.constant 0 : index
    %198 = vector.load %arg7[%c1_134, %c0_135, %c0_136] : memref<2x1x64xf32, #tpu.memory_space<vmem>>, vector<1x1x64xf32>
    %199 = vector.shape_cast %198 : vector<1x1x64xf32> to vector<1x64xf32>
    %200 = vector.broadcast %199 : vector<1x64xf32> to vector<2x64xf32>
    %201 = arith.addf %197, %200 : vector<2x64xf32>
    %202 = vector.extract_strided_slice %201 {offsets = [0, 0], sizes = [2, 16], strides = [1, 1]} : vector<2x64xf32> to vector<2x16xf32>
    %203 = arith.negf %202 : vector<2x16xf32>
    %204 = math.exp %203 : vector<2x16xf32>
    %cst_137 = arith.constant 1.000000e+00 : f32
    %205 = vector.broadcast %cst_137 : f32 to vector<2x16xf32>
    %206 = arith.addf %205, %204 : vector<2x16xf32>
    %207 = arith.divf %205, %206 : vector<2x16xf32>
    %208 = vector.extract_strided_slice %201 {offsets = [0, 16], sizes = [2, 16], strides = [1, 1]} : vector<2x64xf32> to vector<2x16xf32>
    %209 = arith.negf %208 : vector<2x16xf32>
    %210 = math.exp %209 : vector<2x16xf32>
    %cst_138 = arith.constant 1.000000e+00 : f32
    %211 = vector.broadcast %cst_138 : f32 to vector<2x16xf32>
    %212 = arith.addf %211, %210 : vector<2x16xf32>
    %213 = arith.divf %211, %212 : vector<2x16xf32>
    %214 = vector.extract_strided_slice %201 {offsets = [0, 32], sizes = [2, 16], strides = [1, 1]} : vector<2x64xf32> to vector<2x16xf32>
    %215 = math.tanh %214 : vector<2x16xf32>
    %216 = vector.extract_strided_slice %201 {offsets = [0, 48], sizes = [2, 16], strides = [1, 1]} : vector<2x64xf32> to vector<2x16xf32>
    %217 = arith.negf %216 : vector<2x16xf32>
    %218 = math.exp %217 : vector<2x16xf32>
    %cst_139 = arith.constant 1.000000e+00 : f32
    %219 = vector.broadcast %cst_139 : f32 to vector<2x16xf32>
    %220 = arith.addf %219, %218 : vector<2x16xf32>
    %221 = arith.divf %219, %220 : vector<2x16xf32>
    %c1_140 = arith.constant 1 : index
    %c0_141 = arith.constant 0 : index
    %c0_142 = arith.constant 0 : index
    %222 = vector.load %arg14[%c1_140, %c0_141, %c0_142] : memref<2x2x16xf32, #tpu.memory_space<vmem>>, vector<1x2x16xf32>
    %223 = vector.shape_cast %222 : vector<1x2x16xf32> to vector<2x16xf32>
    %224 = arith.mulf %213, %223 : vector<2x16xf32>
    %225 = arith.mulf %207, %215 : vector<2x16xf32>
    %226 = arith.addf %224, %225 : vector<2x16xf32>
    %227 = math.tanh %226 : vector<2x16xf32>
    %228 = arith.mulf %221, %227 : vector<2x16xf32>
    %c1_143 = arith.constant 1 : index
    %c0_144 = arith.constant 0 : index
    %c0_145 = arith.constant 0 : index
    %229 = vector.load %arg13[%c1_143, %c0_144, %c0_145] : memref<2x2x16xf32, #tpu.memory_space<vmem>>, vector<1x2x16xf32>
    %230 = vector.shape_cast %229 : vector<1x2x16xf32> to vector<2x16xf32>
    %231 = vector.shape_cast %228 : vector<2x16xf32> to vector<1x2x16xf32>
    tpu.vector_store %arg13[%c1_143, %c0_144, %c0_145], %231 {strides = array<i32>} : memref<2x2x16xf32, #tpu.memory_space<vmem>>, vector<1x2x16xf32>,
    %c1_146 = arith.constant 1 : index
    %c0_147 = arith.constant 0 : index
    %c0_148 = arith.constant 0 : index
    %232 = vector.load %arg14[%c1_146, %c0_147, %c0_148] : memref<2x2x16xf32, #tpu.memory_space<vmem>>, vector<1x2x16xf32>
    %233 = vector.shape_cast %232 : vector<1x2x16xf32> to vector<2x16xf32>
    %234 = vector.shape_cast %226 : vector<2x16xf32> to vector<1x2x16xf32>
    tpu.vector_store %arg14[%c1_146, %c0_147, %c0_148], %234 {strides = array<i32>} : memref<2x2x16xf32, #tpu.memory_space<vmem>>, vector<1x2x16xf32>,
    %235 = arith.index_cast %c1_i32 : i32 to index
    %c0_149 = arith.constant 0 : index
    %c0_150 = arith.constant 0 : index
    %236 = vector.load %arg8[%235, %c0_149, %c0_150] : memref<4x2x16xf32, #tpu.memory_space<vmem>>, vector<1x2x16xf32>
    %237 = vector.shape_cast %236 : vector<1x2x16xf32> to vector<2x16xf32>
    %238 = vector.shape_cast %228 : vector<2x16xf32> to vector<1x2x16xf32>
    tpu.vector_store %arg8[%235, %c0_149, %c0_150], %238 {strides = array<i32>} : memref<4x2x16xf32, #tpu.memory_space<vmem>>, vector<1x2x16xf32>,
    %c2_i32 = arith.constant 2 : i32
    %239 = arith.index_cast %c2_i32 : i32 to index
    %c0_151 = arith.constant 0 : index
    %c0_152 = arith.constant 0 : index
    %240 = vector.load %arg11[%239, %c0_151, %c0_152] : memref<4x2x8xbf16, #tpu.memory_space<vmem>>, vector<1x2x8xbf16>
    %241 = vector.shape_cast %240 : vector<1x2x8xbf16> to vector<2x8xbf16>
    %c0_153 = arith.constant 0 : index
    %c0_154 = arith.constant 0 : index
    %242 = vector.load %arg12[%c0_153, %c0_154] : memref<2x32xbf16, #tpu.memory_space<vmem>>, vector<2x8xbf16>
    tpu.vector_store %arg12[%c0_153, %c0_154], %241 {strides = array<i32>} : memref<2x32xbf16, #tpu.memory_space<vmem>>, vector<2x8xbf16>,
    %c0_155 = arith.constant 0 : index
    %c0_156 = arith.constant 0 : index
    %c0_157 = arith.constant 0 : index
    %243 = vector.load %arg13[%c0_155, %c0_156, %c0_157] : memref<2x2x16xf32, #tpu.memory_space<vmem>>, vector<1x2x16xf32>
    %244 = vector.shape_cast %243 : vector<1x2x16xf32> to vector<2x16xf32>
    %245 = arith.truncf %244 : vector<2x16xf32> to vector<2x16xbf16>
    %c0_158 = arith.constant 0 : index
    %c16_159 = arith.constant 16 : index
    %246 = vector.load %arg12[%c0_158, %c16_159] : memref<2x32xbf16, #tpu.memory_space<vmem>>, vector<2x16xbf16>
    tpu.vector_store %arg12[%c0_158, %c16_159], %245 {strides = array<i32>} : memref<2x32xbf16, #tpu.memory_space<vmem>>, vector<2x16xbf16>,
    %c0_160 = arith.constant 0 : index
    %c0_161 = arith.constant 0 : index
    %247 = vector.load %arg12[%c0_160, %c0_161] : memref<2x32xbf16, #tpu.memory_space<vmem>>, vector<2x32xbf16>
    %c0_162 = arith.constant 0 : index
    %c0_163 = arith.constant 0 : index
    %c0_164 = arith.constant 0 : index
    %248 = vector.load %arg6[%c0_162, %c0_163, %c0_164] : memref<2x32x64xbf16, #tpu.memory_space<vmem>>, vector<1x32x64xbf16>
    %249 = vector.shape_cast %248 : vector<1x32x64xbf16> to vector<32x64xbf16>
    %cst_165 = arith.constant dense<0.000000e+00> : vector<2x64xf32>
    %250 = tpu.matmul %247, %249, %cst_165 {dimension_numbers = #tpu.dot_dimension_numbers<[1], [0], [0], [1], [0, 0, 1, 1], [], []>} : vector<2x32xbf16>, vector<32x64xbf16>, vector<2x64xf32> -> vector<2x64xf32>
    %c0_166 = arith.constant 0 : index
    %c0_167 = arith.constant 0 : index
    %c0_168 = arith.constant 0 : index
    %251 = vector.load %arg7[%c0_166, %c0_167, %c0_168] : memref<2x1x64xf32, #tpu.memory_space<vmem>>, vector<1x1x64xf32>
    %252 = vector.shape_cast %251 : vector<1x1x64xf32> to vector<1x64xf32>
    %253 = vector.broadcast %252 : vector<1x64xf32> to vector<2x64xf32>
    %254 = arith.addf %250, %253 : vector<2x64xf32>
    %255 = vector.extract_strided_slice %254 {offsets = [0, 0], sizes = [2, 16], strides = [1, 1]} : vector<2x64xf32> to vector<2x16xf32>
    %256 = arith.negf %255 : vector<2x16xf32>
    %257 = math.exp %256 : vector<2x16xf32>
    %cst_169 = arith.constant 1.000000e+00 : f32
    %258 = vector.broadcast %cst_169 : f32 to vector<2x16xf32>
    %259 = arith.addf %258, %257 : vector<2x16xf32>
    %260 = arith.divf %258, %259 : vector<2x16xf32>
    %261 = vector.extract_strided_slice %254 {offsets = [0, 16], sizes = [2, 16], strides = [1, 1]} : vector<2x64xf32> to vector<2x16xf32>
    %262 = arith.negf %261 : vector<2x16xf32>
    %263 = math.exp %262 : vector<2x16xf32>
    %cst_170 = arith.constant 1.000000e+00 : f32
    %264 = vector.broadcast %cst_170 : f32 to vector<2x16xf32>
    %265 = arith.addf %264, %263 : vector<2x16xf32>
    %266 = arith.divf %264, %265 : vector<2x16xf32>
    %267 = vector.extract_strided_slice %254 {offsets = [0, 32], sizes = [2, 16], strides = [1, 1]} : vector<2x64xf32> to vector<2x16xf32>
    %268 = math.tanh %267 : vector<2x16xf32>
    %269 = vector.extract_strided_slice %254 {offsets = [0, 48], sizes = [2, 16], strides = [1, 1]} : vector<2x64xf32> to vector<2x16xf32>
    %270 = arith.negf %269 : vector<2x16xf32>
    %271 = math.exp %270 : vector<2x16xf32>
    %cst_171 = arith.constant 1.000000e+00 : f32
    %272 = vector.broadcast %cst_171 : f32 to vector<2x16xf32>
    %273 = arith.addf %272, %271 : vector<2x16xf32>
    %274 = arith.divf %272, %273 : vector<2x16xf32>
    %c0_172 = arith.constant 0 : index
    %c0_173 = arith.constant 0 : index
    %c0_174 = arith.constant 0 : index
    %275 = vector.load %arg14[%c0_172, %c0_173, %c0_174] : memref<2x2x16xf32, #tpu.memory_space<vmem>>, vector<1x2x16xf32>
    %276 = vector.shape_cast %275 : vector<1x2x16xf32> to vector<2x16xf32>
    %277 = arith.mulf %266, %276 : vector<2x16xf32>
    %278 = arith.mulf %260, %268 : vector<2x16xf32>
    %279 = arith.addf %277, %278 : vector<2x16xf32>
    %280 = math.tanh %279 : vector<2x16xf32>
    %281 = arith.mulf %274, %280 : vector<2x16xf32>
    %c0_175 = arith.constant 0 : index
    %c0_176 = arith.constant 0 : index
    %c0_177 = arith.constant 0 : index
    %282 = vector.load %arg13[%c0_175, %c0_176, %c0_177] : memref<2x2x16xf32, #tpu.memory_space<vmem>>, vector<1x2x16xf32>
    %283 = vector.shape_cast %282 : vector<1x2x16xf32> to vector<2x16xf32>
    %284 = vector.shape_cast %281 : vector<2x16xf32> to vector<1x2x16xf32>
    tpu.vector_store %arg13[%c0_175, %c0_176, %c0_177], %284 {strides = array<i32>} : memref<2x2x16xf32, #tpu.memory_space<vmem>>, vector<1x2x16xf32>,
    %c0_178 = arith.constant 0 : index
    %c0_179 = arith.constant 0 : index
    %c0_180 = arith.constant 0 : index
    %285 = vector.load %arg14[%c0_178, %c0_179, %c0_180] : memref<2x2x16xf32, #tpu.memory_space<vmem>>, vector<1x2x16xf32>
    %286 = vector.shape_cast %285 : vector<1x2x16xf32> to vector<2x16xf32>
    %287 = vector.shape_cast %279 : vector<2x16xf32> to vector<1x2x16xf32>
    tpu.vector_store %arg14[%c0_178, %c0_179, %c0_180], %287 {strides = array<i32>} : memref<2x2x16xf32, #tpu.memory_space<vmem>>, vector<1x2x16xf32>,
    %288 = arith.truncf %281 : vector<2x16xf32> to vector<2x16xbf16>
    %c0_181 = arith.constant 0 : index
    %c0_182 = arith.constant 0 : index
    %289 = vector.load %arg12[%c0_181, %c0_182] : memref<2x32xbf16, #tpu.memory_space<vmem>>, vector<2x16xbf16>
    tpu.vector_store %arg12[%c0_181, %c0_182], %288 {strides = array<i32>} : memref<2x32xbf16, #tpu.memory_space<vmem>>, vector<2x16xbf16>,
    %c1_183 = arith.constant 1 : index
    %c0_184 = arith.constant 0 : index
    %c0_185 = arith.constant 0 : index
    %290 = vector.load %arg13[%c1_183, %c0_184, %c0_185] : memref<2x2x16xf32, #tpu.memory_space<vmem>>, vector<1x2x16xf32>
    %291 = vector.shape_cast %290 : vector<1x2x16xf32> to vector<2x16xf32>
    %292 = arith.truncf %291 : vector<2x16xf32> to vector<2x16xbf16>
    %c0_186 = arith.constant 0 : index
    %c16_187 = arith.constant 16 : index
    %293 = vector.load %arg12[%c0_186, %c16_187] : memref<2x32xbf16, #tpu.memory_space<vmem>>, vector<2x16xbf16>
    tpu.vector_store %arg12[%c0_186, %c16_187], %292 {strides = array<i32>} : memref<2x32xbf16, #tpu.memory_space<vmem>>, vector<2x16xbf16>,
    %c0_188 = arith.constant 0 : index
    %c0_189 = arith.constant 0 : index
    %294 = vector.load %arg12[%c0_188, %c0_189] : memref<2x32xbf16, #tpu.memory_space<vmem>>, vector<2x32xbf16>
    %c1_190 = arith.constant 1 : index
    %c0_191 = arith.constant 0 : index
    %c0_192 = arith.constant 0 : index
    %295 = vector.load %arg6[%c1_190, %c0_191, %c0_192] : memref<2x32x64xbf16, #tpu.memory_space<vmem>>, vector<1x32x64xbf16>
    %296 = vector.shape_cast %295 : vector<1x32x64xbf16> to vector<32x64xbf16>
    %cst_193 = arith.constant dense<0.000000e+00> : vector<2x64xf32>
    %297 = tpu.matmul %294, %296, %cst_193 {dimension_numbers = #tpu.dot_dimension_numbers<[1], [0], [0], [1], [0, 0, 1, 1], [], []>} : vector<2x32xbf16>, vector<32x64xbf16>, vector<2x64xf32> -> vector<2x64xf32>
    %c1_194 = arith.constant 1 : index
    %c0_195 = arith.constant 0 : index
    %c0_196 = arith.constant 0 : index
    %298 = vector.load %arg7[%c1_194, %c0_195, %c0_196] : memref<2x1x64xf32, #tpu.memory_space<vmem>>, vector<1x1x64xf32>
    %299 = vector.shape_cast %298 : vector<1x1x64xf32> to vector<1x64xf32>
    %300 = vector.broadcast %299 : vector<1x64xf32> to vector<2x64xf32>
    %301 = arith.addf %297, %300 : vector<2x64xf32>
    %302 = vector.extract_strided_slice %301 {offsets = [0, 0], sizes = [2, 16], strides = [1, 1]} : vector<2x64xf32> to vector<2x16xf32>
    %303 = arith.negf %302 : vector<2x16xf32>
    %304 = math.exp %303 : vector<2x16xf32>
    %cst_197 = arith.constant 1.000000e+00 : f32
    %305 = vector.broadcast %cst_197 : f32 to vector<2x16xf32>
    %306 = arith.addf %305, %304 : vector<2x16xf32>
    %307 = arith.divf %305, %306 : vector<2x16xf32>
    %308 = vector.extract_strided_slice %301 {offsets = [0, 16], sizes = [2, 16], strides = [1, 1]} : vector<2x64xf32> to vector<2x16xf32>
    %309 = arith.negf %308 : vector<2x16xf32>
    %310 = math.exp %309 : vector<2x16xf32>
    %cst_198 = arith.constant 1.000000e+00 : f32
    %311 = vector.broadcast %cst_198 : f32 to vector<2x16xf32>
    %312 = arith.addf %311, %310 : vector<2x16xf32>
    %313 = arith.divf %311, %312 : vector<2x16xf32>
    %314 = vector.extract_strided_slice %301 {offsets = [0, 32], sizes = [2, 16], strides = [1, 1]} : vector<2x64xf32> to vector<2x16xf32>
    %315 = math.tanh %314 : vector<2x16xf32>
    %316 = vector.extract_strided_slice %301 {offsets = [0, 48], sizes = [2, 16], strides = [1, 1]} : vector<2x64xf32> to vector<2x16xf32>
    %317 = arith.negf %316 : vector<2x16xf32>
    %318 = math.exp %317 : vector<2x16xf32>
    %cst_199 = arith.constant 1.000000e+00 : f32
    %319 = vector.broadcast %cst_199 : f32 to vector<2x16xf32>
    %320 = arith.addf %319, %318 : vector<2x16xf32>
    %321 = arith.divf %319, %320 : vector<2x16xf32>
    %c1_200 = arith.constant 1 : index
    %c0_201 = arith.constant 0 : index
    %c0_202 = arith.constant 0 : index
    %322 = vector.load %arg14[%c1_200, %c0_201, %c0_202] : memref<2x2x16xf32, #tpu.memory_space<vmem>>, vector<1x2x16xf32>
    %323 = vector.shape_cast %322 : vector<1x2x16xf32> to vector<2x16xf32>
    %324 = arith.mulf %313, %323 : vector<2x16xf32>
    %325 = arith.mulf %307, %315 : vector<2x16xf32>
    %326 = arith.addf %324, %325 : vector<2x16xf32>
    %327 = math.tanh %326 : vector<2x16xf32>
    %328 = arith.mulf %321, %327 : vector<2x16xf32>
    %c1_203 = arith.constant 1 : index
    %c0_204 = arith.constant 0 : index
    %c0_205 = arith.constant 0 : index
    %329 = vector.load %arg13[%c1_203, %c0_204, %c0_205] : memref<2x2x16xf32, #tpu.memory_space<vmem>>, vector<1x2x16xf32>
    %330 = vector.shape_cast %329 : vector<1x2x16xf32> to vector<2x16xf32>
    %331 = vector.shape_cast %328 : vector<2x16xf32> to vector<1x2x16xf32>
    tpu.vector_store %arg13[%c1_203, %c0_204, %c0_205], %331 {strides = array<i32>} : memref<2x2x16xf32, #tpu.memory_space<vmem>>, vector<1x2x16xf32>,
    %c1_206 = arith.constant 1 : index
    %c0_207 = arith.constant 0 : index
    %c0_208 = arith.constant 0 : index
    %332 = vector.load %arg14[%c1_206, %c0_207, %c0_208] : memref<2x2x16xf32, #tpu.memory_space<vmem>>, vector<1x2x16xf32>
    %333 = vector.shape_cast %332 : vector<1x2x16xf32> to vector<2x16xf32>
    %334 = vector.shape_cast %326 : vector<2x16xf32> to vector<1x2x16xf32>
    tpu.vector_store %arg14[%c1_206, %c0_207, %c0_208], %334 {strides = array<i32>} : memref<2x2x16xf32, #tpu.memory_space<vmem>>, vector<1x2x16xf32>,
    %335 = arith.index_cast %c2_i32 : i32 to index
    %c0_209 = arith.constant 0 : index
    %c0_210 = arith.constant 0 : index
    %336 = vector.load %arg8[%335, %c0_209, %c0_210] : memref<4x2x16xf32, #tpu.memory_space<vmem>>, vector<1x2x16xf32>
    %337 = vector.shape_cast %336 : vector<1x2x16xf32> to vector<2x16xf32>
    %338 = vector.shape_cast %328 : vector<2x16xf32> to vector<1x2x16xf32>
    tpu.vector_store %arg8[%335, %c0_209, %c0_210], %338 {strides = array<i32>} : memref<4x2x16xf32, #tpu.memory_space<vmem>>, vector<1x2x16xf32>,
    %c3_i32 = arith.constant 3 : i32
    %339 = arith.index_cast %c3_i32 : i32 to index
    %c0_211 = arith.constant 0 : index
    %c0_212 = arith.constant 0 : index
    %340 = vector.load %arg11[%339, %c0_211, %c0_212] : memref<4x2x8xbf16, #tpu.memory_space<vmem>>, vector<1x2x8xbf16>
    %341 = vector.shape_cast %340 : vector<1x2x8xbf16> to vector<2x8xbf16>
    %c0_213 = arith.constant 0 : index
    %c0_214 = arith.constant 0 : index
    %342 = vector.load %arg12[%c0_213, %c0_214] : memref<2x32xbf16, #tpu.memory_space<vmem>>, vector<2x8xbf16>
    tpu.vector_store %arg12[%c0_213, %c0_214], %341 {strides = array<i32>} : memref<2x32xbf16, #tpu.memory_space<vmem>>, vector<2x8xbf16>,
    %c0_215 = arith.constant 0 : index
    %c0_216 = arith.constant 0 : index
    %c0_217 = arith.constant 0 : index
    %343 = vector.load %arg13[%c0_215, %c0_216, %c0_217] : memref<2x2x16xf32, #tpu.memory_space<vmem>>, vector<1x2x16xf32>
    %344 = vector.shape_cast %343 : vector<1x2x16xf32> to vector<2x16xf32>
    %345 = arith.truncf %344 : vector<2x16xf32> to vector<2x16xbf16>
    %c0_218 = arith.constant 0 : index
    %c16_219 = arith.constant 16 : index
    %346 = vector.load %arg12[%c0_218, %c16_219] : memref<2x32xbf16, #tpu.memory_space<vmem>>, vector<2x16xbf16>
    tpu.vector_store %arg12[%c0_218, %c16_219], %345 {strides = array<i32>} : memref<2x32xbf16, #tpu.memory_space<vmem>>, vector<2x16xbf16>,
    %c0_220 = arith.constant 0 : index
    %c0_221 = arith.constant 0 : index
    %347 = vector.load %arg12[%c0_220, %c0_221] : memref<2x32xbf16, #tpu.memory_space<vmem>>, vector<2x32xbf16>
    %c0_222 = arith.constant 0 : index
    %c0_223 = arith.constant 0 : index
    %c0_224 = arith.constant 0 : index
    %348 = vector.load %arg6[%c0_222, %c0_223, %c0_224] : memref<2x32x64xbf16, #tpu.memory_space<vmem>>, vector<1x32x64xbf16>
    %349 = vector.shape_cast %348 : vector<1x32x64xbf16> to vector<32x64xbf16>
    %cst_225 = arith.constant dense<0.000000e+00> : vector<2x64xf32>
    %350 = tpu.matmul %347, %349, %cst_225 {dimension_numbers = #tpu.dot_dimension_numbers<[1], [0], [0], [1], [0, 0, 1, 1], [], []>} : vector<2x32xbf16>, vector<32x64xbf16>, vector<2x64xf32> -> vector<2x64xf32>
    %c0_226 = arith.constant 0 : index
    %c0_227 = arith.constant 0 : index
    %c0_228 = arith.constant 0 : index
    %351 = vector.load %arg7[%c0_226, %c0_227, %c0_228] : memref<2x1x64xf32, #tpu.memory_space<vmem>>, vector<1x1x64xf32>
    %352 = vector.shape_cast %351 : vector<1x1x64xf32> to vector<1x64xf32>
    %353 = vector.broadcast %352 : vector<1x64xf32> to vector<2x64xf32>
    %354 = arith.addf %350, %353 : vector<2x64xf32>
    %355 = vector.extract_strided_slice %354 {offsets = [0, 0], sizes = [2, 16], strides = [1, 1]} : vector<2x64xf32> to vector<2x16xf32>
    %356 = arith.negf %355 : vector<2x16xf32>
    %357 = math.exp %356 : vector<2x16xf32>
    %cst_229 = arith.constant 1.000000e+00 : f32
    %358 = vector.broadcast %cst_229 : f32 to vector<2x16xf32>
    %359 = arith.addf %358, %357 : vector<2x16xf32>
    %360 = arith.divf %358, %359 : vector<2x16xf32>
    %361 = vector.extract_strided_slice %354 {offsets = [0, 16], sizes = [2, 16], strides = [1, 1]} : vector<2x64xf32> to vector<2x16xf32>
    %362 = arith.negf %361 : vector<2x16xf32>
    %363 = math.exp %362 : vector<2x16xf32>
    %cst_230 = arith.constant 1.000000e+00 : f32
    %364 = vector.broadcast %cst_230 : f32 to vector<2x16xf32>
    %365 = arith.addf %364, %363 : vector<2x16xf32>
    %366 = arith.divf %364, %365 : vector<2x16xf32>
    %367 = vector.extract_strided_slice %354 {offsets = [0, 32], sizes = [2, 16], strides = [1, 1]} : vector<2x64xf32> to vector<2x16xf32>
    %368 = math.tanh %367 : vector<2x16xf32>
    %369 = vector.extract_strided_slice %354 {offsets = [0, 48], sizes = [2, 16], strides = [1, 1]} : vector<2x64xf32> to vector<2x16xf32>
    %370 = arith.negf %369 : vector<2x16xf32>
    %371 = math.exp %370 : vector<2x16xf32>
    %cst_231 = arith.constant 1.000000e+00 : f32
    %372 = vector.broadcast %cst_231 : f32 to vector<2x16xf32>
    %373 = arith.addf %372, %371 : vector<2x16xf32>
    %374 = arith.divf %372, %373 : vector<2x16xf32>
    %c0_232 = arith.constant 0 : index
    %c0_233 = arith.constant 0 : index
    %c0_234 = arith.constant 0 : index
    %375 = vector.load %arg14[%c0_232, %c0_233, %c0_234] : memref<2x2x16xf32, #tpu.memory_space<vmem>>, vector<1x2x16xf32>
    %376 = vector.shape_cast %375 : vector<1x2x16xf32> to vector<2x16xf32>
    %377 = arith.mulf %366, %376 : vector<2x16xf32>
    %378 = arith.mulf %360, %368 : vector<2x16xf32>
    %379 = arith.addf %377, %378 : vector<2x16xf32>
    %380 = math.tanh %379 : vector<2x16xf32>
    %381 = arith.mulf %374, %380 : vector<2x16xf32>
    %c0_235 = arith.constant 0 : index
    %c0_236 = arith.constant 0 : index
    %c0_237 = arith.constant 0 : index
    %382 = vector.load %arg13[%c0_235, %c0_236, %c0_237] : memref<2x2x16xf32, #tpu.memory_space<vmem>>, vector<1x2x16xf32>
    %383 = vector.shape_cast %382 : vector<1x2x16xf32> to vector<2x16xf32>
    %384 = vector.shape_cast %381 : vector<2x16xf32> to vector<1x2x16xf32>
    tpu.vector_store %arg13[%c0_235, %c0_236, %c0_237], %384 {strides = array<i32>} : memref<2x2x16xf32, #tpu.memory_space<vmem>>, vector<1x2x16xf32>,
    %c0_238 = arith.constant 0 : index
    %c0_239 = arith.constant 0 : index
    %c0_240 = arith.constant 0 : index
    %385 = vector.load %arg14[%c0_238, %c0_239, %c0_240] : memref<2x2x16xf32, #tpu.memory_space<vmem>>, vector<1x2x16xf32>
    %386 = vector.shape_cast %385 : vector<1x2x16xf32> to vector<2x16xf32>
    %387 = vector.shape_cast %379 : vector<2x16xf32> to vector<1x2x16xf32>
    tpu.vector_store %arg14[%c0_238, %c0_239, %c0_240], %387 {strides = array<i32>} : memref<2x2x16xf32, #tpu.memory_space<vmem>>, vector<1x2x16xf32>,
    %388 = arith.truncf %381 : vector<2x16xf32> to vector<2x16xbf16>
    %c0_241 = arith.constant 0 : index
    %c0_242 = arith.constant 0 : index
    %389 = vector.load %arg12[%c0_241, %c0_242] : memref<2x32xbf16, #tpu.memory_space<vmem>>, vector<2x16xbf16>
    tpu.vector_store %arg12[%c0_241, %c0_242], %388 {strides = array<i32>} : memref<2x32xbf16, #tpu.memory_space<vmem>>, vector<2x16xbf16>,
    %c1_243 = arith.constant 1 : index
    %c0_244 = arith.constant 0 : index
    %c0_245 = arith.constant 0 : index
    %390 = vector.load %arg13[%c1_243, %c0_244, %c0_245] : memref<2x2x16xf32, #tpu.memory_space<vmem>>, vector<1x2x16xf32>
    %391 = vector.shape_cast %390 : vector<1x2x16xf32> to vector<2x16xf32>
    %392 = arith.truncf %391 : vector<2x16xf32> to vector<2x16xbf16>
    %c0_246 = arith.constant 0 : index
    %c16_247 = arith.constant 16 : index
    %393 = vector.load %arg12[%c0_246, %c16_247] : memref<2x32xbf16, #tpu.memory_space<vmem>>, vector<2x16xbf16>
    tpu.vector_store %arg12[%c0_246, %c16_247], %392 {strides = array<i32>} : memref<2x32xbf16, #tpu.memory_space<vmem>>, vector<2x16xbf16>,
    %c0_248 = arith.constant 0 : index
    %c0_249 = arith.constant 0 : index
    %394 = vector.load %arg12[%c0_248, %c0_249] : memref<2x32xbf16, #tpu.memory_space<vmem>>, vector<2x32xbf16>
    %c1_250 = arith.constant 1 : index
    %c0_251 = arith.constant 0 : index
    %c0_252 = arith.constant 0 : index
    %395 = vector.load %arg6[%c1_250, %c0_251, %c0_252] : memref<2x32x64xbf16, #tpu.memory_space<vmem>>, vector<1x32x64xbf16>
    %396 = vector.shape_cast %395 : vector<1x32x64xbf16> to vector<32x64xbf16>
    %cst_253 = arith.constant dense<0.000000e+00> : vector<2x64xf32>
    %397 = tpu.matmul %394, %396, %cst_253 {dimension_numbers = #tpu.dot_dimension_numbers<[1], [0], [0], [1], [0, 0, 1, 1], [], []>} : vector<2x32xbf16>, vector<32x64xbf16>, vector<2x64xf32> -> vector<2x64xf32>
    %c1_254 = arith.constant 1 : index
    %c0_255 = arith.constant 0 : index
    %c0_256 = arith.constant 0 : index
    %398 = vector.load %arg7[%c1_254, %c0_255, %c0_256] : memref<2x1x64xf32, #tpu.memory_space<vmem>>, vector<1x1x64xf32>
    %399 = vector.shape_cast %398 : vector<1x1x64xf32> to vector<1x64xf32>
    %400 = vector.broadcast %399 : vector<1x64xf32> to vector<2x64xf32>
    %401 = arith.addf %397, %400 : vector<2x64xf32>
    %402 = vector.extract_strided_slice %401 {offsets = [0, 0], sizes = [2, 16], strides = [1, 1]} : vector<2x64xf32> to vector<2x16xf32>
    %403 = arith.negf %402 : vector<2x16xf32>
    %404 = math.exp %403 : vector<2x16xf32>
    %cst_257 = arith.constant 1.000000e+00 : f32
    %405 = vector.broadcast %cst_257 : f32 to vector<2x16xf32>
    %406 = arith.addf %405, %404 : vector<2x16xf32>
    %407 = arith.divf %405, %406 : vector<2x16xf32>
    %408 = vector.extract_strided_slice %401 {offsets = [0, 16], sizes = [2, 16], strides = [1, 1]} : vector<2x64xf32> to vector<2x16xf32>
    %409 = arith.negf %408 : vector<2x16xf32>
    %410 = math.exp %409 : vector<2x16xf32>
    %cst_258 = arith.constant 1.000000e+00 : f32
    %411 = vector.broadcast %cst_258 : f32 to vector<2x16xf32>
    %412 = arith.addf %411, %410 : vector<2x16xf32>
    %413 = arith.divf %411, %412 : vector<2x16xf32>
    %414 = vector.extract_strided_slice %401 {offsets = [0, 32], sizes = [2, 16], strides = [1, 1]} : vector<2x64xf32> to vector<2x16xf32>
    %415 = math.tanh %414 : vector<2x16xf32>
    %416 = vector.extract_strided_slice %401 {offsets = [0, 48], sizes = [2, 16], strides = [1, 1]} : vector<2x64xf32> to vector<2x16xf32>
    %417 = arith.negf %416 : vector<2x16xf32>
    %418 = math.exp %417 : vector<2x16xf32>
    %cst_259 = arith.constant 1.000000e+00 : f32
    %419 = vector.broadcast %cst_259 : f32 to vector<2x16xf32>
    %420 = arith.addf %419, %418 : vector<2x16xf32>
    %421 = arith.divf %419, %420 : vector<2x16xf32>
    %c1_260 = arith.constant 1 : index
    %c0_261 = arith.constant 0 : index
    %c0_262 = arith.constant 0 : index
    %422 = vector.load %arg14[%c1_260, %c0_261, %c0_262] : memref<2x2x16xf32, #tpu.memory_space<vmem>>, vector<1x2x16xf32>
    %423 = vector.shape_cast %422 : vector<1x2x16xf32> to vector<2x16xf32>
    %424 = arith.mulf %413, %423 : vector<2x16xf32>
    %425 = arith.mulf %407, %415 : vector<2x16xf32>
    %426 = arith.addf %424, %425 : vector<2x16xf32>
    %427 = math.tanh %426 : vector<2x16xf32>
    %428 = arith.mulf %421, %427 : vector<2x16xf32>
    %c1_263 = arith.constant 1 : index
    %c0_264 = arith.constant 0 : index
    %c0_265 = arith.constant 0 : index
    %429 = vector.load %arg13[%c1_263, %c0_264, %c0_265] : memref<2x2x16xf32, #tpu.memory_space<vmem>>, vector<1x2x16xf32>
    %430 = vector.shape_cast %429 : vector<1x2x16xf32> to vector<2x16xf32>
    %431 = vector.shape_cast %428 : vector<2x16xf32> to vector<1x2x16xf32>
    tpu.vector_store %arg13[%c1_263, %c0_264, %c0_265], %431 {strides = array<i32>} : memref<2x2x16xf32, #tpu.memory_space<vmem>>, vector<1x2x16xf32>,
    %c1_266 = arith.constant 1 : index
    %c0_267 = arith.constant 0 : index
    %c0_268 = arith.constant 0 : index
    %432 = vector.load %arg14[%c1_266, %c0_267, %c0_268] : memref<2x2x16xf32, #tpu.memory_space<vmem>>, vector<1x2x16xf32>
    %433 = vector.shape_cast %432 : vector<1x2x16xf32> to vector<2x16xf32>
    %434 = vector.shape_cast %426 : vector<2x16xf32> to vector<1x2x16xf32>
    tpu.vector_store %arg14[%c1_266, %c0_267, %c0_268], %434 {strides = array<i32>} : memref<2x2x16xf32, #tpu.memory_space<vmem>>, vector<1x2x16xf32>,
    %435 = arith.index_cast %c3_i32 : i32 to index
    %c0_269 = arith.constant 0 : index
    %c0_270 = arith.constant 0 : index
    %436 = vector.load %arg8[%435, %c0_269, %c0_270] : memref<4x2x16xf32, #tpu.memory_space<vmem>>, vector<1x2x16xf32>
    %437 = vector.shape_cast %436 : vector<1x2x16xf32> to vector<2x16xf32>
    %438 = vector.shape_cast %428 : vector<2x16xf32> to vector<1x2x16xf32>
    tpu.vector_store %arg8[%435, %c0_269, %c0_270], %438 {strides = array<i32>} : memref<4x2x16xf32, #tpu.memory_space<vmem>>, vector<1x2x16xf32>,
    %c4_i32 = arith.constant 4 : i32
    %c0_271 = arith.constant 0 : index
    %c0_272 = arith.constant 0 : index
    %c0_273 = arith.constant 0 : index
    %439 = vector.load %arg13[%c0_271, %c0_272, %c0_273] : memref<2x2x16xf32, #tpu.memory_space<vmem>>, vector<2x2x16xf32>
    %c0_274 = arith.constant 0 : index
    %c0_275 = arith.constant 0 : index
    %c0_276 = arith.constant 0 : index
    %440 = vector.load %arg9[%c0_274, %c0_275, %c0_276] : memref<2x2x16xf32, #tpu.memory_space<vmem>>, vector<2x2x16xf32>
    tpu.vector_store %arg9[%c0_274, %c0_275, %c0_276], %439 {strides = array<i32>} : memref<2x2x16xf32, #tpu.memory_space<vmem>>, vector<2x2x16xf32>,
    %c0_277 = arith.constant 0 : index
    %c0_278 = arith.constant 0 : index
    %c0_279 = arith.constant 0 : index
    %441 = vector.load %arg14[%c0_277, %c0_278, %c0_279] : memref<2x2x16xf32, #tpu.memory_space<vmem>>, vector<2x2x16xf32>
    %c0_280 = arith.constant 0 : index
    %c0_281 = arith.constant 0 : index
    %c0_282 = arith.constant 0 : index
    %442 = vector.load %arg10[%c0_280, %c0_281, %c0_282] : memref<2x2x16xf32, #tpu.memory_space<vmem>>, vector<2x2x16xf32>
    tpu.vector_store %arg10[%c0_280, %c0_281, %c0_282], %441 {strides = array<i32>} : memref<2x2x16xf32, #tpu.memory_space<vmem>>, vector<2x2x16xf32>,
    return
  }
  func.func @transform_0(%arg0: i32) -> (i32, i32) {
    %c0_i32 = arith.constant 0 : i32
    %c0_i32_0 = arith.constant 0 : i32
    %c0_i32_1 = arith.constant 0 : i32
    return %c0_i32, %c0_i32_0 : i32, i32
  }
  func.func @transform_1(%arg0: i32) -> (i32, i32) {
    %c0_i32 = arith.constant 0 : i32
    %c0_i32_0 = arith.constant 0 : i32
    %c0_i32_1 = arith.constant 0 : i32
    return %c0_i32, %c0_i32_0 : i32, i32
  }
  func.func @transform_2(%arg0: i32) -> (i32, i32) {
    %c0_i32 = arith.constant 0 : i32
    %c0_i32_0 = arith.constant 0 : i32
    %c0_i32_1 = arith.constant 0 : i32
    return %c0_i32, %c0_i32_0 : i32, i32
  }
  func.func @transform_3(%arg0: i32) -> (i32, i32) {
    %c0_i32 = arith.constant 0 : i32
    %c0_i32_0 = arith.constant 0 : i32
    %c0_i32_1 = arith.constant 0 : i32
    return %c0_i32, %c0_i32_0 : i32, i32
  }
  func.func @transform_4(%arg0: i32) -> (i32, i32) {
    %c0_i32 = arith.constant 0 : i32
    %c0_i32_0 = arith.constant 0 : i32
    %c0_i32_1 = arith.constant 0 : i32
    return %c0_i32, %c0_i32_0 : i32, i32
  }
  func.func @transform_5(%arg0: i32) -> (i32, i32, i32) {
    %c0_i32 = arith.constant 0 : i32
    %c0_i32_0 = arith.constant 0 : i32
    %c0_i32_1 = arith.constant 0 : i32
    %c0_i32_2 = arith.constant 0 : i32
    return %c0_i32, %c0_i32_0, %c0_i32_1 : i32, i32, i32
  }
  func.func @transform_6(%arg0: i32) -> (i32, i32, i32) {
    %c0_i32 = arith.constant 0 : i32
    %c0_i32_0 = arith.constant 0 : i32
    %c0_i32_1 = arith.constant 0 : i32
    %c0_i32_2 = arith.constant 0 : i32
    return %c0_i32, %c0_i32_0, %c0_i32_1 : i32, i32, i32
  }
  func.func @transform_7(%arg0: i32) -> (i32, i32, i32) {
    %c0_i32 = arith.constant 0 : i32
    %c0_i32_0 = arith.constant 0 : i32
    %c0_i32_1 = arith.constant 0 : i32
    %c0_i32_2 = arith.constant 0 : i32
    return %c0_i32, %c0_i32_0, %c0_i32_1 : i32, i32, i32
  }
  func.func @transform_8(%arg0: i32) -> (i32, i32, i32) {
    %c0_i32 = arith.constant 0 : i32
    %c0_i32_0 = arith.constant 0 : i32
    %c0_i32_1 = arith.constant 0 : i32
    %c0_i32_2 = arith.constant 0 : i32
    return %c0_i32, %c0_i32_0, %c0_i32_1 : i32, i32, i32
  }
  func.func @transform_9(%arg0: i32) -> (i32, i32, i32) {
    %c0_i32 = arith.constant 0 : i32
    %c0_i32_0 = arith.constant 0 : i32
    %c0_i32_1 = arith.constant 0 : i32
    %c0_i32_2 = arith.constant 0 : i32
    return %c0_i32, %c0_i32_0, %c0_i32_1 : i32, i32, i32
  }
}

</mosaic_0001>

<bundles_post_ra>
// kernel: tpu_custom_call.1
= control target key start
LH: loop header
LB: loop body
LE: loop exit
PB: predicated region body
PF: predicated region fallthrough
CT: control target
= control target key end

     0   :  { %15 = vsyncpa [#allocation7], 0  ;;  %s4918_s0 = inlined_call_operand.vmem [shape: bf16[8,1600], index: 0, kind: input, shape index: {}]   ;;  %s4919_s1 = inlined_call_operand.vmem [shape: bf16[1600,200], index: 1, kind: input, shape index: {}]   ;;  %s4920_s2 = inlined_call_operand.vmem [shape: f32[1,200], index: 2, kind: input, shape index: {}]   ;;  %s4921_s3 = inlined_call_operand.vmem [shape: bf16[200,8], index: 3, kind: input, shape index: {}]   ;;  %s4922_s4 = inlined_call_operand.vmem [shape: f32[1,8], index: 4, kind: input, shape index: {}]   ;;  %s4923_s5 = inlined_call_operand.vmem [shape: bf16[2,32,64], index: 5, kind: input, shape index: {}]   ;;  %s4924_s6 = inlined_call_operand.vmem [shape: f32[2,1,64], index: 6, kind: input, shape index: {}]   ;;  %s4925_s7 = inlined_call_operand.hbm [shape: f32[4,2,16], index: 7, kind: output, shape index: {0}]   ;;  %s4926_s8 = inlined_call_operand.hbm [shape: f32[2,2,16], index: 8, kind: output, shape index: {1}]   ;;  %s4927_s9 = inlined_call_operand.hbm [shape: f32[2,2,16], index: 9, kind: output, shape index: {2}]  }
   0x1   :  { %v3376_v0 = vld [vmem:[%s4919_s1 + $0x204] ss:$8 sps:$4 sm:$0xff]   ;;  %v3378_v1 = vld [vmem:[%s4919_s1 + $0x200] ss:$8 sps:$4 sm:$0xff]   ;;  %v3379_v2 = vld [vmem:[%s4919_s1 + $0x214] ss:$8 sps:$4 sm:$0xff]  }
   0x2   :  { %1382 = vmatprep.subr.bf16.mxu0 %v3376_v0  ;;  %v3381_v3 = vld [vmem:[%s4919_s1 + $0x210] ss:$8 sps:$4 sm:$0xff]   ;;  %v3382_v4 = vld [vmem:[%s4919_s1 + $0x224] ss:$8 sps:$4 sm:$0xff]   ;;  %v3384_v5 = vld [vmem:[%s4919_s1 + $0x220] ss:$8 sps:$4 sm:$0xff]  }
   0x3   :  { %1383 = vmatpush1.bf16.msra.mxu0 %v3378_v1  ;;  %v3385_v6 = vld [vmem:[%s4919_s1 + $0x234] ss:$8 sps:$4 sm:$0xff]   ;;  %v3387_v7 = vld [vmem:[%s4919_s1 + $0x230] ss:$8 sps:$4 sm:$0xff]   ;;  %v3388_v8 = vld [vmem:[%s4919_s1 + $0x244] ss:$8 sps:$4 sm:$0xff]  }
   0x4   :  { %1384 = vmatprep.subr.bf16.mxu0 %v3379_v2  ;;  %v3390_v9 = vld [vmem:[%s4919_s1 + $0x240] ss:$8 sps:$4 sm:$0xff]   ;;  %v3391_v10 = vld [vmem:[%s4919_s1 + $0x254] ss:$8 sps:$4 sm:$0xff]   ;;  %v3412_v11 = vld [vmem:[%s4919_s1 + $0x4] ss:$8 sps:$4 sm:$0xff]  }
   0x5   :  { %v3393_v12 = vld [vmem:[%s4919_s1 + $0x250] ss:$8 sps:$4 sm:$0xff]   ;;  %1300 = vmatprep.subr.bf16.mxu1 %v3412_v11  ;;  %v3416_v13 = vld [vmem:[%s4919_s1] ss:$8 sps:$4 sm:$0xff]   ;;  %v3418_v14 = vld [vmem:[%s4919_s1 + $0x14] ss:$8 sps:$4 sm:$0xff]  }
   0x6   :  { %v3394_v15 = vld [vmem:[%s4919_s1 + $0x264] ss:$8 sps:$4 sm:$0xff]   ;;  %1301 = vmatpush1.bf16.msra.mxu1 %v3416_v13  ;;  %v3422_v16 = vld [vmem:[%s4919_s1 + $0x10] ss:$8 sps:$4 sm:$0xff]   ;;  %v3396_v18 = vld [vmem:[%s4919_s1 + $0x260] ss:$8 sps:$4 sm:$0xff]  }
   0x7   :  { %1385 = vmatpush1.bf16.msra.mxu0 %v3381_v3  ;;  %1302 = vmatprep.subr.bf16.mxu1 %v3418_v14  ;;  %v3424_v17 = vld [vmem:[%s4919_s1 + $0x24] ss:$8 sps:$4 sm:$0xff]   ;;  %v3397_v19 = vld [vmem:[%s4919_s1 + $0x274] ss:$8 sps:$4 sm:$0xff]   ;;  %v3428_v20 = vld [vmem:[%s4919_s1 + $0x20] ss:$8 sps:$4 sm:$0xff]  }
   0x8   :  { %1386 = vmatprep.subr.bf16.mxu0 %v3382_v4  ;;  %v3430_v21 = vld [vmem:[%s4919_s1 + $0x34] ss:$8 sps:$4 sm:$0xff]   ;;  %v3399_v22 = vld [vmem:[%s4919_s1 + $0x270] ss:$8 sps:$4 sm:$0xff]   ;;  %v3400_v23 = vld [vmem:[%s4919_s1 + $0x284] ss:$8 sps:$4 sm:$0xff]  }
   0x9   :  { %v3990_v24 = vld [vmem:[%s4918_s0 + $0x10] sm:$0xff]  ;;  %v3436_v27 = vld [vmem:[%s4919_s1 + $0x44] ss:$8 sps:$4 sm:$0xff]   ;;  %v3402_v28 = vld [vmem:[%s4919_s1 + $0x280] ss:$8 sps:$4 sm:$0xff]  }
   0xa   :  { %1303 = vmatpush1.bf16.msra.mxu1 %v3422_v16  ;;  %v3434_v25 = vld [vmem:[%s4919_s1 + $0x30] ss:$8 sps:$4 sm:$0xff]   ;;  %v2969_v26 = vcombine.high %v3990_v24, %v3990_v24  ;;  %v3403_v29 = vld [vmem:[%s4919_s1 + $0x294] ss:$8 sps:$4 sm:$0xff]   ;;  %v3443_v30 = vld [vmem:[%s4919_s1 + $0x40] ss:$8 sps:$4 sm:$0xff]   ;;  %v2968_v62 = vcombine.low %v3990_v24, %v3990_v24 }
   0xb   :  { %1387 = vmatpush1.bf16.msra.mxu0 %v3384_v5  ;;  %1304 = vmatprep.subr.bf16.mxu1 %v3424_v17  ;;  %v3444_v31 = vld [vmem:[%s4919_s1 + $0x54] ss:$8 sps:$4 sm:$0xff]   ;;  %v3405_v32 = vld [vmem:[%s4919_s1 + $0x290] ss:$8 sps:$4 sm:$0xff]   ;;  %v3406_v33 = vld [vmem:[%s4919_s1 + $0x2a4] ss:$8 sps:$4 sm:$0xff]  }
   0xc   :  { %1388 = vmatprep.subr.bf16.mxu0 %v3385_v6  ;;  %1414 = vmatprep.mubr.bf16.mxu0 %v2969_v26  ;;  %v3449_v34 = vld [vmem:[%s4919_s1 + $0x50] ss:$8 sps:$4 sm:$0xff]   ;;  %v3450_v35 = vld [vmem:[%s4919_s1 + $0x64] ss:$8 sps:$4 sm:$0xff]   ;;  %v3408_v36 = vld [vmem:[%s4919_s1 + $0x2a0] ss:$8 sps:$4 sm:$0xff]  }
   0xd   :  { %v3409_v37 = vld [vmem:[%s4919_s1 + $0x2b4] ss:$8 sps:$4 sm:$0xff]   ;;  %v3455_v38 = vld [vmem:[%s4919_s1 + $0x60] ss:$8 sps:$4 sm:$0xff]   ;;  %v3411_v40 = vld [vmem:[%s4919_s1 + $0x2b0] ss:$8 sps:$4 sm:$0xff]  }
   0xe   :  { %1305 = vmatpush1.bf16.msra.mxu1 %v3428_v20  ;;  %v3456_v39 = vld [vmem:[%s4919_s1 + $0x74] ss:$8 sps:$4 sm:$0xff]   ;;  %v3414_v41 = vld [vmem:[%s4919_s1 + $0x2c4] ss:$8 sps:$4 sm:$0xff]   ;;  %v3461_v42 = vld [vmem:[%s4919_s1 + $0x70] ss:$8 sps:$4 sm:$0xff]  }
   0xf   :  { %1389 = vmatpush1.bf16.msra.mxu0 %v3387_v7  ;;  %1306 = vmatprep.subr.bf16.mxu1 %v3430_v21  ;;  %v3462_v43 = vld [vmem:[%s4919_s1 + $0x84] ss:$8 sps:$4 sm:$0xff]   ;;  %v3417_v44 = vld [vmem:[%s4919_s1 + $0x2c0] ss:$8 sps:$4 sm:$0xff]   ;;  %v3420_v45 = vld [vmem:[%s4919_s1 + $0x2d4] ss:$8 sps:$4 sm:$0xff]  }
  0x10   :  { %1390 = vmatprep.subr.bf16.mxu0 %v3388_v8  ;;  %v3467_v46 = vld [vmem:[%s4919_s1 + $0x80] ss:$8 sps:$4 sm:$0xff]   ;;  %v3468_v47 = vld [vmem:[%s4919_s1 + $0x94] ss:$8 sps:$4 sm:$0xff]   ;;  %v3423_v48 = vld [vmem:[%s4919_s1 + $0x2d0] ss:$8 sps:$4 sm:$0xff]  }
  0x11   :  { %v3426_v49 = vld [vmem:[%s4919_s1 + $0x2e4] ss:$8 sps:$4 sm:$0xff]   ;;  %v3473_v50 = vld [vmem:[%s4919_s1 + $0x90] ss:$8 sps:$4 sm:$0xff]   ;;  %v3429_v52 = vld [vmem:[%s4919_s1 + $0x2e0] ss:$8 sps:$4 sm:$0xff]  }
  0x12   :  { %1307 = vmatpush1.bf16.msra.mxu1 %v3434_v25  ;;  %v3474_v51 = vld [vmem:[%s4919_s1 + $0xa4] ss:$8 sps:$4 sm:$0xff]   ;;  %v3432_v53 = vld [vmem:[%s4919_s1 + $0x2f4] ss:$8 sps:$4 sm:$0xff]   ;;  %v3479_v54 = vld [vmem:[%s4919_s1 + $0xa0] ss:$8 sps:$4 sm:$0xff]  }
  0x13   :  { %1391 = vmatpush1.bf16.msra.mxu0 %v3390_v9  ;;  %1308 = vmatprep.subr.bf16.mxu1 %v3436_v27  ;;  %v3480_v55 = vld [vmem:[%s4919_s1 + $0xb4] ss:$8 sps:$4 sm:$0xff]   ;;  %v3435_v56 = vld [vmem:[%s4919_s1 + $0x2f0] ss:$8 sps:$4 sm:$0xff]   ;;  %v32_v57 = vld [vmem:[%s4918_s0] sm:$0xff] }
  0x14   :  { %1392 = vmatprep.subr.bf16.mxu0 %v3391_v10  ;;  %v3442_v58 = vld [vmem:[%s4919_s1 + $0x304] ss:$8 sps:$4 sm:$0xff]   ;;  %v3485_v59 = vld [vmem:[%s4919_s1 + $0xb0] ss:$8 sps:$4 sm:$0xff]   ;;  %v2965_v60 = vcombine.high %v32_v57, %v32_v57  ;;  %v3440_v63 = vld [vmem:[%s4919_s1 + $0x300] ss:$8 sps:$4 sm:$0xff]  }
  0x15   :  { %v3486_v61 = vld [vmem:[%s4919_s1 + $0xc4] ss:$8 sps:$4 sm:$0xff]   ;;  %v3448_v0 = vld [vmem:[%s4919_s1 + $0x314] ss:$8 sps:$4 sm:$0xff]   ;;  %v3491_v1 = vld [vmem:[%s4919_s1 + $0xc0] ss:$8 sps:$4 sm:$0xff]  }
  0x16   :  { %1309 = vmatpush1.bf16.msra.mxu1 %v3443_v30  ;;  %1332 = vmatprep.mubr.bf16.mxu1 %v2965_v60  ;;  %v3492_v2 = vld [vmem:[%s4919_s1 + $0xd4] ss:$8 sps:$4 sm:$0xff]   ;;  %v3446_v3 = vld [vmem:[%s4919_s1 + $0x310] ss:$8 sps:$4 sm:$0xff]   ;;  %v3454_v4 = vld [vmem:[%s4919_s1 + $0x324] ss:$8 sps:$4 sm:$0xff]  }
  0x17   :  { %1393 = vmatpush1.bf16.msra.mxu0 %v3393_v12  ;;  %1310 = vmatprep.subr.bf16.mxu1 %v3444_v31  ;;  %v3497_v5 = vld [vmem:[%s4919_s1 + $0xd0] ss:$8 sps:$4 sm:$0xff]   ;;  %v3498_v6 = vld [vmem:[%s4919_s1 + $0xe4] ss:$8 sps:$4 sm:$0xff]   ;;  %v3452_v7 = vld [vmem:[%s4919_s1 + $0x320] ss:$8 sps:$4 sm:$0xff]  }
  0x18   :  { %1394 = vmatprep.subr.bf16.mxu0 %v3394_v15  ;;  %v4131_v8 = vld [vmem:[%s4918_s0 + $0x18] sm:$0xff]  ;;  %v3503_v10 = vld [vmem:[%s4919_s1 + $0xe0] ss:$8 sps:$4 sm:$0xff]   ;;  %v3466_v14 = vld [vmem:[%s4919_s1 + $0x344] ss:$8 sps:$4 sm:$0xff]  }
  0x19   :  { %v3460_v9 = vld [vmem:[%s4919_s1 + $0x334] ss:$8 sps:$4 sm:$0xff]   ;;  %v2971_v11 = vcombine.high %v4131_v8, %v4131_v8  ;;  %v3458_v13 = vld [vmem:[%s4919_s1 + $0x330] ss:$8 sps:$4 sm:$0xff]   ;;  %v3514_v16 = vld [vmem:[%s4919_s1 + $0x104] ss:$8 sps:$4 sm:$0xff]  }
  0x1a   :  { %1311 = vmatpush1.bf16.msra.mxu1 %v3449_v34  ;;  %v3504_v12 = vld [vmem:[%s4919_s1 + $0xf4] ss:$8 sps:$4 sm:$0xff]   ;;  %v3509_v15 = vld [vmem:[%s4919_s1 + $0xf0] ss:$8 sps:$4 sm:$0xff]   ;;  %v3464_v17 = vld [vmem:[%s4919_s1 + $0x340] ss:$8 sps:$4 sm:$0xff]  }
  0x1b   :  { %1395 = vmatpush1.bf16.msra.mxu0 %v3396_v18  ;;  %1312 = vmatprep.subr.bf16.mxu1 %v3450_v35  ;;  %v2964_v18 = vcombine.low %v32_v57, %v32_v57  ;;  %v3512_v20 = vld [vmem:[%s4919_s1 + $0x100] ss:$8 sps:$4 sm:$0xff]   ;;  %v3520_v21 = vld [vmem:[%s4919_s1 + $0x114] ss:$8 sps:$4 sm:$0xff]   ;;  %v3518_v24 = vld [vmem:[%s4919_s1 + $0x110] ss:$8 sps:$4 sm:$0xff]  }
  0x1c   :  { %1396 = vmatprep.subr.bf16.mxu0 %v3397_v19  ;;  %v3472_v19 = vld [vmem:[%s4919_s1 + $0x354] ss:$8 sps:$4 sm:$0xff]   ;;  %v3526_v25 = vld [vmem:[%s4919_s1 + $0x124] ss:$8 sps:$4 sm:$0xff]   ;;  %v3476_v26 = vld [vmem:[%s4919_s1 + $0x360] ss:$8 sps:$4 sm:$0xff]  }
  0x1d   :  { %v3484_v27 = vld [vmem:[%s4919_s1 + $0x374] ss:$8 sps:$4 sm:$0xff]   ;;  %v3482_v30 = vld [vmem:[%s4919_s1 + $0x370] ss:$8 sps:$4 sm:$0xff]   ;;  %v3490_v31 = vld [vmem:[%s4919_s1 + $0x384] ss:$8 sps:$4 sm:$0xff]  }
  0x1e   :  { %1313 = vmatpush1.bf16.msra.mxu1 %v3455_v38  ;;  %v3488_v34 = vld [vmem:[%s4919_s1 + $0x380] ss:$8 sps:$4 sm:$0xff]   ;;  %v3496_v35 = vld [vmem:[%s4919_s1 + $0x394] ss:$8 sps:$4 sm:$0xff]   ;;  %v3494_v38 = vld [vmem:[%s4919_s1 + $0x390] ss:$8 sps:$4 sm:$0xff]  }
  0x1f   :  { %1397 = vmatpush1.bf16.msra.mxu0 %v3399_v22  ;;  %1314 = vmatprep.subr.bf16.mxu1 %v3456_v39  ;;  %v3470_v22 = vld [vmem:[%s4919_s1 + $0x350] ss:$8 sps:$4 sm:$0xff]   ;;  %v3502_v39 = vld [vmem:[%s4919_s1 + $0x3a4] ss:$8 sps:$4 sm:$0xff]   ;;  %v3527_v60 = vld [vmem:[%s4919_s1 + $0x3e0] ss:$8 sps:$4 sm:$0xff]  }
  0x20   :  { %1398 = vmatprep.subr.bf16.mxu0 %v3400_v23  ;;  %v3478_v23 = vld [vmem:[%s4919_s1 + $0x364] ss:$8 sps:$4 sm:$0xff]  }
  0x21   :  { %v3529_v57 = vld [vmem:[%s4919_s1 + $0x3e4] ss:$8 sps:$4 sm:$0xff]  }
  0x22   :  { %1315 = vmatpush1.bf16.msra.mxu1 %v3461_v42  ;;  %v4231_v42 = vld [vmem:[%s4918_s0 + $0x8] sm:$0xff] }
  0x23   :  { %1399 = vmatpush1.bf16.msra.mxu0 %v3402_v28  ;;  %1316 = vmatprep.subr.bf16.mxu1 %v3462_v43  ;;  %v3524_v28 = vld [vmem:[%s4919_s1 + $0x120] ss:$8 sps:$4 sm:$0xff]  }
  0x24   :  { %1400 = vmatprep.subr.bf16.mxu0 %v3403_v29  ;;  %v3532_v29 = vld [vmem:[%s4919_s1 + $0x134] ss:$8 sps:$4 sm:$0xff]   ;;  %v3500_v43 = vld [vmem:[%s4919_s1 + $0x3a0] ss:$8 sps:$4 sm:$0xff]  }
  0x26   :  { %1317 = vmatpush1.bf16.msra.mxu1 %v3467_v46  ;;  %v3550_v46 = vld [vmem:[%s4919_s1 + $0x160] ss:$8 sps:$4 sm:$0xff]  }
  0x27   :  { %1401 = vmatpush1.bf16.msra.mxu0 %v3405_v32  ;;  %1318 = vmatprep.subr.bf16.mxu1 %v3468_v47  ;;  %v3530_v32 = vld [vmem:[%s4919_s1 + $0x130] ss:$8 sps:$4 sm:$0xff]   ;;  %v3558_v47 = vld [vmem:[%s4919_s1 + $0x174] ss:$8 sps:$4 sm:$0xff]  }
  0x28   :  { %1402 = vmatprep.subr.bf16.mxu0 %v3406_v33  ;;  %v3538_v33 = vld [vmem:[%s4919_s1 + $0x144] ss:$8 sps:$4 sm:$0xff]  }
  0x2a   :  { %1319 = vmatpush1.bf16.msra.mxu1 %v3473_v50  ;;  %v3556_v50 = vld [vmem:[%s4919_s1 + $0x170] ss:$8 sps:$4 sm:$0xff]  }
  0x2b   :  { %1403 = vmatpush1.bf16.msra.mxu0 %v3408_v36  ;;  %1320 = vmatprep.subr.bf16.mxu1 %v3474_v51  ;;  %v3536_v36 = vld [vmem:[%s4919_s1 + $0x140] ss:$8 sps:$4 sm:$0xff]   ;;  %v3564_v51 = vld [vmem:[%s4919_s1 + $0x184] ss:$8 sps:$4 sm:$0xff]  }
  0x2c   :  { %1404 = vmatprep.subr.bf16.mxu0 %v3409_v37  ;;  %v3546_v37 = vld [vmem:[%s4919_s1 + $0x154] ss:$8 sps:$4 sm:$0xff]  }
  0x2e   :  { %1321 = vmatpush1.bf16.msra.mxu1 %v3479_v54  ;;  %v3562_v54 = vld [vmem:[%s4919_s1 + $0x180] ss:$8 sps:$4 sm:$0xff]  }
  0x2f   :  { %1405 = vmatpush1.bf16.msra.mxu0 %v3411_v40  ;;  %1322 = vmatprep.subr.bf16.mxu1 %v3480_v55  ;;  %v3544_v40 = vld [vmem:[%s4919_s1 + $0x150] ss:$8 sps:$4 sm:$0xff]   ;;  %v3570_v55 = vld [vmem:[%s4919_s1 + $0x194] ss:$8 sps:$4 sm:$0xff]  }
  0x30   :  { %1406 = vmatprep.subr.bf16.mxu0 %v3414_v41  ;;  %v3552_v41 = vld [vmem:[%s4919_s1 + $0x164] ss:$8 sps:$4 sm:$0xff]  }
  0x32   :  { %1323 = vmatpush1.bf16.msra.mxu1 %v3485_v59  ;;  %v3576_v59 = vld [vmem:[%s4919_s1 + $0x1a4] ss:$8 sps:$4 sm:$0xff]  }
  0x33   :  { %1407 = vmatpush1.bf16.msra.mxu0 %v3417_v44  ;;  %1324 = vmatprep.subr.bf16.mxu1 %v3486_v61  ;;  %v3508_v44 = vld [vmem:[%s4919_s1 + $0x3b4] ss:$8 sps:$4 sm:$0xff]  }
  0x34   :  { %1408 = vmatprep.subr.bf16.mxu0 %v3420_v45  ;;  %v2967_v45 = vcombine.high %v4231_v42, %v4231_v42  ;;  %v3535_v61 = vld [vmem:[%s4919_s1 + $0x3f4] ss:$8 sps:$4 sm:$0xff]  }
  0x36   :  { %1325 = vmatpush1.bf16.msra.mxu1 %v3491_v1  ;;  %v3543_v1 = vld [vmem:[%s4919_s1 + $0x404] ss:$8 sps:$4 sm:$0xff]  }
  0x37   :  { %1409 = vmatpush1.bf16.msra.mxu0 %v3423_v48  ;;  %1326 = vmatprep.subr.bf16.mxu1 %v3492_v2  ;;  %v3506_v48 = vld [vmem:[%s4919_s1 + $0x3b0] ss:$8 sps:$4 sm:$0xff]  }
  0x38   :  { %1410 = vmatprep.subr.bf16.mxu0 %v3426_v49  ;;  %v3517_v49 = vld [vmem:[%s4919_s1 + $0x3c4] ss:$8 sps:$4 sm:$0xff]   ;;  %v3580_v2 = vld [vmem:[%s4919_s1 + $0x1b0] ss:$8 sps:$4 sm:$0xff]  }
  0x3a   :  { %1327 = vmatpush1.bf16.msra.mxu1 %v3497_v5  ;;  %v2970_v5 = vcombine.low %v4131_v8, %v4131_v8  ;;  %v3594_v8 = vld [vmem:[%s4919_s1 + $0x1d4] ss:$8 sps:$4 sm:$0xff]  }
  0x3b   :  { %1411 = vmatpush1.bf16.msra.mxu0 %v3429_v52  ;;  %1328 = vmatprep.subr.bf16.mxu1 %v3498_v6  ;;  %v3515_v52 = vld [vmem:[%s4919_s1 + $0x3c0] ss:$8 sps:$4 sm:$0xff]  }
  0x3c   :  { %1412 = vmatprep.subr.bf16.mxu0 %v3432_v53  ;;  %v3523_v53 = vld [vmem:[%s4919_s1 + $0x3d4] ss:$8 sps:$4 sm:$0xff]   ;;  %v3541_v6 = vld [vmem:[%s4919_s1 + $0x400] ss:$8 sps:$4 sm:$0xff]  }
  0x3e   :  { %1329 = vmatpush1.bf16.msra.mxu1 %v3503_v10  ;;  %v3586_v10 = vld [vmem:[%s4919_s1 + $0x1c0] ss:$8 sps:$4 sm:$0xff]  }
  0x3f   :  { %1413 = vmatpush1.bf16.msra.mxu0 %v3435_v56  ;;  %1330 = vmatprep.subr.bf16.mxu1 %v3504_v12  ;;  %v3521_v56 = vld [vmem:[%s4919_s1 + $0x3d0] ss:$8 sps:$4 sm:$0xff]   ;;  %v3555_v12 = vld [vmem:[%s4919_s1 + $0x424] ss:$8 sps:$4 sm:$0xff]  }
  0x40   :  { %1423 = vmatprep.subr.bf16.mxu0 %v3442_v58  ;;  %v3568_v58 = vld [vmem:[%s4919_s1 + $0x190] ss:$8 sps:$4 sm:$0xff]  }
  0x42   :  { %1415 = vmatmul.mubr.bf16.vlgmr.msra.gmra.mrb[0].mxu0 %v2968_v62  ;;  %1331 = vmatpush1.bf16.msra.mxu1 %v3509_v15  ;;  %v3574_v62 = vld [vmem:[%s4919_s1 + $0x1a0] ss:$8 sps:$4 sm:$0xff]  }
  0x43   :  { %1424 = vmatpush1.bf16.msra.mxu0 %v3440_v63  ;;  %1455 = vmatprep.mubr.bf16.mxu0 %v2971_v11  ;;  %v3582_v63 = vld [vmem:[%s4919_s1 + $0x1b4] ss:$8 sps:$4 sm:$0xff]   ;;  %v3547_v11 = vld [vmem:[%s4919_s1 + $0x410] ss:$8 sps:$4 sm:$0xff]   ;;  %v3553_v15 = vld [vmem:[%s4919_s1 + $0x420] ss:$8 sps:$4 sm:$0xff]  }
  0x44   :  { %1425 = vmatprep.subr.bf16.mxu0 %v3448_v0  ;;  %1341 = vmatprep.subr.bf16.mxu1 %v3514_v16  ;;  %v3533_v0 = vld [vmem:[%s4919_s1 + $0x3f0] ss:$8 sps:$4 sm:$0xff]   ;;  %v3561_v16 = vld [vmem:[%s4919_s1 + $0x434] ss:$8 sps:$4 sm:$0xff]  }
  0x45   :  { %1333 = vmatmul.mubr.bf16.vlgmr.msra.gmra.mrb[0].mxu1 %v2964_v18  ;;  %v3606_v18 = vld [vmem:[%s4919_s1 + $0x1f4] ss:$8 sps:$4 sm:$0xff]  }
  0x46   :  { %1342 = vmatpush1.bf16.msra.mxu1 %v3512_v20  ;;  %1373 = vmatprep.mubr.bf16.mxu1 %v2967_v45  ;;  %v3567_v20 = vld [vmem:[%s4919_s1 + $0x444] ss:$8 sps:$4 sm:$0xff]  }
  0x47   :  { %1426 = vmatpush1.bf16.msra.mxu0 %v3446_v3  ;;  %1343 = vmatprep.subr.bf16.mxu1 %v3520_v21  ;;  %v4307_v3 = vld [vmem:[%s4918_s0 + $0x20] sm:$0xff]  ;;  %v3604_v21 = vld [vmem:[%s4919_s1 + $0x1f0] ss:$8 sps:$4 sm:$0xff]  }
  0x48   :  { %1427 = vmatprep.subr.bf16.mxu0 %v3454_v4  ;;  %v3588_v4 = vld [vmem:[%s4919_s1 + $0x1c4] ss:$8 sps:$4 sm:$0xff]  }
  0x4a   :  { %1344 = vmatpush1.bf16.msra.mxu1 %v3518_v24  ;;  %v3573_v24 = vld [vmem:[%s4919_s1 + $0x454] ss:$8 sps:$4 sm:$0xff]  }
  0x4b   :  { %1428 = vmatpush1.bf16.msra.mxu0 %v3452_v7  ;;  %1345 = vmatprep.subr.bf16.mxu1 %v3526_v25  ;;  %v3549_v7 = vld [vmem:[%s4919_s1 + $0x414] ss:$8 sps:$4 sm:$0xff]   ;;  %v3662_v25 = vld [vmem:[%s4919_s1 + $0x600] ss:$8 sps:$4 sm:$0xff]  }
  0x4c   :  { %1429 = vmatprep.subr.bf16.mxu0 %v3460_v9  ;;  %v2973_v9 = vcombine.high %v4307_v3, %v4307_v3 }
  0x4e   :  { %1346 = vmatpush1.bf16.msra.mxu1 %v3524_v28  ;;  %v3571_v28 = vld [vmem:[%s4919_s1 + $0x450] ss:$8 sps:$4 sm:$0xff]  }
  0x4f   :  { %1430 = vmatpush1.bf16.msra.mxu0 %v3458_v13  ;;  %1347 = vmatprep.subr.bf16.mxu1 %v3532_v29  ;;  %v3592_v13 = vld [vmem:[%s4919_s1 + $0x1d0] ss:$8 sps:$4 sm:$0xff]   ;;  %v3579_v29 = vld [vmem:[%s4919_s1 + $0x464] ss:$8 sps:$4 sm:$0xff]  }
  0x50   :  { %1431 = vmatprep.subr.bf16.mxu0 %v3466_v14  ;;  %v3600_v14 = vld [vmem:[%s4919_s1 + $0x1e4] ss:$8 sps:$4 sm:$0xff]  }
  0x52   :  { %1348 = vmatpush1.bf16.msra.mxu1 %v3530_v32  ;;  %v3577_v32 = vld [vmem:[%s4919_s1 + $0x460] ss:$8 sps:$4 sm:$0xff]  }
  0x53   :  { %1432 = vmatpush1.bf16.msra.mxu0 %v3464_v17  ;;  %1349 = vmatprep.subr.bf16.mxu1 %v3538_v33  ;;  %v3598_v17 = vld [vmem:[%s4919_s1 + $0x1e0] ss:$8 sps:$4 sm:$0xff]   ;;  %v3852_v33 = vmov 0  }
  0x54   :  { %1433 = vmatprep.subr.bf16.mxu0 %v3472_v19  ;;  %v3559_v19 = vld [vmem:[%s4919_s1 + $0x430] ss:$8 sps:$4 sm:$0xff]  }
  0x56   :  { %1350 = vmatpush1.bf16.msra.mxu1 %v3536_v36  ;;  %v3682_v36 = vld [vmem:[%s4919_s1 + $0x634] ss:$8 sps:$4 sm:$0xff]  }
  0x57   :  { %1434 = vmatpush1.bf16.msra.mxu0 %v3470_v22  ;;  %1351 = vmatprep.subr.bf16.mxu1 %v3546_v37  ;;  %v3664_v22 = vld [vmem:[%s4919_s1 + $0x604] ss:$8 sps:$4 sm:$0xff]   ;;  %v3583_v37 = vld [vmem:[%s4919_s1 + $0x470] ss:$8 sps:$4 sm:$0xff]  }
  0x58   :  { %1435 = vmatprep.subr.bf16.mxu0 %v3478_v23  ;;  %v3565_v23 = vld [vmem:[%s4919_s1 + $0x440] ss:$8 sps:$4 sm:$0xff]  }
  0x5a   :  { %1352 = vmatpush1.bf16.msra.mxu1 %v3544_v40 }
  0x5b   :  { %1436 = vmatpush1.bf16.msra.mxu0 %v3476_v26  ;;  %1353 = vmatprep.subr.bf16.mxu1 %v3552_v41  ;;  %v2966_v26 = vcombine.low %v4231_v42, %v4231_v42 }
  0x5c   :  { %1437 = vmatprep.subr.bf16.mxu0 %v3484_v27  ;;  %v3670_v27 = vld [vmem:[%s4919_s1 + $0x614] ss:$8 sps:$4 sm:$0xff]  }
  0x5e   :  { %1354 = vmatpush1.bf16.msra.mxu1 %v3550_v46 }
  0x5f   :  { %1438 = vmatpush1.bf16.msra.mxu0 %v3482_v30  ;;  %1355 = vmatprep.subr.bf16.mxu1 %v3558_v47  ;;  %v3668_v30 = vld [vmem:[%s4919_s1 + $0x610] ss:$8 sps:$4 sm:$0xff]  }
  0x60   :  { %1439 = vmatprep.subr.bf16.mxu0 %v3490_v31  ;;  %v3676_v31 = vld [vmem:[%s4919_s1 + $0x624] ss:$8 sps:$4 sm:$0xff]  }
  0x62   :  { %1356 = vmatpush1.bf16.msra.mxu1 %v3556_v50 }
  0x63   :  { %1440 = vmatpush1.bf16.msra.mxu0 %v3488_v34  ;;  %1357 = vmatprep.subr.bf16.mxu1 %v3564_v51  ;;  %v3585_v34 = vld [vmem:[%s4919_s1 + $0x474] ss:$8 sps:$4 sm:$0xff]  }
  0x64   :  { %1441 = vmatprep.subr.bf16.mxu0 %v3496_v35  ;;  %v3674_v35 = vld [vmem:[%s4919_s1 + $0x620] ss:$8 sps:$4 sm:$0xff]  }
  0x66   :  { %1358 = vmatpush1.bf16.msra.mxu1 %v3562_v54 }
  0x67   :  { %1442 = vmatpush1.bf16.msra.mxu0 %v3494_v38  ;;  %1359 = vmatprep.subr.bf16.mxu1 %v3570_v55 }
  0x68   :  { %1443 = vmatprep.subr.bf16.mxu0 %v3502_v39 }
  0x6a   :  { %1360 = vmatpush1.bf16.msra.mxu1 %v3568_v58 }
  0x6b   :  { %1444 = vmatpush1.bf16.msra.mxu0 %v3500_v43  ;;  %1361 = vmatprep.subr.bf16.mxu1 %v3576_v59 }
  0x6c   :  { %1445 = vmatprep.subr.bf16.mxu0 %v3508_v44 }
  0x6e   :  { %1362 = vmatpush1.bf16.msra.mxu1 %v3574_v62 }
  0x6f   :  { %1446 = vmatpush1.bf16.msra.mxu0 %v3506_v48  ;;  %1363 = vmatprep.subr.bf16.mxu1 %v3582_v63 }
  0x70   :  { %1447 = vmatprep.subr.bf16.mxu0 %v3517_v49 }
  0x72   :  { %1364 = vmatpush1.bf16.msra.mxu1 %v3580_v2 }
  0x73   :  { %1448 = vmatpush1.bf16.msra.mxu0 %v3515_v52  ;;  %1365 = vmatprep.subr.bf16.mxu1 %v3588_v4 }
  0x74   :  { %1449 = vmatprep.subr.bf16.mxu0 %v3523_v53 }
  0x76   :  { %1366 = vmatpush1.bf16.msra.mxu1 %v3586_v10 }
  0x77   :  { %1450 = vmatpush1.bf16.msra.mxu0 %v3521_v56  ;;  %1367 = vmatprep.subr.bf16.mxu1 %v3594_v8 }
  0x78   :  { %1451 = vmatprep.subr.bf16.mxu0 %v3529_v57 }
  0x7a   :  { %1368 = vmatpush1.bf16.msra.mxu1 %v3592_v13 }
  0x7b   :  { %1452 = vmatpush1.bf16.msra.mxu0 %v3527_v60  ;;  %1369 = vmatprep.subr.bf16.mxu1 %v3600_v14 }
  0x7c   :  { %1453 = vmatprep.subr.bf16.mxu0 %v3535_v61 }
  0x7e   :  { %1370 = vmatpush1.bf16.msra.mxu1 %v3598_v17 }
  0x7f   :  { %1454 = vmatpush1.bf16.msra.mxu0 %v3533_v0  ;;  %1371 = vmatprep.subr.bf16.mxu1 %v3606_v18 }
  0x80   :  { %1464 = vmatprep.subr.bf16.mxu0 %v3543_v1 }
  0x82   :  { %1456 = vmatmul.mubr.bf16.vlgmr.msra.gmra.mrb[0].mxu0 %v2970_v5  ;;  %1372 = vmatpush1.bf16.msra.mxu1 %v3604_v21 }
  0x83   :  { %1465 = vmatpush1.bf16.msra.mxu0 %v3541_v6  ;;  %1496 = vmatprep.mubr.bf16.mxu0 %v2973_v9 }
  0x84   :  { %1466 = vmatprep.subr.bf16.mxu0 %v3549_v7  ;;  %1546 = vmatprep.subr.bf16.mxu1 %v3664_v22 }
  0x85   :  { %1374 = vmatmul.mubr.bf16.vlgmr.msra.gmra.mrb[0].mxu1 %v2966_v26 }
  0x86   :  { %1547 = vmatpush1.bf16.msra.mxu1 %v3662_v25  ;;  %1578 = vmatprep.mubr.bf16.mxu1 %v3852_v33 }
  0x87   :  { %1467 = vmatpush1.bf16.msra.mxu0 %v3547_v11  ;;  %1548 = vmatprep.subr.bf16.mxu1 %v3670_v27 }
  0x88   :  { %1468 = vmatprep.subr.bf16.mxu0 %v3555_v12 }
  0x8a   :  { %1549 = vmatpush1.bf16.msra.mxu1 %v3668_v30 }
  0x8b   :  { %1469 = vmatpush1.bf16.msra.mxu0 %v3553_v15  ;;  %1550 = vmatprep.subr.bf16.mxu1 %v3676_v31 }
  0x8c   :  { %1470 = vmatprep.subr.bf16.mxu0 %v3561_v16 }
  0x8f   :  { %1471 = vmatpush1.bf16.msra.mxu0 %v3559_v19 }
  0x90   :  { %1472 = vmatprep.subr.bf16.mxu0 %v3567_v20 }
  0x93   :  { %1473 = vmatpush1.bf16.msra.mxu0 %v3565_v23 }
  0x94   :  { %1474 = vmatprep.subr.bf16.mxu0 %v3573_v24 }
  0x97   :  { %1475 = vmatpush1.bf16.msra.mxu0 %v3571_v28 }
  0x98   :  { %1476 = vmatprep.subr.bf16.mxu0 %v3579_v29 }
  0x9b   :  { %1477 = vmatpush1.bf16.msra.mxu0 %v3577_v32 }
  0x9c   :  { %16 = vsyncpa [#allocation9], 0  ;;  %1478 = vmatprep.subr.bf16.mxu0 %v3585_v34  ;;  %v3591_v38 = vld [vmem:[%s4919_s1 + $0x484] ss:$8 sps:$4 sm:$0xff]   ;;  %1551 = vmatpush1.bf16.msra.mxu1 %v3674_v35  ;;  %v3680_v39 = vld [vmem:[%s4919_s1 + $0x630] ss:$8 sps:$4 sm:$0xff]   ;;  %v2972_v58 = vcombine.low %v4307_v3, %v4307_v3 }
  0x9d   :  { %1552 = vmatprep.subr.bf16.mxu1 %v3682_v36  ;;  %v3589_v40 = vld [vmem:[%s4919_s1 + $0x480] ss:$8 sps:$4 sm:$0xff]   ;;  %v3688_v41 = vld [vmem:[%s4918_s0 + $0x30] ss:$0 sps:$4 sm:$0xff]   ;;  %v3597_v42 = vld [vmem:[%s4919_s1 + $0x494] ss:$8 sps:$4 sm:$0xff]  }
  0x9e   :  { %vm1296_vm0 = vcmask 523264   ;;  %v3595_v43 = vld [vmem:[%s4919_s1 + $0x490] ss:$8 sps:$4 sm:$0xff]   ;;  %v3603_v44 = vld [vmem:[%s4919_s1 + $0x4a4] ss:$8 sps:$4 sm:$0xff]   ;;  %vm1702_vm1 = vcmask 1043456  }
  0x9f   :  { %1479 = vmatpush1.bf16.msra.mxu0 %v3583_v37  ;;  %v3601_v45 = vld [vmem:[%s4919_s1 + $0x4a0] ss:$8 sps:$4 sm:$0xff]   ;;  %v3609_v46 = vld [vmem:[%s4919_s1 + $0x4b4] ss:$8 sps:$4 sm:$0xff]   ;;  %v3607_v47 = vld [vmem:[%s4919_s1 + $0x4b0] ss:$8 sps:$4 sm:$0xff]  }
  0xa0   :  { %1480 = vmatprep.subr.bf16.mxu0 %v3591_v38  ;;  %1553 = vmatpush1.bf16.msra.mxu1 %v3680_v39  ;;  %v3614_v48 = vld [vmem:[%s4919_s1 + $0x4c4] ss:$8 sps:$4 sm:$0xff]   ;;  %v3612_v49 = vld [vmem:[%s4919_s1 + $0x4c0] ss:$8 sps:$4 sm:$0xff]   ;;  %v3617_v50 = vld [vmem:[%s4919_s1 + $0x4d4] ss:$8 sps:$4 sm:$0xff]  }
  0xa1   :  { %1706 = vmatprep.subr.bf16.mxu1 %v3852_v33  ;;  %v3615_v51 = vld [vmem:[%s4919_s1 + $0x4d0] ss:$8 sps:$4 sm:$0xff]   ;;  %v3620_v52 = vld [vmem:[%s4919_s1 + $0x4e4] ss:$8 sps:$4 sm:$0xff]   ;;  %v3618_v53 = vld [vmem:[%s4919_s1 + $0x4e0] ss:$8 sps:$4 sm:$0xff]  }
  0xa2   :  { %v3623_v54 = vld [vmem:[%s4919_s1 + $0x4f4] ss:$8 sps:$4 sm:$0xff]   ;;  %v3621_v55 = vld [vmem:[%s4919_s1 + $0x4f0] ss:$8 sps:$4 sm:$0xff]   ;;  %v3628_v56 = vld [vmem:[%s4919_s1 + $0x504] ss:$8 sps:$4 sm:$0xff]  }
  0xa3   :  { %1481 = vmatpush1.bf16.msra.mxu0 %v3589_v40  ;;  %3177 = vmatmul.mubr.msk.bf16.vlgmr.msra.gmra.mrb[4].mxu1 %vm1296_vm0, %v3688_v41  ;;  %v4467_v57 = vld [vmem:[%s4918_s0 + $0x28] sm:$0xff]  ;;  %v3631_v61 = vld [vmem:[%s4919_s1 + $0x514] ss:$8 sps:$4 sm:$0xff]   ;;  %v3629_v62 = vld [vmem:[%s4919_s1 + $0x510] ss:$8 sps:$4 sm:$0xff]   ;;  %vm1784_vm2 = vcmask 123904  }
  0xa4   :  { %1482 = vmatprep.subr.bf16.mxu0 %v3597_v42  ;;  %v3626_v59 = vld [vmem:[%s4919_s1 + $0x500] ss:$8 sps:$4 sm:$0xff]   ;;  %v2975_v60 = vcombine.high %v4467_v57, %v4467_v57  ;;  %v3634_v63 = vld [vmem:[%s4919_s1 + $0x524] ss:$8 sps:$4 sm:$0xff]   ;;  %v3637_v1 = vld [vmem:[%s4919_s1 + $0x534] ss:$8 sps:$4 sm:$0xff]   ;;  %v2974_v34 = vcombine.low %v4467_v57, %v4467_v57 }
  0xa5   :  { %v3632_v0 = vld [vmem:[%s4919_s1 + $0x520] ss:$8 sps:$4 sm:$0xff]   ;;  %v3635_v2 = vld [vmem:[%s4919_s1 + $0x530] ss:$8 sps:$4 sm:$0xff]   ;;  %v3640_v3 = vld [vmem:[%s4919_s1 + $0x544] ss:$8 sps:$4 sm:$0xff]  }
  0xa6   :  { %v3638_v4 = vld [vmem:[%s4919_s1 + $0x540] ss:$8 sps:$4 sm:$0xff]   ;;  %v3643_v5 = vld [vmem:[%s4919_s1 + $0x554] ss:$8 sps:$4 sm:$0xff]   ;;  %v3641_v6 = vld [vmem:[%s4919_s1 + $0x550] ss:$8 sps:$4 sm:$0xff]  }
  0xa7   :  { %1483 = vmatpush1.bf16.msra.mxu0 %v3595_v43  ;;  %v3646_v7 = vld [vmem:[%s4919_s1 + $0x564] ss:$8 sps:$4 sm:$0xff]   ;;  %v3644_v9 = vld [vmem:[%s4919_s1 + $0x560] ss:$8 sps:$4 sm:$0xff]   ;;  %v3649_v10 = vld [vmem:[%s4919_s1 + $0x574] ss:$8 sps:$4 sm:$0xff]  }
  0xa8   :  { %1484 = vmatprep.subr.bf16.mxu0 %v3603_v44  ;;  %v3647_v8 = vld [vmem:[%s4919_s1 + $0x570] ss:$8 sps:$4 sm:$0xff]   ;;  %v3652_v11 = vld [vmem:[%s4919_s1 + $0x584] ss:$8 sps:$4 sm:$0xff]   ;;  %v3650_v12 = vld [vmem:[%s4919_s1 + $0x580] ss:$8 sps:$4 sm:$0xff]  }
  0xa9   :  { %v3655_v13 = vld [vmem:[%s4919_s1 + $0x594] ss:$8 sps:$4 sm:$0xff]   ;;  %v3653_v14 = vld [vmem:[%s4919_s1 + $0x590] ss:$8 sps:$4 sm:$0xff]   ;;  %v3658_v15 = vld [vmem:[%s4919_s1 + $0x5a4] ss:$8 sps:$4 sm:$0xff]  }
  0xaa   :  { %v3656_v16 = vld [vmem:[%s4919_s1 + $0x5a0] ss:$8 sps:$4 sm:$0xff]   ;;  %v3661_v17 = vld [vmem:[%s4919_s1 + $0x5b4] ss:$8 sps:$4 sm:$0xff]   ;;  %v3659_v19 = vld [vmem:[%s4919_s1 + $0x5b0] ss:$8 sps:$4 sm:$0xff]  }
  0xab   :  { %1485 = vmatpush1.bf16.msra.mxu0 %v3601_v45  ;;  %v3689_v18 = vld [vmem:[%s4921_s3] sm:$0xff]   ;;  %v3690_v20 = vld [vmem:[%s4921_s3 + $0x8] sm:$0xff]   ;;  %v3691_v23 = vld [vmem:[%s4921_s3 + $0x10] sm:$0xff]   ;;  %v3853_v43 = vmov 1966171168   ;;  %v241_v45 = vlaneseq  ;;  %vm1698_vm3 = vcmask 588800  }
  0xac   :  { %1486 = vmatprep.subr.bf16.mxu0 %v3609_v46  ;;  %1707 = vmatpush1.bf16.msra.mxu1 %v3689_v18  ;;  %v3667_v21 = vld [vmem:[%s4919_s1 + $0x5c4] ss:$8 sps:$4 sm:$0xff]   ;;  %v3665_v22 = vld [vmem:[%s4919_s1 + $0x5c0] ss:$8 sps:$4 sm:$0xff]   ;;  %v3673_v24 = vld [vmem:[%s4919_s1 + $0x5d4] ss:$8 sps:$4 sm:$0xff]   ;;  %v1752_v44 = vunpack.c.l.s4 %v3853_v43 }
  0xad   :  { %1708 = vmatprep.subr.bf16.mxu1 %v3852_v33  ;;  %v3671_v25 = vld [vmem:[%s4919_s1 + $0x5d0] ss:$8 sps:$4 sm:$0xff]   ;;  %v3679_v27 = vld [vmem:[%s4919_s1 + $0x5e4] ss:$8 sps:$4 sm:$0xff]   ;;  %v3677_v28 = vld [vmem:[%s4919_s1 + $0x5e0] ss:$8 sps:$4 sm:$0xff]  }
  0xae   :  { %v3692_v26 = vld [vmem:[%s4921_s3 + $0x18] sm:$0xff]   ;;  %v3693_v29 = vld [vmem:[%s4921_s3 + $0x20] sm:$0xff]   ;;  %v3694_v32 = vld [vmem:[%s4921_s3 + $0x28] sm:$0xff]   ;;  %v3854_v46 = vmov 0.0   ;;  %vm1789_vm4 = vcmask 253952   ;;  %vm3856_vm5 = vmmov 0  }
  0xaf   :  { %1487 = vmatpush1.bf16.msra.mxu0 %v3607_v47  ;;  %v3685_v30 = vld [vmem:[%s4919_s1 + $0x5f4] ss:$8 sps:$4 sm:$0xff]   ;;  %v3683_v31 = vld [vmem:[%s4919_s1 + $0x5f0] ss:$8 sps:$4 sm:$0xff]   ;;  %v3697_v37 = vld [vmem:[%s4921_s3 + $0x40] sm:$0xff]   ;;  %v1753_v47 = vunpack.c.0.s8 %v1752_v44  ;;  %vm1748_vm6 = vcmask 57344  }
  0xb0   :  { %1488 = vmatprep.subr.bf16.mxu0 %v3614_v48  ;;  %1709 = vmatpush1.bf16.msra.mxu1 %v3690_v20  ;;  %v3695_v35 = vld [vmem:[%s4921_s3 + $0x30] sm:$0xff]   ;;  %v3696_v36 = vld [vmem:[%s4921_s3 + $0x38] sm:$0xff]   ;;  %v3698_v38 = vld [vmem:[%s4921_s3 + $0x48] sm:$0xff]   ;;  %1785 = vst.msk [vmem:[#allocation4] sm:$0x3] %vm1784_vm2, %v3854_v46  ;;  %v242_v48 = vshrl.u32 %v241_v45, 7 }
  0xb1   :  { %1710 = vmatprep.subr.bf16.mxu1 %v3852_v33  ;;  %v3699_v39 = vld [vmem:[%s4921_s3 + $0x50] sm:$0xff]   ;;  %v3700_v40 = vld [vmem:[%s4921_s3 + $0x58] sm:$0xff]   ;;  %v3701_v41 = vld [vmem:[%s4921_s3 + $0x60] ss:$0 sps:$4 sm:$0xff]   ;;  %1786 = vst.msk [vmem:[#allocation4 + $0x2] sm:$0x3] %vm1784_vm2, %v3854_v46 }
  0xb2   :  { %v1704_v42 = vsel %vm1702_vm1, %v3701_v41, 0  ;;  %1787 = vst.msk [vmem:[#allocation5] sm:$0x3] %vm1784_vm2, %v3854_v46  ;;  %1788 = vst.msk [vmem:[#allocation5 + $0x2] sm:$0x3] %vm1784_vm2, %v3854_v46  ;;  %s3855_s3 = smov 16  }
  0xb3   :  { %1489 = vmatpush1.bf16.msra.mxu0 %v3612_v49  ;;  %1790 = vst.msk [vmem:[#allocation3] sm:$0x1] %vm1789_vm4, %v3852_v33  ;;  %v3703_v18 = vld [vmem:[%s4923_s5 + $0x8] sm:$0xff]   ;;  %vm1813_vm7 = vcmask 254080   ;;  %vm1839_vm8 = vcmask 261120   ;;  %s3857_s10 = smov 96  }
  0xb4   :  { %1490 = vmatprep.subr.bf16.mxu0 %v3617_v50  ;;  %1711 = vmatpush1.bf16.msra.mxu1 %v3691_v23  ;;  %v4628_v50 = vsub.s32 %v1753_v47, %v242_v48  ;;  %s3858_s11 = smov 32   ;;  %s3859_s15 = smov 80   ;;  %vm1941_vm9 = vcmask 122880  }
  0xb5   :  { %1712 = vmatprep.subr.bf16.mxu1 %v3852_v33  ;;  %s3860_s20 = smov 112  }
  0xb7   :  { %1491 = vmatpush1.bf16.msra.mxu0 %v3615_v51 }
  0xb8   :  { %1492 = vmatprep.subr.bf16.mxu0 %v3620_v52  ;;  %1713 = vmatpush1.bf16.msra.mxu1 %v3692_v26 }
  0xb9   :  { %1714 = vmatprep.subr.bf16.mxu1 %v3852_v33 }
  0xbb   :  { %1493 = vmatpush1.bf16.msra.mxu0 %v3618_v53  ;;  %v1793_v53 = vld [vmem:[#allocation4] sm:$0x3] }
  0xbc   :  { %1494 = vmatprep.subr.bf16.mxu0 %v3623_v54  ;;  %1715 = vmatpush1.bf16.msra.mxu1 %v3693_v29 }
  0xbd   :  { %1716 = vmatprep.subr.bf16.mxu1 %v3852_v33 }
  0xbf   :  { %1495 = vmatpush1.bf16.msra.mxu0 %v3621_v55  ;;  %v1794_v55 = vpack.c.bf16 %v1793_v53, %v1793_v53 }
  0xc0   :  { %1505 = vmatprep.subr.bf16.mxu0 %v3628_v56  ;;  %1717 = vmatpush1.bf16.msra.mxu1 %v3694_v32 }
  0xc1   :  { %1718 = vmatprep.subr.bf16.mxu1 %v3852_v33  ;;  %v1802_v56 = vrot.slane %v1794_v55, %v4628_v50 }
  0xc2   :  { %1497 = vmatmul.mubr.bf16.vlgmr.msra.gmra.mrb[0].mxu0 %v2972_v58 }
  0xc3   :  { %1506 = vmatpush1.bf16.msra.mxu0 %v3626_v59  ;;  %1537 = vmatprep.mubr.bf16.mxu0 %v2975_v60  ;;  %v1809_v57 = vrot.slane %v1802_v56, %v4628_v50 }
  0xc4   :  { %1507 = vmatprep.subr.bf16.mxu0 %v3631_v61  ;;  %1719 = vmatpush1.bf16.msra.mxu1 %v3695_v35 }
  0xc5   :  { %1720 = vmatprep.subr.bf16.mxu1 %v3852_v33  ;;  %1810 = vrot.lane.b32.xlu0 %v1809_v57, %s3855_s3  ;;  %v1944_v57 = vld [vmem:[#allocation4 + $0x2] sm:$0x3] }
  0xc7   :  { %1508 = vmatpush1.bf16.msra.mxu0 %v3629_v62  ;;  %v243_v62 = vsub.s32 0, %v242_v48 }
  0xc8   :  { %1509 = vmatprep.subr.bf16.mxu0 %v3634_v63  ;;  %1721 = vmatpush1.bf16.msra.mxu1 %v3696_v36  ;;  %v239_v63 = vld [vmem:[%s4920_s2] sm:$0x3] }
  0xc9   :  { %1722 = vmatprep.subr.bf16.mxu1 %v3852_v33 }
  0xcb   :  { %1510 = vmatpush1.bf16.msra.mxu0 %v3632_v0  ;;  %v247_v0 = vsub.s32 1, %v242_v48 }
  0xcc   :  { %1511 = vmatprep.subr.bf16.mxu0 %v3637_v1  ;;  %1723 = vmatpush1.bf16.msra.mxu1 %v3697_v37  ;;  %v244_v1 = vrot.slane %v239_v63, %v243_v62  ;;  %v4666_v37 = vld [vmem:[%s4924_s6] ss:$0 sm:$0xff]  ;;  %v3705_v62 = vld [vmem:[%s4923_s5 + $0x18] sm:$0xff]  }
  0xcd   :  { %1724 = vmatprep.subr.bf16.mxu1 %v3852_v33 }
  0xcf   :  { %1512 = vmatpush1.bf16.msra.mxu0 %v3635_v2  ;;  %v248_v2 = vrot.slane %v239_v63, %v247_v0 }
  0xd0   :  { %1513 = vmatprep.subr.bf16.mxu0 %v3640_v3  ;;  %1725 = vmatpush1.bf16.msra.mxu1 %v3698_v38 }
  0xd1   :  { %1726 = vmatprep.subr.bf16.mxu1 %v3852_v33 }
  0xd3   :  { %1514 = vmatpush1.bf16.msra.mxu0 %v3638_v4 }
  0xd4   :  { %1515 = vmatprep.subr.bf16.mxu0 %v3643_v5  ;;  %1727 = vmatpush1.bf16.msra.mxu1 %v3699_v39 }
  0xd5   :  { %1728 = vmatprep.subr.bf16.mxu1 %v3852_v33 }
  0xd7   :  { %1516 = vmatpush1.bf16.msra.mxu0 %v3641_v6 }
  0xd8   :  { %1517 = vmatprep.subr.bf16.mxu0 %v3646_v7  ;;  %1729 = vmatpush1.bf16.msra.mxu1 %v3700_v40 }
  0xd9   :  { %1730 = vmatprep.subr.bf16.mxu1 %v3852_v33  ;;  %v3178_v33 = vld [vmem:[%s4922_s4] ss:$0 sm:$0xff] }
  0xdb   :  { %1518 = vmatpush1.bf16.msra.mxu0 %v3644_v9 }
  0xdc   :  { %1519 = vmatprep.subr.bf16.mxu0 %v3649_v10  ;;  %1731 = vmatpush1.bf16.msra.mxu1 %v1704_v42 }
  0xdd   :  { %3277 = vmatprep.subr.bf16.mxu1 %v3854_v46 }
  0xdf   :  { %1520 = vmatpush1.bf16.msra.mxu0 %v3647_v8 }
  0xe0   :  { %1521 = vmatprep.subr.bf16.mxu0 %v3652_v11 }
  0xe3   :  { %1522 = vmatpush1.bf16.msra.mxu0 %v3650_v12 }
  0xe4   :  { %1523 = vmatprep.subr.bf16.mxu0 %v3655_v13 }
  0xe7   :  { %1524 = vmatpush1.bf16.msra.mxu0 %v3653_v14 }
  0xe8   :  { %1525 = vmatprep.subr.bf16.mxu0 %v3658_v15 }
  0xeb   :  { %1526 = vmatpush1.bf16.msra.mxu0 %v3656_v16 }
  0xec   :  { %1527 = vmatprep.subr.bf16.mxu0 %v3661_v17  ;;  %v3702_v17 = vld [vmem:[%s4923_s5] sm:$0xff]  }
  0xef   :  { %1528 = vmatpush1.bf16.msra.mxu0 %v3659_v19  ;;  %v1890_v19 = vld [vmem:[#allocation5] sm:$0x3] }
  0xf0   :  { %1529 = vmatprep.subr.bf16.mxu0 %v3667_v21  ;;  %1892 = vrot.lane.b32.xlu1 %v1890_v19, %s3855_s3 }
  0xf3   :  { %1530 = vmatpush1.bf16.msra.mxu0 %v3665_v22 }
  0xf4   :  { %1531 = vmatprep.subr.bf16.mxu0 %v3673_v24 }
  0xf7   :  { %1532 = vmatpush1.bf16.msra.mxu0 %v3671_v25 }
  0xf8   :  { %1533 = vmatprep.subr.bf16.mxu0 %v3679_v27 }
  0xfb   :  { %1534 = vmatpush1.bf16.msra.mxu0 %v3677_v28 }
  0xfc   :  { %1535 = vmatprep.subr.bf16.mxu0 %v3685_v30 }
  0xff   :  { %1536 = vmatpush1.bf16.msra.mxu0 %v3683_v31 }
 0x102   :  { %1538 = vmatmul.mubr.bf16.vlgmr.msra.gmra.mrb[0].mxu0 %v2974_v34 }
 0x137   :  { %v1811_v34 = vpop.permute.xlu0 %1810 }
 0x158   :  { %v1375_v49 = vpop.f32.mrb[0].mxu1 }
 0x159   :  { %v1377_v51 = vpop.f32.mrb[1].mxu1  ;;  %v3341_v3 = vadd.f32 %v1375_v49, %v244_v1 }
 0x15a   :  { %v1379_v52 = vpop.f32.mrb[2].mxu1  ;;  %v3344_v4 = vadd.f32 %v1377_v51, %v248_v2 }
 0x15b   :  { %v1380_v54 = vpop.f32.mrb[3].mxu1 }
 0x162   :  { %v1893_v52 = vpop.permute.xlu1 %1892 }
 0x176   :  { %v1580_v58 = vpop.f32.mrb[4].mxu1 }
 0x177   :  { %v1582_v59 = vpop.f32.mrb[5].mxu1 }
 0x178   :  { %v1584_v60 = vpop.f32.mrb[6].mxu1 }
 0x179   :  { %v1585_v61 = vpop.f32.mrb[7].mxu1 }
 0x1d5   :  { %v1539_v5 = vpop.f32.mrb[0].mxu0 }
 0x1d6   :  { %v3342_v6 = vadd.f32 %v3341_v3, %v1539_v5  ;;  %v1541_v7 = vpop.f32.mrb[1].mxu0 }
 0x1d7   :  { %v3345_v9 = vadd.f32 %v3344_v4, %v1541_v7  ;;  %v1543_v10 = vpop.f32.mrb[2].mxu0 }
 0x1d8   :  { %v3343_v8 = vadd.f32 %v3342_v6, %v1580_v58  ;;  %v1544_v11 = vpop.f32.mrb[3].mxu0  ;;  %v1945_v58 = vpack.c.bf16 %v1944_v57, %v1944_v57 }
 0x1d9   :  { %v3346_v12 = vadd.f32 %v3345_v9, %v1582_v59  ;;  %v3704_v59 = vld [vmem:[%s4923_s5 + $0x10] sm:$0xff]   ;;  %v3706_v11 = vld [vmem:[%s4923_s5] sm:$0xff]  }
 0x1da   :  { %v1587_v13 = vmax.f32 %v3343_v8, 0.0  ;;  %v1953_v60 = vrot.slane %v1945_v58, %v4628_v50 }
 0x1db   :  { %v1588_v14 = vmax.f32 %v3346_v12, 0.0 }
 0x1dc   :  { %v1589_v16 = vpack.c.bf16 %v1587_v13, %v1587_v13  ;;  %v1960_v1 = vrot.slane %v1953_v60, %v4628_v50 }
 0x1dd   :  { %v1590_v15 = vpack.c.bf16 %v1588_v14, %v1588_v14  ;;  %v3707_v14 = vld [vmem:[%s4923_s5 + $0x8] sm:$0xff]  }
 0x1df   :  { %3192 = vmatprep.mubr.msk.bf16.mxu1 %vm1698_vm3, %v1590_v15 }
 0x1e0   :  { %1739 = vmatmul.mubr.bf16.vlgmr.msra.gmra.mrb[8].mxu1 %v1589_v16 }
 0x1e1   :  { %3278 = vmatpush3.bf16.msra.mxu1 %v3702_v17  ;;  %3281 = vmatprep.mubr.msk.bf16.mxu1 %vm3856_vm5, %v3854_v46 }
 0x1e2   :  { %3279 = vmatprep.subr.bf16.mxu1 %v3854_v46 }
 0x1e5   :  { %3280 = vmatpush3.bf16.msra.mxu1 %v3703_v18  ;;  %v4714_v18 = vld [vmem:[%s4924_s6 + $0x1] ss:$0 sm:$0xff] }
 0x1e6   :  { %3285 = vmatprep.subr.bf16.mxu1 %v3854_v46 }
 0x2b3   :  { %v1740_v20 = vpop.f32.mrb[8].mxu1 }
 0x2b4   :  { %v1741_v21 = vadd.f32 %v3178_v33, %v1740_v20  ;;  %v1742_v22 = vpop.f32.mrb[9].mxu1 }
 0x2b5   :  { %v1743_v23 = vpop.f32.mrb[10].mxu1 }
 0x2b6   :  { %v1746_v24 = vmax.f32 %v1741_v21, 0.0  ;;  %v1744_v25 = vpop.f32.mrb[11].mxu1 }
 0x2b8   :  { %v1747_v26 = vpack.c.bf16 %v1746_v24, %v1746_v24  ;;  %v2042_v24 = vld [vmem:[#allocation5 + $0x2] sm:$0x3] }
 0x2ba   :  { %1749 = vst.msk [vmem:[#allocation2] sm:$0x1] %vm1748_vm6, %v1747_v26  ;;  %v1757_v27 = vrot.slane %v1747_v26, %v4628_v50 }
 0x2bc   :  { %v1758_v28 = vcombine.high %v1757_v27, %v1757_v27  ;;  %v1765_v29 = vrot.slane %v1757_v27, %v4628_v50 }
 0x2be   :  { %v1772_v30 = vrot.slane %v1758_v28, %v4628_v50  ;;  %v1776_v31 = vcombine.high %v1765_v29, %v1765_v29 }
 0x2c0   :  { %1775 = vst.msk [vmem:[#allocation2 + $0x1] sm:$0x1] %vm1748_vm6, %v1772_v30  ;;  %1779 = vst.msk [vmem:[#allocation2 + $0x2] sm:$0x1] %vm1748_vm6, %v1776_v31  ;;  %v1780_v32 = vcombine.high %v1772_v30, %v1772_v30 }
 0x2c1   :  { %v1791_v35 = vld [vmem:[#allocation2] sm:$0x1] }
 0x2c2   :  { %1783 = vst.msk [vmem:[#allocation2 + $0x3] sm:$0x1] %vm1748_vm6, %v1780_v32  ;;  %1792 = vst.msk [vmem:[#allocation3] sm:$0x1] %vm1748_vm6, %v1791_v35 }
 0x2c3   :  { %1814 = vst.msk [vmem:[#allocation3] sm:$0x1] %vm1813_vm7, %v1811_v34 }
 0x2c7   :  { %v2075_v12 = vld [vmem:[#allocation2 + $0x1] sm:$0x1] }
 0x2ca   :  { %v1815_v36 = vld [vmem:[#allocation3] sm:$0x1] }
 0x2cb   :  { %3282 = vmatmul.mubr.msk.bf16.vlgmr.msra.gmra.mrb[12].mxu1 %vm1839_vm8, %v1815_v36 }
 0x2cc   :  { %3289 = vmatprep.mubr.msk.bf16.mxu1 %vm3856_vm5, %v3854_v46  ;;  %3286 = vmatpush3.bf16.msra.mxu1 %v3704_v59 }
 0x2cd   :  { %3287 = vmatprep.subr.bf16.mxu1 %v3854_v46 }
 0x2d0   :  { %3288 = vmatpush3.bf16.msra.mxu1 %v3705_v62 }
 0x2d1   :  { %3293 = vmatprep.subr.bf16.mxu1 %v3854_v46 }
 0x39e   :  { %v1877_v38 = vpop.f32.mrb[12].mxu1 }
 0x39f   :  { %v1878_v39 = vadd.f32 %v4666_v37, %v1877_v38  ;;  %v3283_v40 = vpop.f32.mrb[13].mxu1 }
 0x3a0   :  { %v1880_v41 = vpop.f32.mrb[14].mxu1 }
 0x3a1   :  { %3718 = vtanh.f32 %v1878_v39  ;;  %v3284_v42 = vpop.f32.mrb[15].mxu1  ;;  %v3197_v44 = vmul.f32 -1.442695, %v1878_v39 }
 0x3a3   :  { %3720 = vpow2.f32 %v3197_v44 }
 0x3ab   :  { %v3719_v43 = vpop.eup %3718 }
 0x3ac   :  { %1897 = vrot.lane.b32.xlu0 %v3719_v43, %s3857_s10 }
 0x3ad   :  { %v3721_v45 = vpop.eup %3720 }
 0x3ae   :  { %v1886_v47 = vadd.f32 1.0, %v3721_v45 }
 0x3b0   :  { %3722 = vrcp.f32 %v1886_v47 }
 0x3ba   :  { %v3723_v48 = vpop.eup %3722 }
 0x3bb   :  { %v1895_v53 = vmul.f32 %v3723_v48, %v1893_v52 }
 0x41e   :  { %v1898_v49 = vpop.permute.xlu0 %1897 }
 0x41f   :  { %v1900_v51 = vmul.f32 %v3723_v48, %v1898_v49 }
 0x421   :  { %1902 = vrot.lane.b32.xlu1 %v1900_v51, %s3855_s3 }
 0x493   :  { %v1903_v54 = vpop.permute.xlu1 %1902 }
 0x494   :  { %v1905_v55 = vadd.f32 %v1903_v54, %v1895_v53 }
 0x496   :  { %3724 = vtanh.f32 %v1905_v55 }
 0x4a0   :  { %v3725_v56 = vpop.eup %3724 }
 0x4a1   :  { %1908 = vrot.lane.b32.xlu0 %v3725_v56, %s3858_s11 }
 0x513   :  { %v1909_v61 = vpop.permute.xlu0 %1908 }
 0x514   :  { %v1911_v63 = vmul.f32 %v3723_v48, %v1909_v61  ;;  %v3708_v61 = vld [vmem:[%s4923_s5 + $0x10] sm:$0xff]  }
 0x516   :  { %v1922_v0 = vpack.c.bf16 %v1911_v63, %v1911_v63  ;;  %1913 = vrot.lane.b32.xlu1 %v1911_v63, %s3859_s15  ;;  %v3709_v63 = vld [vmem:[%s4923_s5 + $0x18] sm:$0xff]  }
 0x518   :  { %v1930_v2 = vrot.slane %v1922_v0, %v4628_v50 }
 0x51a   :  { %v1937_v3 = vrot.slane %v1930_v2, %v4628_v50  ;;  %1961 = vrot.lane.b32.xlu1 %v1960_v1, %s3855_s3 }
 0x51c   :  { %1938 = vrot.lane.b32.xlu0 %v1937_v3, %s3859_s15 }
 0x588   :  { %v1914_v4 = vpop.permute.xlu1 %1913 }
 0x589   :  { %1916 = vst.msk [vmem:[#allocation4] sm:$0x3] %vm1784_vm2, %v1914_v4 }
 0x58c   :  { %v1962_v5 = vpop.permute.xlu1 %1961 }
 0x58e   :  { %v1939_v6 = vpop.permute.xlu0 %1938 }
 0x58f   :  { %1942 = vst.msk [vmem:[#allocation3] sm:$0x1] %vm1941_vm9, %v1939_v6 }
 0x590   :  { %1964 = vst.msk [vmem:[#allocation3] sm:$0x1] %vm1813_vm7, %v1962_v5  ;;  %v2077_v7 = vld [vmem:[#allocation4] sm:$0x3] }
 0x591   :  { %v2078_v9 = vpack.c.bf16 %v2077_v7, %v2077_v7 }
 0x593   :  { %v2086_v10 = vrot.slane %v2078_v9, %v4628_v50 }
 0x595   :  { %v2093_v8 = vrot.slane %v2086_v10, %v4628_v50 }
 0x597   :  { %v1965_v13 = vld [vmem:[#allocation3] sm:$0x1]  ;;  %2094 = vrot.lane.b32.xlu0 %v2093_v8, %s3855_s3 }
 0x598   :  { %2076 = vst.msk [vmem:[#allocation3] sm:$0x1] %vm1748_vm6, %v2075_v12  ;;  %3290 = vmatmul.mubr.msk.bf16.vlgmr.msra.gmra.mrb[16].mxu1 %vm1839_vm8, %v1965_v13 }
 0x599   :  { %3294 = vmatpush3.bf16.msra.mxu1 %v3706_v11  ;;  %3297 = vmatprep.mubr.msk.bf16.mxu1 %vm3856_vm5, %v3854_v46 }
 0x59a   :  { %3295 = vmatprep.subr.bf16.mxu1 %v3854_v46 }
 0x59b   :  { %1918 = vrot.lane.b32.xlu0 %v1905_v55, %s3860_s20 }
 0x59d   :  { %3296 = vmatpush3.bf16.msra.mxu1 %v3707_v14 }
 0x59e   :  { %3301 = vmatprep.subr.bf16.mxu1 %v3854_v46 }
 0x609   :  { %v2095_v15 = vpop.permute.xlu0 %2094 }
 0x60a   :  { %2097 = vst.msk [vmem:[#allocation3] sm:$0x1] %vm1813_vm7, %v2095_v15 }
 0x60d   :  { %v1919_v16 = vpop.permute.xlu0 %1918 }
 0x60e   :  { %1921 = vst.msk [vmem:[#allocation5] sm:$0x3] %vm1784_vm2, %v1919_v16  ;;  %v3710_v16 = vld [vmem:[%s4923_s5] sm:$0xff]  }
 0x611   :  { %v2098_v17 = vld [vmem:[#allocation3] sm:$0x1] }
 0x612   :  { %3298 = vmatmul.mubr.msk.bf16.vlgmr.msra.gmra.mrb[20].mxu1 %vm1839_vm8, %v2098_v17 }
 0x613   :  { %3305 = vmatprep.mubr.msk.bf16.mxu1 %vm3856_vm5, %v3854_v46  ;;  %3302 = vmatpush3.bf16.msra.mxu1 %v3708_v61 }
 0x614   :  { %3303 = vmatprep.subr.bf16.mxu1 %v3854_v46 }
 0x615   :  { %v2172_v38 = vld [vmem:[#allocation5] sm:$0x3] }
 0x617   :  { %3304 = vmatpush3.bf16.msra.mxu1 %v3709_v63 }
 0x618   :  { %3309 = vmatprep.subr.bf16.mxu1 %v3854_v46 }
 0x66b   :  { %v2028_v19 = vpop.f32.mrb[16].mxu1 }
 0x66c   :  { %v2029_v33 = vadd.f32 %v4714_v18, %v2028_v19  ;;  %v3291_v20 = vpop.f32.mrb[17].mxu1 }
 0x66d   :  { %v2031_v21 = vpop.f32.mrb[18].mxu1  ;;  %v3711_v20 = vld [vmem:[%s4923_s5 + $0x8] sm:$0xff]  }
 0x66e   :  { %3726 = vtanh.f32 %v2029_v33  ;;  %v3292_v22 = vpop.f32.mrb[19].mxu1  ;;  %v3207_v25 = vmul.f32 -1.442695, %v2029_v33  ;;  %v2353_v33 = vld [vmem:[#allocation2 + $0x2] sm:$0x1] }
 0x670   :  { %3728 = vpow2.f32 %v3207_v25 }
 0x678   :  { %v3727_v23 = vpop.eup %3726 }
 0x679   :  { %2049 = vrot.lane.b32.xlu1 %v3727_v23, %s3857_s10 }
 0x67a   :  { %v3729_v26 = vpop.eup %3728 }
 0x67b   :  { %v2037_v27 = vadd.f32 1.0, %v3729_v26 }
 0x67d   :  { %2044 = vrot.lane.b32.xlu1 %v2042_v24, %s3855_s3  ;;  %3730 = vrcp.f32 %v2037_v27 }
 0x687   :  { %v3731_v34 = vpop.eup %3730 }
 0x6e5   :  { %v2159_v28 = vpop.f32.mrb[20].mxu1 }
 0x6e6   :  { %v2160_v29 = vadd.f32 %v4666_v37, %v2159_v28  ;;  %v3299_v30 = vpop.f32.mrb[21].mxu1 }
 0x6e7   :  { %v2162_v31 = vpop.f32.mrb[22].mxu1 }
 0x6e8   :  { %3732 = vtanh.f32 %v2160_v29  ;;  %v3300_v32 = vpop.f32.mrb[23].mxu1  ;;  %v3212_v40 = vmul.f32 -1.442695, %v2160_v29 }
 0x6ea   :  { %3734 = vpow2.f32 %v3212_v40 }
 0x6eb   :  { %v2050_v35 = vpop.permute.xlu1 %2049 }
 0x6ec   :  { %v2052_v36 = vmul.f32 %v3731_v34, %v2050_v35 }
 0x6ee   :  { %2054 = vrot.lane.b32.xlu0 %v2052_v36, %s3855_s3 }
 0x6ef   :  { %v2045_v43 = vpop.permute.xlu1 %2044 }
 0x6f0   :  { %v2047_v44 = vmul.f32 %v3731_v34, %v2045_v43 }
 0x6f2   :  { %v3733_v39 = vpop.eup %3732  ;;  %2174 = vrot.lane.b32.xlu0 %v2172_v38, %s3855_s3 }
 0x6f3   :  { %2179 = vrot.lane.b32.xlu1 %v3733_v39, %s3857_s10 }
 0x6f4   :  { %v3735_v41 = vpop.eup %3734 }
 0x6f5   :  { %v2168_v42 = vadd.f32 1.0, %v3735_v41 }
 0x6f7   :  { %3736 = vrcp.f32 %v2168_v42 }
 0x701   :  { %v3737_v48 = vpop.eup %3736 }
 0x760   :  { %v2055_v45 = vpop.permute.xlu0 %2054 }
 0x761   :  { %v2057_v47 = vadd.f32 %v2055_v45, %v2047_v44 }
 0x763   :  { %3738 = vtanh.f32 %v2057_v47 }
 0x764   :  { %v2175_v53 = vpop.permute.xlu0 %2174 }
 0x765   :  { %v2180_v49 = vpop.permute.xlu1 %2179  ;;  %v2177_v54 = vmul.f32 %v3737_v48, %v2175_v53 }
 0x766   :  { %v2182_v51 = vmul.f32 %v3737_v48, %v2180_v49 }
 0x768   :  { %2184 = vrot.lane.b32.xlu1 %v2182_v51, %s3855_s3 }
 0x76d   :  { %v3739_v52 = vpop.eup %3738 }
 0x76e   :  { %2060 = vrot.lane.b32.xlu0 %v3739_v52, %s3858_s11 }
 0x7da   :  { %v2185_v55 = vpop.permute.xlu1 %2184 }
 0x7db   :  { %v2187_v56 = vadd.f32 %v2185_v55, %v2177_v54 }
 0x7dd   :  { %3740 = vtanh.f32 %v2187_v56 }
 0x7e0   :  { %v2061_v57 = vpop.permute.xlu0 %2060 }
 0x7e1   :  { %v2063_v58 = vmul.f32 %v3731_v34, %v2061_v57 }
 0x7e3   :  { %2065 = vrot.lane.b32.xlu1 %v2063_v58, %s3859_s15 }
 0x7e7   :  { %v3741_v59 = vpop.eup %3740 }
 0x7e8   :  { %2190 = vrot.lane.b32.xlu0 %v3741_v59, %s3858_s11 }
 0x855   :  { %v2066_v60 = vpop.permute.xlu1 %2065 }
 0x856   :  { %2068 = vst.msk [vmem:[#allocation4 + $0x2] sm:$0x3] %vm1784_vm2, %v2066_v60  ;;  %2074 = vst.msk [vmem:[#allocation6] sm:$0x3] %vm1784_vm2, %v2066_v60 }
 0x85a   :  { %v2191_v62 = vpop.permute.xlu0 %2190 }
 0x85b   :  { %v2193_v0 = vmul.f32 %v3737_v48, %v2191_v62 }
 0x85d   :  { %v2204_v1 = vpack.c.bf16 %v2193_v0, %v2193_v0  ;;  %2195 = vrot.lane.b32.xlu1 %v2193_v0, %s3859_s15  ;;  %v2224_v2 = vld [vmem:[#allocation4 + $0x2] sm:$0x3] }
 0x85e   :  { %v2225_v3 = vpack.c.bf16 %v2224_v2, %v2224_v2  ;;  %v3712_v2 = vld [vmem:[%s4923_s5 + $0x10] sm:$0xff]  }
 0x85f   :  { %v2212_v4 = vrot.slane %v2204_v1, %v4628_v50 }
 0x860   :  { %v2233_v5 = vrot.slane %v2225_v3, %v4628_v50 }
 0x861   :  { %v2219_v6 = vrot.slane %v2212_v4, %v4628_v50  ;;  %v3713_v4 = vld [vmem:[%s4923_s5 + $0x18] sm:$0xff]  }
 0x862   :  { %v2240_v7 = vrot.slane %v2233_v5, %v4628_v50 }
 0x863   :  { %2220 = vrot.lane.b32.xlu0 %v2219_v6, %s3859_s15 }
 0x864   :  { %2241 = vrot.lane.b32.xlu1 %v2240_v7, %s3855_s3 }
 0x868   :  { %2070 = vrot.lane.b32.xlu1 %v2057_v47, %s3860_s20 }
 0x86c   :  { %2200 = vrot.lane.b32.xlu1 %v2187_v56, %s3860_s20 }
 0x8cf   :  { %v2196_v9 = vpop.permute.xlu1 %2195 }
 0x8d0   :  { %2198 = vst.msk [vmem:[#allocation4] sm:$0x3] %vm1784_vm2, %v2196_v9 }
 0x8d5   :  { %v2221_v10 = vpop.permute.xlu0 %2220 }
 0x8d6   :  { %2223 = vst.msk [vmem:[#allocation3] sm:$0x1] %vm1941_vm9, %v2221_v10  ;;  %v2242_v8 = vpop.permute.xlu1 %2241 }
 0x8d7   :  { %2244 = vst.msk [vmem:[#allocation3] sm:$0x1] %vm1813_vm7, %v2242_v8  ;;  %v2355_v11 = vld [vmem:[#allocation4] sm:$0x3] }
 0x8d8   :  { %v2356_v12 = vpack.c.bf16 %v2355_v11, %v2355_v11 }
 0x8da   :  { %v2071_v13 = vpop.permute.xlu1 %2070  ;;  %v2364_v14 = vrot.slane %v2356_v12, %v4628_v50 }
 0x8db   :  { %2073 = vst.msk [vmem:[#allocation5 + $0x2] sm:$0x3] %vm1784_vm2, %v2071_v13 }
 0x8dc   :  { %v2371_v15 = vrot.slane %v2364_v14, %v4628_v50 }
 0x8de   :  { %v2201_v17 = vpop.permute.xlu1 %2200  ;;  %2372 = vrot.lane.b32.xlu0 %v2371_v15, %s3855_s3  ;;  %v2245_v19 = vld [vmem:[#allocation3] sm:$0x1] }
 0x8df   :  { %2203 = vst.msk [vmem:[#allocation5] sm:$0x3] %vm1784_vm2, %v2201_v17  ;;  %3306 = vmatmul.mubr.msk.bf16.vlgmr.msra.gmra.mrb[24].mxu1 %vm1839_vm8, %v2245_v19 }
 0x8e0   :  { %2354 = vst.msk [vmem:[#allocation3] sm:$0x1] %vm1748_vm6, %v2353_v33  ;;  %3310 = vmatpush3.bf16.msra.mxu1 %v3710_v16  ;;  %3313 = vmatprep.mubr.msk.bf16.mxu1 %vm3856_vm5, %v3854_v46 }
 0x8e1   :  { %3311 = vmatprep.subr.bf16.mxu1 %v3854_v46 }
 0x8e2   :  { %v2319_v29 = vld [vmem:[#allocation5 + $0x2] sm:$0x3] }
 0x8e4   :  { %3312 = vmatpush3.bf16.msra.mxu1 %v3711_v20 }
 0x8e5   :  { %3317 = vmatprep.subr.bf16.mxu1 %v3854_v46 }
 0x8e6   :  { %v2450_v43 = vld [vmem:[#allocation5] sm:$0x3] }
 0x950   :  { %v2373_v21 = vpop.permute.xlu0 %2372 }
 0x951   :  { %2375 = vst.msk [vmem:[#allocation3] sm:$0x1] %vm1813_vm7, %v2373_v21  ;;  %v3714_v21 = vld [vmem:[%s4923_s5] sm:$0xff]  }
 0x958   :  { %v2376_v22 = vld [vmem:[#allocation3] sm:$0x1] }
 0x959   :  { %3314 = vmatmul.mubr.msk.bf16.vlgmr.msra.gmra.mrb[28].mxu1 %vm1839_vm8, %v2376_v22  ;;  %v2631_v22 = vld [vmem:[#allocation2 + $0x3] sm:$0x1] }
 0x95a   :  { %3321 = vmatprep.mubr.msk.bf16.mxu1 %vm3856_vm5, %v3854_v46  ;;  %3318 = vmatpush3.bf16.msra.mxu1 %v3712_v2 }
 0x95b   :  { %3319 = vmatprep.subr.bf16.mxu1 %v3854_v46 }
 0x95e   :  { %3320 = vmatpush3.bf16.msra.mxu1 %v3713_v4 }
 0x95f   :  { %3325 = vmatprep.subr.bf16.mxu1 %v3854_v46 }
 0x9b2   :  { %v2306_v23 = vpop.f32.mrb[24].mxu1 }
 0x9b3   :  { %v2307_v24 = vadd.f32 %v4714_v18, %v2306_v23  ;;  %v3307_v25 = vpop.f32.mrb[25].mxu1 }
 0x9b4   :  { %v2309_v26 = vpop.f32.mrb[26].mxu1  ;;  %v3715_v25 = vld [vmem:[%s4923_s5 + $0x8] sm:$0xff]  }
 0x9b5   :  { %3742 = vtanh.f32 %v2307_v24  ;;  %v3308_v27 = vpop.f32.mrb[27].mxu1  ;;  %v3222_v30 = vmul.f32 -1.442695, %v2307_v24 }
 0x9b7   :  { %3744 = vpow2.f32 %v3222_v30 }
 0x9bf   :  { %v3743_v28 = vpop.eup %3742 }
 0x9c0   :  { %2326 = vrot.lane.b32.xlu0 %v3743_v28, %s3857_s10 }
 0x9c1   :  { %v3745_v31 = vpop.eup %3744 }
 0x9c2   :  { %v2315_v32 = vadd.f32 1.0, %v3745_v31 }
 0x9c4   :  { %2321 = vrot.lane.b32.xlu0 %v2319_v29, %s3855_s3  ;;  %3746 = vrcp.f32 %v2315_v32 }
 0x9ce   :  { %v3747_v40 = vpop.eup %3746 }
 0xa2c   :  { %v2437_v34 = vpop.f32.mrb[28].mxu1 }
 0xa2d   :  { %v2438_v35 = vadd.f32 %v4666_v37, %v2437_v34  ;;  %v3315_v36 = vpop.f32.mrb[29].mxu1 }
 0xa2e   :  { %v2440_v38 = vpop.f32.mrb[30].mxu1 }
 0xa2f   :  { %3748 = vtanh.f32 %v2438_v35  ;;  %v3316_v39 = vpop.f32.mrb[31].mxu1  ;;  %v3227_v45 = vmul.f32 -1.442695, %v2438_v35 }
 0xa31   :  { %3750 = vpow2.f32 %v3227_v45 }
 0xa32   :  { %v2327_v41 = vpop.permute.xlu0 %2326 }
 0xa33   :  { %v2329_v42 = vmul.f32 %v3747_v40, %v2327_v41 }
 0xa35   :  { %2331 = vrot.lane.b32.xlu1 %v2329_v42, %s3855_s3 }
 0xa36   :  { %v2322_v49 = vpop.permute.xlu0 %2321 }
 0xa37   :  { %v2324_v51 = vmul.f32 %v3747_v40, %v2322_v49 }
 0xa39   :  { %v3749_v44 = vpop.eup %3748  ;;  %2452 = vrot.lane.b32.xlu1 %v2450_v43, %s3855_s3 }
 0xa3a   :  { %2457 = vrot.lane.b32.xlu0 %v3749_v44, %s3857_s10 }
 0xa3b   :  { %v3751_v47 = vpop.eup %3750 }
 0xa3c   :  { %v2446_v48 = vadd.f32 1.0, %v3751_v47 }
 0xa3e   :  { %3752 = vrcp.f32 %v2446_v48 }
 0xa48   :  { %v3753_v54 = vpop.eup %3752 }
 0xaa7   :  { %v2332_v52 = vpop.permute.xlu1 %2331 }
 0xaa8   :  { %v2334_v53 = vadd.f32 %v2332_v52, %v2324_v51 }
 0xaaa   :  { %3754 = vtanh.f32 %v2334_v53 }
 0xaab   :  { %v2453_v58 = vpop.permute.xlu1 %2452 }
 0xaac   :  { %v2458_v55 = vpop.permute.xlu0 %2457  ;;  %v2455_v59 = vmul.f32 %v3753_v54, %v2453_v58 }
 0xaad   :  { %v2460_v56 = vmul.f32 %v3753_v54, %v2458_v55 }
 0xaaf   :  { %2462 = vrot.lane.b32.xlu0 %v2460_v56, %s3855_s3 }
 0xab4   :  { %v3755_v57 = vpop.eup %3754 }
 0xab5   :  { %2337 = vrot.lane.b32.xlu1 %v3755_v57, %s3858_s11 }
 0xb21   :  { %v2463_v60 = vpop.permute.xlu0 %2462 }
 0xb22   :  { %v2465_v61 = vadd.f32 %v2463_v60, %v2455_v59 }
 0xb24   :  { %3756 = vtanh.f32 %v2465_v61 }
 0xb27   :  { %v2338_v62 = vpop.permute.xlu1 %2337 }
 0xb28   :  { %v2340_v63 = vmul.f32 %v3747_v40, %v2338_v62 }
 0xb2a   :  { %2342 = vrot.lane.b32.xlu0 %v2340_v63, %s3859_s15 }
 0xb2e   :  { %v3757_v0 = vpop.eup %3756 }
 0xb2f   :  { %2468 = vrot.lane.b32.xlu1 %v3757_v0, %s3858_s11 }
 0xb9c   :  { %v2343_v1 = vpop.permute.xlu0 %2342 }
 0xb9d   :  { %2345 = vst.msk [vmem:[#allocation4 + $0x2] sm:$0x3] %vm1784_vm2, %v2343_v1  ;;  %2352 = vst.msk [vmem:[#allocation6 + $0x2] sm:$0x3] %vm1784_vm2, %v2343_v1 }
 0xba1   :  { %v2469_v3 = vpop.permute.xlu1 %2468 }
 0xba2   :  { %v2471_v5 = vmul.f32 %v3753_v54, %v2469_v3 }
 0xba4   :  { %v2482_v6 = vpack.c.bf16 %v2471_v5, %v2471_v5  ;;  %2473 = vrot.lane.b32.xlu0 %v2471_v5, %s3859_s15  ;;  %v2502_v7 = vld [vmem:[#allocation4 + $0x2] sm:$0x3] }
 0xba5   :  { %v2503_v9 = vpack.c.bf16 %v2502_v7, %v2502_v7 }
 0xba6   :  { %v2490_v10 = vrot.slane %v2482_v6, %v4628_v50  ;;  %v3716_v6 = vld [vmem:[%s4923_s5 + $0x10] sm:$0xff]  }
 0xba7   :  { %v2511_v8 = vrot.slane %v2503_v9, %v4628_v50  ;;  %v3717_v9 = vld [vmem:[%s4923_s5 + $0x18] sm:$0xff]   ;;  %s3861_s5 = smov [#allocation6]  }
 0xba8   :  { %v2497_v11 = vrot.slane %v2490_v10, %v4628_v50 }
 0xba9   :  { %v2518_v12 = vrot.slane %v2511_v8, %v4628_v50 }
 0xbaa   :  { %2498 = vrot.lane.b32.xlu1 %v2497_v11, %s3859_s15 }
 0xbab   :  { %2519 = vrot.lane.b32.xlu0 %v2518_v12, %s3855_s3 }
 0xbaf   :  { %2347 = vrot.lane.b32.xlu0 %v2334_v53, %s3860_s20 }
 0xbb3   :  { %2478 = vrot.lane.b32.xlu0 %v2465_v61, %s3860_s20 }
 0xc16   :  { %v2474_v13 = vpop.permute.xlu0 %2473 }
 0xc17   :  { %2476 = vst.msk [vmem:[#allocation4] sm:$0x3] %vm1784_vm2, %v2474_v13 }
 0xc1c   :  { %v2499_v14 = vpop.permute.xlu1 %2498 }
 0xc1d   :  { %2501 = vst.msk [vmem:[#allocation3] sm:$0x1] %vm1941_vm9, %v2499_v14  ;;  %v2520_v15 = vpop.permute.xlu0 %2519 }
 0xc1e   :  { %2522 = vst.msk [vmem:[#allocation3] sm:$0x1] %vm1813_vm7, %v2520_v15  ;;  %v2633_v16 = vld [vmem:[#allocation4] sm:$0x3] }
 0xc1f   :  { %v2634_v17 = vpack.c.bf16 %v2633_v16, %v2633_v16 }
 0xc21   :  { %v2348_v19 = vpop.permute.xlu0 %2347  ;;  %v2642_v33 = vrot.slane %v2634_v17, %v4628_v50 }
 0xc22   :  { %2350 = vst.msk [vmem:[#allocation5 + $0x2] sm:$0x3] %vm1784_vm2, %v2348_v19 }
 0xc23   :  { %v2649_v20 = vrot.slane %v2642_v33, %v4628_v50 }
 0xc25   :  { %v2479_v23 = vpop.permute.xlu0 %2478  ;;  %2650 = vrot.lane.b32.xlu1 %v2649_v20, %s3855_s3  ;;  %v2523_v24 = vld [vmem:[#allocation3] sm:$0x1] }
 0xc26   :  { %2481 = vst.msk [vmem:[#allocation5] sm:$0x3] %vm1784_vm2, %v2479_v23  ;;  %3322 = vmatmul.mubr.msk.bf16.vlgmr.msra.gmra.mrb[32].mxu1 %vm1839_vm8, %v2523_v24 }
 0xc27   :  { %2632 = vst.msk [vmem:[#allocation3] sm:$0x1] %vm1748_vm6, %v2631_v22  ;;  %3326 = vmatpush3.bf16.msra.mxu1 %v3714_v21  ;;  %3329 = vmatprep.mubr.msk.bf16.mxu1 %vm3856_vm5, %v3854_v46 }
 0xc28   :  { %3327 = vmatprep.subr.bf16.mxu1 %v3854_v46 }
 0xc29   :  { %v2597_v35 = vld [vmem:[#allocation5 + $0x2] sm:$0x3] }
 0xc2b   :  { %3328 = vmatpush3.bf16.msra.mxu1 %v3715_v25 }
 0xc2c   :  { %3333 = vmatprep.subr.bf16.mxu1 %v3854_v46 }
 0xc2d   :  { %v2728_v49 = vld [vmem:[#allocation5] sm:$0x3] }
 0xc97   :  { %v2651_v26 = vpop.permute.xlu1 %2650 }
 0xc98   :  { %2653 = vst.msk [vmem:[#allocation3] sm:$0x1] %vm1813_vm7, %v2651_v26 }
 0xc9f   :  { %v2654_v27 = vld [vmem:[#allocation3] sm:$0x1] }
 0xca0   :  { %3330 = vmatmul.mubr.msk.bf16.vlgmr.msra.gmra.mrb[36].mxu1 %vm1839_vm8, %v2654_v27 }
 0xca1   :  { %3337 = vmatprep.mubr.msk.bf16.mxu1 %vm3856_vm5, %v3854_v46  ;;  %3334 = vmatpush3.bf16.msra.mxu1 %v3716_v6 }
 0xca2   :  { %3335 = vmatprep.subr.bf16.mxu1 %v3854_v46 }
 0xca5   :  { %3336 = vmatpush3.bf16.msra.mxu1 %v3717_v9 }
 0xcf9   :  { %v2584_v28 = vpop.f32.mrb[32].mxu1 }
 0xcfa   :  { %v2585_v29 = vadd.f32 %v4714_v18, %v2584_v28  ;;  %v3323_v30 = vpop.f32.mrb[33].mxu1 }
 0xcfb   :  { %v2587_v31 = vpop.f32.mrb[34].mxu1 }
 0xcfc   :  { %3758 = vtanh.f32 %v2585_v29  ;;  %v3324_v32 = vpop.f32.mrb[35].mxu1  ;;  %v3237_v36 = vmul.f32 -1.442695, %v2585_v29 }
 0xcfe   :  { %3760 = vpow2.f32 %v3237_v36 }
 0xd06   :  { %v3759_v34 = vpop.eup %3758 }
 0xd07   :  { %2604 = vrot.lane.b32.xlu1 %v3759_v34, %s3857_s10 }
 0xd08   :  { %v3761_v38 = vpop.eup %3760 }
 0xd09   :  { %v2593_v39 = vadd.f32 1.0, %v3761_v38 }
 0xd0b   :  { %2599 = vrot.lane.b32.xlu1 %v2597_v35, %s3855_s3  ;;  %3762 = vrcp.f32 %v2593_v39 }
 0xd15   :  { %v3763_v45 = vpop.eup %3762 }
 0xd73   :  { %v2715_v40 = vpop.f32.mrb[36].mxu1 }
 0xd74   :  { %v2716_v41 = vadd.f32 %v4666_v37, %v2715_v40  ;;  %v3331_v42 = vpop.f32.mrb[37].mxu1 }
 0xd75   :  { %v2718_v43 = vpop.f32.mrb[38].mxu1 }
 0xd76   :  { %3764 = vtanh.f32 %v2716_v41  ;;  %v3332_v44 = vpop.f32.mrb[39].mxu1  ;;  %v3242_v52 = vmul.f32 -1.442695, %v2716_v41 }
 0xd78   :  { %3766 = vpow2.f32 %v3242_v52 }
 0xd79   :  { %v2605_v47 = vpop.permute.xlu1 %2604 }
 0xd7a   :  { %v2607_v48 = vmul.f32 %v3763_v45, %v2605_v47 }
 0xd7c   :  { %2609 = vrot.lane.b32.xlu0 %v2607_v48, %s3855_s3 }
 0xd7d   :  { %v2600_v37 = vpop.permute.xlu1 %2599 }
 0xd7e   :  { %v2602_v55 = vmul.f32 %v3763_v45, %v2600_v37 }
 0xd80   :  { %v3765_v51 = vpop.eup %3764  ;;  %2730 = vrot.lane.b32.xlu0 %v2728_v49, %s3855_s3 }
 0xd81   :  { %2735 = vrot.lane.b32.xlu1 %v3765_v51, %s3857_s10 }
 0xd82   :  { %v3767_v53 = vpop.eup %3766 }
 0xd83   :  { %v2724_v54 = vadd.f32 1.0, %v3767_v53 }
 0xd85   :  { %3768 = vrcp.f32 %v2724_v54 }
 0xd8f   :  { %v3769_v58 = vpop.eup %3768 }
 0xdee   :  { %v2610_v56 = vpop.permute.xlu0 %2609 }
 0xdef   :  { %v2612_v57 = vadd.f32 %v2610_v56, %v2602_v55 }
 0xdf1   :  { %3770 = vtanh.f32 %v2612_v57 }
 0xdf2   :  { %v2731_v62 = vpop.permute.xlu0 %2730 }
 0xdf3   :  { %v2736_v59 = vpop.permute.xlu1 %2735  ;;  %v2733_v63 = vmul.f32 %v3769_v58, %v2731_v62 }
 0xdf4   :  { %v2738_v60 = vmul.f32 %v3769_v58, %v2736_v59 }
 0xdf6   :  { %2740 = vrot.lane.b32.xlu1 %v2738_v60, %s3855_s3 }
 0xdfb   :  { %v3771_v61 = vpop.eup %3770 }
 0xdfc   :  { %2615 = vrot.lane.b32.xlu0 %v3771_v61, %s3858_s11 }
 0xe68   :  { %v2741_v0 = vpop.permute.xlu1 %2740 }
 0xe69   :  { %v2743_v1 = vadd.f32 %v2741_v0, %v2733_v63 }
 0xe6b   :  { %3772 = vtanh.f32 %v2743_v1 }
 0xe6e   :  { %v2616_v2 = vpop.permute.xlu0 %2615 }
 0xe6f   :  { %v2618_v3 = vmul.f32 %v3763_v45, %v2616_v2 }
 0xe71   :  { %2620 = vrot.lane.b32.xlu1 %v2618_v3, %s3859_s15 }
 0xe75   :  { %v3773_v4 = vpop.eup %3772 }
 0xe76   :  { %2746 = vrot.lane.b32.xlu0 %v3773_v4, %s3858_s11 }
 0xee3   :  { %v2621_v5 = vpop.permute.xlu1 %2620 }
 0xee4   :  { %2623 = vst.msk [vmem:[#allocation4 + $0x2] sm:$0x3] %vm1784_vm2, %v2621_v5  ;;  %2630 = vst.msk [vmem:[#allocation6 + $0x4] sm:$0x3] %vm1784_vm2, %v2621_v5 }
 0xee8   :  { %v2747_v7 = vpop.permute.xlu0 %2746 }
 0xee9   :  { %v2749_v10 = vmul.f32 %v3769_v58, %v2747_v7 }
 0xeeb   :  { %v2760_v8 = vpack.c.bf16 %v2749_v10, %v2749_v10  ;;  %v2780_v11 = vld [vmem:[#allocation4 + $0x2] sm:$0x3] }
 0xeec   :  { %v2781_v12 = vpack.c.bf16 %v2780_v11, %v2780_v11 }
 0xeed   :  { %v2768_v13 = vrot.slane %v2760_v8, %v4628_v50 }
 0xeee   :  { %v2789_v14 = vrot.slane %v2781_v12, %v4628_v50 }
 0xeef   :  { %v2775_v15 = vrot.slane %v2768_v13, %v4628_v50 }
 0xef0   :  { %v2796_v16 = vrot.slane %v2789_v14, %v4628_v50 }
 0xef1   :  { %2776 = vrot.lane.b32.xlu1 %v2775_v15, %s3859_s15 }
 0xef2   :  { %2797 = vrot.lane.b32.xlu0 %v2796_v16, %s3855_s3 }
 0xef5   :  { %2625 = vrot.lane.b32.xlu1 %v2612_v57, %s3860_s20 }
 0xf63   :  { %v2777_v46 = vpop.permute.xlu1 %2776 }
 0xf64   :  { %2779 = vst.msk [vmem:[#allocation3] sm:$0x1] %vm1941_vm9, %v2777_v46  ;;  %v2798_v17 = vpop.permute.xlu0 %2797 }
 0xf65   :  { %2800 = vst.msk [vmem:[#allocation3] sm:$0x1] %vm1813_vm7, %v2798_v17 }
 0xf67   :  { %v2626_v19 = vpop.permute.xlu1 %2625 }
 0xf68   :  { %2628 = vst.msk [vmem:[#allocation5 + $0x2] sm:$0x3] %vm1784_vm2, %v2626_v19 }
 0xf6c   :  { %v2801_v33 = vld [vmem:[#allocation3] sm:$0x1] }
 0xf6d   :  { %3338 = vmatmul.mubr.msk.bf16.vlgmr.msra.gmra.mrb[40].mxu1 %vm1839_vm8, %v2801_v33 }
 0xf6f   :  { %v2875_v20 = vld [vmem:[#allocation5 + $0x2] sm:$0x3] }
 0xf70   :  { %2877 = vrot.lane.b32.xlu1 %v2875_v20, %s3855_s3 }
0x1040   :  { %v2862_v50 = vpop.f32.mrb[40].mxu1 }
0x1041   :  { %v2863_v21 = vadd.f32 %v4714_v18, %v2862_v50  ;;  %v3339_v22 = vpop.f32.mrb[41].mxu1  ;;  %v2878_v18 = vpop.permute.xlu1 %2877 }
0x1042   :  { %v2865_v23 = vpop.f32.mrb[42].mxu1 }
0x1043   :  { %3774 = vtanh.f32 %v2863_v21  ;;  %v3340_v24 = vpop.f32.mrb[43].mxu1  ;;  %v3252_v26 = vmul.f32 -1.442695, %v2863_v21 }
0x1045   :  { %3776 = vpow2.f32 %v3252_v26 }
0x104d   :  { %v3775_v25 = vpop.eup %3774 }
0x104e   :  { %2882 = vrot.lane.b32.xlu0 %v3775_v25, %s3857_s10 }
0x104f   :  { %v3777_v27 = vpop.eup %3776 }
0x1050   :  { %v2871_v28 = vadd.f32 1.0, %v3777_v27 }
0x1052   :  { %3778 = vrcp.f32 %v2871_v28 }
0x105c   :  { %v3779_v29 = vpop.eup %3778 }
0x105d   :  { %v2880_v32 = vmul.f32 %v3779_v29, %v2878_v18 }
0x10c0   :  { %v2883_v30 = vpop.permute.xlu0 %2882 }
0x10c1   :  { %v2885_v31 = vmul.f32 %v3779_v29, %v2883_v30 }
0x10c3   :  { %2887 = vrot.lane.b32.xlu0 %v2885_v31, %s3855_s3  ;;  %s2922_s3 = sshll.u32 %s3861_s5, 4  ;;  %s2923_s3 = int_to_ptr.vmem [resolvable:$true] %s2922_s3 }
0x10c4   :  { %s3782_s10 = scalar_lea.vmem %s2923_s3, 128  ;;  %p3787_p1 = scmp.lt.s32.totalorder %s2923_s3, %s2923_s3 }
0x10c5   :  { %p3783_p0 = scmp.ne.s32.totalorder %s2923_s3, %s3782_s10  ;;  %p3788_p2 = scmp.lt.s32.totalorder %s3782_s10, %s3782_s10 }
0x10c7   :  { %2751 = vrot.lane.b32.xlu0 %v2749_v10, %s3859_s15  ;;  %p3789_p3 = por %p3788_p2, %p3787_p1 }
0x10c9   :  { %p3790_p4 = pnand %p3789_p3, %p3783_p0 }
0x10cb   :  { %2756 = vrot.lane.b32.xlu0 %v2743_v1, %s3860_s20 }
0x1135   :  { %v2888_v34 = vpop.permute.xlu0 %2887 }
0x1136   :  { %v2890_v35 = vadd.f32 %v2888_v34, %v2880_v32 }
0x1138   :  { %3780 = vtanh.f32 %v2890_v35 }
0x1139   :  { %v2752_v36 = vpop.permute.xlu0 %2751 }
0x113a   :  { %2754 = vst.msk [vmem:[#allocation4] sm:$0x3] %vm1784_vm2, %v2752_v36 }
0x113d   :  { %v2757_v38 = vpop.permute.xlu0 %2756 }
0x113e   :  { %2759 = vst.msk [vmem:[#allocation5] sm:$0x3] %vm1784_vm2, %v2757_v38 }
0x1141   :  { %v2909_v39 = vld [vmem:[#allocation4] sm:$0x3] }
0x1142   :  { %v3781_v40 = vpop.eup %3780  ;;  %2911 = vst.msk [vmem:[#allocation8] sm:$0x3] %vm1784_vm2, %v2909_v39 }
0x1143   :  { %2893 = vrot.lane.b32.xlu1 %v3781_v40, %s3858_s11 }
0x1145   :  { %v2913_v41 = vld [vmem:[#allocation5] sm:$0x3] }
0x1146   :  { %2915 = vst.msk [vmem:[#allocation10] sm:$0x3] %vm1784_vm2, %v2913_v41 }
0x11b5   :  { %v2894_v42 = vpop.permute.xlu1 %2893 }
0x11b6   :  { %v2896_v43 = vmul.f32 %v3779_v29, %v2894_v42 }
0x11b8   :  { %2898 = vrot.lane.b32.xlu1 %v2896_v43, %s3859_s15 }
0x11bc   :  { %2903 = vrot.lane.b32.xlu1 %v2890_v35, %s3860_s20 }
0x122a   :  { %v2899_v44 = vpop.permute.xlu1 %2898 }
0x122b   :  { %2901 = vst.msk [vmem:[#allocation4 + $0x2] sm:$0x3] %vm1784_vm2, %v2899_v44  ;;  %2908 = vst.msk [vmem:[#allocation6 + $0x6] sm:$0x3] %vm1784_vm2, %v2899_v44 }
0x122c   :  { %3793 = shalt.err (!%p3790_p4)
}
0x122d   :  { %s3794_s15 = scalar_lea.hbm %s4925_s7, 128 }
0x122e   :  { %p3795_p5 = scmp.ne.s32.totalorder %s4925_s7, %s3794_s15  ;;  %p3798_p6 = scmp.lt.u32.totalorder %s3794_s15, %s4925_s7 }
0x1230   :  { %p3800_p7 = pnand %p3798_p6, %p3795_p5 }
0x1232   :  { %3803 = shalt.err (!%p3800_p7)
}
0x1233   :  { %s3862_s25 = smov 2   ;;  %v2904_v45 = vpop.permute.xlu1 %2903  ;;  %s3863_s27 = smov [#allocation8]   ;;  %v2910_v47 = vld [vmem:[#allocation4 + $0x2] sm:$0x3] }
0x1234   :  { %2928 = dma.vmem_to_hbm [thread:$0]  %s2923_s3, 128, %s4925_s7, [#allocation7], %s3858_s11, %s3858_s11, %s3862_s25   ;;  %2906 = vst.msk [vmem:[#allocation5 + $0x2] sm:$0x3] %vm1784_vm2, %v2904_v45  ;;  %2912 = vst.msk [vmem:[#allocation8 + $0x2] sm:$0x3] %vm1784_vm2, %v2910_v47 }
0x1235   :  { %s2934_s28 = sshll.u32 %s3863_s27, 4  ;;  %s3864_s0 = smov [#allocation10]   ;;  %s2935_s28 = int_to_ptr.vmem [resolvable:$true] %s2934_s28 }
0x1236   :  { %s2946_s29 = sshll.u32 %s3864_s0, 4  ;;  %s3804_s4 = scalar_lea.vmem %s2935_s28, 64  ;;  %s2947_s29 = int_to_ptr.vmem [resolvable:$true] %s2946_s29 }
0x1237   :  { %p3805_p8 = scmp.ne.s32.totalorder %s2935_s28, %s3804_s4  ;;  %p3809_p9 = scmp.lt.s32.totalorder %s2935_s28, %s2935_s28 }
0x1238   :  { %p3810_p10 = scmp.lt.s32.totalorder %s3804_s4, %s3804_s4 }
0x123a   :  { %p3811_p11 = por %p3810_p10, %p3809_p9 }
0x123c   :  { %p3812_p12 = pnand %p3811_p11, %p3805_p8 }
0x123e   :  { %3815 = shalt.err (!%p3812_p12)
}
0x123f   :  { %s3816_s12 = scalar_lea.hbm %s4926_s8, 64 }
0x1240   :  { %p3817_p13 = scmp.ne.s32.totalorder %s4926_s8, %s3816_s12  ;;  %p3820_p0 = scmp.lt.u32.totalorder %s3816_s12, %s4926_s8 }
0x1242   :  { %p3822_p1 = pnand %p3820_p0, %p3817_p13 }
0x1244   :  { %3825 = shalt.err (!%p3822_p1)
}
0x1245   :  { %2940 = dma.vmem_to_hbm [thread:$0]  %s2935_s28, 64, %s4926_s8, [#allocation9], %s3858_s11, %s3858_s11, %s3862_s25   ;;  %v2914_v48 = vld [vmem:[#allocation5 + $0x2] sm:$0x3] }
0x1246   :  { %2916 = vst.msk [vmem:[#allocation10 + $0x2] sm:$0x3] %vm1784_vm2, %v2914_v48  ;;  %s3826_s19 = scalar_lea.vmem %s2947_s29, 64  ;;  %p3831_p3 = scmp.lt.s32.totalorder %s2947_s29, %s2947_s29 }
0x1247   :  { %p3827_p2 = scmp.ne.s32.totalorder %s2947_s29, %s3826_s19  ;;  %p3832_p4 = scmp.lt.s32.totalorder %s3826_s19, %s3826_s19 }
0x1249   :  { %p3833_p5 = por %p3832_p4, %p3831_p3 }
0x124b   :  { %p3834_p6 = pnand %p3833_p5, %p3827_p2 }
0x124d   :  { %3837 = shalt.err (!%p3834_p6)
}
0x124e   :  { %s3838_s10 = scalar_lea.hbm %s4927_s9, 64 }
0x124f   :  { %p3839_p7 = scmp.ne.s32.totalorder %s4927_s9, %s3838_s10  ;;  %p3842_p8 = scmp.lt.u32.totalorder %s3838_s10, %s4927_s9 }
0x1251   :  { %p3844_p9 = pnand %p3842_p8, %p3839_p7 }
0x1253   :  { %3847 = shalt.err (!%p3844_p9)
}
0x1254   :  { %2952 = dma.vmem_to_hbm [thread:$0]  %s2947_s29, 64, %s4927_s9, [#allocation9], %s3858_s11, %s3858_s11, %s3862_s25  }
0x1255   :  { %3848 = dma.done.wait [#allocation7], 128  }
0x1256   :  { %3849 = vsyncadd [#allocation7], 4294967168 }
0x1257   :  { %3850 = dma.done.wait [#allocation9], 128  }
0x1258   :  { %3851 = vsyncadd [#allocation9], 4294967168 }
0x1259   :  { %2962 = vsyncpa [#allocation7], 1 }
0x125a   :  { %2963 = vsyncpa [#allocation9], 1 }

</bundles_post_ra>
